<compile_context>
chip_gen: v6e
topology: v6e:2x2x1
jax: 0.10.0
libtpu: 0.0.40
codegen_flags: <defaults>
</compile_context>

<pallas_src>
import functools

import jax
import jax.numpy as jnp
from jax.experimental import pallas as pl
from jax.experimental.pallas import tpu as pltpu

MEAN = 0.1307
SIGMA = 0.3081
_LANES = 128
_MIN_PALLAS_BYTES = 1 << 20          # below this, plain JAX (XLA fuses for free)
_MAX_BLOCK_BYTES = 16 * 1024 * 1024  # safety cap for extreme-aspect unaligned shapes


def _target_block_bytes():
    """Per-generation block target: big enough to hide the ~0.35us/step grid
    overhead, small enough that (in + out) x 2 double-buffers fit the default
    scoped-VMEM limit (v5e 16 MiB, v6e 32 MiB, v7x 32/64 MiB)."""
    try:
        kind = jax.devices()[0].device_kind.lower()
    except Exception:  # pragma: no cover - defensive
        kind = ""
    if "v7" in kind:
        return 6 * 1024 * 1024   # 3.2 TB/s HBM; 4 bufs = 24 MiB, under default limit
    if "v6" in kind:
        return 4 * 1024 * 1024   # 4 bufs = 16 MiB, fits 32 MiB default
    return 2 * 1024 * 1024       # v5e / unknown: 4 bufs = 8 MiB, fits 16 MiB default


def _normalize_kernel(x_ref, o_ref, *, inv_sigma, bias):
    xv = x_ref[...].astype(jnp.float32)
    o_ref[...] = (xv * inv_sigma + bias).astype(o_ref.dtype)


def normalization_forward(x, mean=MEAN, sigma=SIGMA):
    """Pallas implementation of (x - mean) / sigma for an NCHW tensor."""
    mean_f = float(mean)
    inv_sigma = float(1.0 / sigma)          # differs from /sigma only in last ulp
    bias = -mean_f * inv_sigma              # y = x*inv_sigma + bias

    # torchvision Normalize is float-only; match PyTorch promotion for ints.
    if not jnp.issubdtype(x.dtype, jnp.floating):
        x = x.astype(jnp.float32)

    orig_shape = x.shape
    dtype = x.dtype
    n = x.size
    itemsize = jnp.dtype(dtype).itemsize

    # Small-tensor fallback: pallas_call launch + DMA round trip dominates.
    if n == 0 or n * itemsize < _MIN_PALLAS_BYTES:
        return (x * inv_sigma + bias).astype(dtype)

    # ----- choose a padding-free 2-D view ---------------------------------
    if n % _LANES == 0:
        # Lane-dense fast path: every vreg row fully populated, unmasked stores.
        n_rows, n_cols = n // _LANES, _LANES
    else:
        # Collapse trailing dims until the row length is >= 128.  The block's
        # last dim equals the full array dim, so the (8,128) rule is satisfied
        # with NO padding and no extra HBM passes; only the trailing partial
        # vreg of each row is lane-masked on store.
        n_cols = 1
        i = len(orig_shape)
        while i > 0 and n_cols < _LANES:
            i -= 1
            n_cols *= int(orig_shape[i])
        n_rows = n // n_cols

    # ----- row tile: generation-specific target, multiple of 8 ------------
    block_bytes = _target_block_bytes()
    if n_rows < 8:
        row_tile = n_rows                                   # full dim (rule-compliant)
    else:
        row_tile = max(8, (block_bytes // (n_cols * itemsize)) // 8 * 8)
        row_tile = min(row_tile, max(8, (n_rows // 8) * 8))  # don't exceed array

    per_block_bytes = row_tile * n_cols * itemsize
    if per_block_bytes > _MAX_BLOCK_BYTES:
        # TODO(synk): tile along the column axis for extreme-aspect-ratio
        # unaligned shapes; plain JAX stays correct here.
        return (x * inv_sigma + bias).astype(dtype)

    # Only raise the scoped-VMEM limit if the double-buffered footprint might
    # exceed the smallest default; keep it well under v7x's 64 MiB physical.
    vmem_limit = 48 * 1024 * 1024 if 4 * per_block_bytes > 24 * 1024 * 1024 else None

    x2d = x.reshape(n_rows, n_cols)
    grid = (pl.cdiv(n_rows, row_tile),)
    kernel = functools.partial(_normalize_kernel, inv_sigma=inv_sigma, bias=bias)

    out2d = pl.pallas_call(
        kernel,
        out_shape=jax.ShapeDtypeStruct((n_rows, n_cols), dtype),
        grid=grid,
        in_specs=[pl.BlockSpec((row_tile, n_cols), lambda i: (i, 0))],
        out_specs=pl.BlockSpec((row_tile, n_cols), lambda i: (i, 0)),
        compiler_params=pltpu.CompilerParams(
            dimension_semantics=("parallel",),
            vmem_limit_bytes=vmem_limit,
        ),
        cost_estimate=pl.CostEstimate(
            flops=2 * n, transcendentals=0, bytes_accessed=2 * n * itemsize),
    )(x2d)

    return out2d.reshape(orig_shape)


if __name__ == "__main__":
    key = jax.random.PRNGKey(0)
    k1, k2, k3, k4 = jax.random.split(key, 4)

    def ref(xf):
        return (xf - MEAN) / SIGMA

    # 1) Small NCHW input (the module's typical shape): plain-JAX fallback path.
    x_small = jax.random.uniform(k1, (2, 4, 16, 16), dtype=jnp.float32)
    y = jax.block_until_ready(normalization_forward(x_small))
    assert y.shape == x_small.shape and y.dtype == x_small.dtype
    assert jnp.allclose(y, ref(x_small), atol=1e-5, rtol=1e-5)

    # 2) Larger 128-aligned input: lane-dense (rows, 128) Pallas path.
    x_big = jax.random.uniform(k2, (8, 4, 128, 128), dtype=jnp.float32)
    y = jax.block_until_ready(normalization_forward(x_big))
    assert y.shape == x_big.shape and y.dtype == x_big.dtype
    assert jnp.allclose(y, ref(x_big), atol=1e-5, rtol=1e-5)

    # 3) Non-128-aligned input: padding-free (N*C, H*W) Pallas path.
    x_odd = jax.random.uniform(k3, (16, 3, 101, 101), dtype=jnp.float32)
    y = jax.block_until_ready(normalization_forward(x_odd))
    assert y.shape == x_odd.shape and y.dtype == x_odd.dtype
    assert jnp.allclose(y, ref(x_odd), atol=1e-5, rtol=1e-5)

    # 4) Integer (uint8 image) input: promoted to float32 output.
    x_u8 = jax.random.randint(k4, (2, 1, 28, 28), 0, 256, dtype=jnp.int32).astype(jnp.uint8)
    y = jax.block_until_ready(normalization_forward(x_u8))
    assert y.shape == x_u8.shape and y.dtype == jnp.float32
    assert jnp.allclose(y, ref(x_u8.astype(jnp.float32)), atol=1e-5, rtol=1e-5)

    print("KERNEL_OK")
</pallas_src>

<mosaic_0001>
module attributes {stable_mosaic.version = 11 : i64} {
  func.func @_normalize_kernel(%arg0: i32, %arg1: memref<4096x128xf32, #tpu.memory_space<vmem>>, %arg2: memref<4096x128xf32, #tpu.memory_space<vmem>>) attributes {dimension_semantics = [#tpu.dimension_semantics<parallel>], iteration_bounds = array<i64: 1>, scalar_prefetch = 0 : i64, scratch_operands = 0 : i64, tpu.core_type = #tpu.core_type<tc>, window_params = [{transform_indices = @transform_0, window_bounds = array<i64: 4096, 128>}, {transform_indices = @transform_1, window_bounds = array<i64: 4096, 128>}]} {
    %c0 = arith.constant 0 : index
    %c0_0 = arith.constant 0 : index
    %0 = vector.load %arg1[%c0, %c0_0] : memref<4096x128xf32, #tpu.memory_space<vmem>>, vector<4096x128xf32>
    %cst = arith.constant 3.24569941 : f32
    %1 = vector.broadcast %cst : f32 to vector<4096x128xf32>
    %2 = arith.mulf %0, %1 : vector<4096x128xf32>
    %cst_1 = arith.constant -0.424212933 : f32
    %3 = vector.broadcast %cst_1 : f32 to vector<4096x128xf32>
    %4 = arith.addf %2, %3 : vector<4096x128xf32>
    %c0_2 = arith.constant 0 : index
    %c0_3 = arith.constant 0 : index
    %5 = vector.load %arg2[%c0_2, %c0_3] : memref<4096x128xf32, #tpu.memory_space<vmem>>, vector<4096x128xf32>
    tpu.vector_store %arg2[%c0_2, %c0_3], %4 {strides = array<i32>} : memref<4096x128xf32, #tpu.memory_space<vmem>>, vector<4096x128xf32>,
    return
  }
  func.func @transform_0(%arg0: i32) -> (i32, i32) {
    %c0_i32 = arith.constant 0 : i32
    %c0_i32_0 = arith.constant 0 : i32
    return %arg0, %c0_i32 : i32, i32
  }
  func.func @transform_1(%arg0: i32) -> (i32, i32) {
    %c0_i32 = arith.constant 0 : i32
    %c0_i32_0 = arith.constant 0 : i32
    return %arg0, %c0_i32 : i32, i32
  }
}

</mosaic_0001>

<bundles_post_ra>
// kernel: tpu_custom_call.1
= control target key start
LH: loop header
LB: loop body
LE: loop exit
PB: predicated region body
PF: predicated region fallthrough
CT: control target
= control target key end

     0   :  { %6 = vsyncpa [#allocation3], 0  ;;  %s2162_s0 = inlined_call_operand.hbm [shape: f32[4096,128], index: 0, kind: input, shape index: {}]   ;;  %s2163_s1 = inlined_call_operand.hbm [shape: f32[4096,128], index: 1, kind: output, shape index: {}]  }
   0x1   :  { %7 = vsyncpa [#allocation4], 0  ;;  %s2136_s6 = smov [#allocation2]  }
   0x2   :  { %s13_s7 = sshll.u32 %s2136_s6, 4  ;;  %s14_s7 = int_to_ptr.vmem [resolvable:$true] %s13_s7 }
   0x3   :  { %s2100_s8 = scalar_lea.vmem %s14_s7, 65536  ;;  %p2105_p1 = scmp.lt.s32.totalorder %s14_s7, %s14_s7 }
   0x4   :  { %p2101_p0 = scmp.ne.s32.totalorder %s14_s7, %s2100_s8  ;;  %p2106_p2 = scmp.lt.s32.totalorder %s2100_s8, %s2100_s8 }
   0x6   :  { %p2107_p3 = por %p2106_p2, %p2105_p1 }
   0x8   :  { %p2108_p4 = pnand %p2107_p3, %p2101_p0 }
   0xa   :  { %2111 = shalt.err (!%p2108_p4)
}
   0xb   :  { %s2137_s9 = smov 128   ;;  %s2138_s10 = smov 8  }
   0xc   :  { %19 = dma.hbm_to_vmem [thread:$0]  %s2162_s0, 65536, %s14_s7, [#allocation3], %s2137_s9, %s2137_s9, %s2138_s10  }
   0xd   :  { %2132 = dma.done.wait [#allocation3], 65536  }
   0xe   :  { %2133 = vsyncadd [#allocation3], 4294901760  ;;  %v23_v0 = vld [vmem:[#allocation2] sm:$0xff]  ;;  %v24_v1 = vld [vmem:[#allocation2 + $0x8] sm:$0xff]  ;;  %s2139_s0 = smov [#allocation5]  }
   0xf   :  { %v25_v2 = vld [vmem:[#allocation2 + $0x10] sm:$0xff]  ;;  %v535_v3 = vmul.f32 3.2456994, %v23_v0  ;;  %v536_v4 = vmul.f32 3.2456994, %v24_v1  ;;  %v26_v6 = vld [vmem:[#allocation2 + $0x18] sm:$0xff] }
  0x10   :  { %v537_v5 = vmul.f32 3.2456994, %v25_v2  ;;  %v27_v7 = vld [vmem:[#allocation2 + $0x20] sm:$0xff]  ;;  %v28_v8 = vld [vmem:[#allocation2 + $0x28] sm:$0xff]  ;;  %v538_v12 = vmul.f32 3.2456994, %v26_v6 }
  0x11   :  { %v1047_v9 = vadd.f32 -0.42421293, %v535_v3  ;;  %v1048_v10 = vadd.f32 -0.42421293, %v536_v4  ;;  %v539_v13 = vmul.f32 3.2456994, %v27_v7 }
  0x12   :  { %v1049_v11 = vadd.f32 -0.42421293, %v537_v5  ;;  %v540_v14 = vmul.f32 3.2456994, %v28_v8  ;;  %v29_v15 = vld [vmem:[#allocation2 + $0x30] sm:$0xff]  ;;  %v30_v16 = vld [vmem:[#allocation2 + $0x38] sm:$0xff] }
  0x13   :  { %1559 = vst [vmem:[#allocation5] sm:$0xff] %v1047_v9  ;;  %1560 = vst [vmem:[#allocation5 + $0x8] sm:$0xff] %v1048_v10  ;;  %v31_v17 = vld [vmem:[#allocation2 + $0x40] sm:$0xff]  ;;  %v1050_v18 = vadd.f32 -0.42421293, %v538_v12  ;;  %v32_v24 = vld [vmem:[#allocation2 + $0x48] sm:$0xff] }
  0x14   :  { %1561 = vst [vmem:[#allocation5 + $0x10] sm:$0xff] %v1049_v11  ;;  %v1051_v19 = vadd.f32 -0.42421293, %v539_v13  ;;  %v1052_v20 = vadd.f32 -0.42421293, %v540_v14  ;;  %v33_v25 = vld [vmem:[#allocation2 + $0x50] sm:$0xff] }
  0x15   :  { %v541_v21 = vmul.f32 3.2456994, %v29_v15  ;;  %v542_v22 = vmul.f32 3.2456994, %v30_v16  ;;  %v543_v23 = vmul.f32 3.2456994, %v31_v17 }
  0x16   :  { %1562 = vst [vmem:[#allocation5 + $0x18] sm:$0xff] %v1050_v18  ;;  %1563 = vst [vmem:[#allocation5 + $0x20] sm:$0xff] %v1051_v19  ;;  %v34_v26 = vld [vmem:[#allocation2 + $0x58] sm:$0xff]  ;;  %v544_v30 = vmul.f32 3.2456994, %v32_v24  ;;  %v35_v33 = vld [vmem:[#allocation2 + $0x60] sm:$0xff] }
  0x17   :  { %1564 = vst [vmem:[#allocation5 + $0x28] sm:$0xff] %v1052_v20  ;;  %v1053_v27 = vadd.f32 -0.42421293, %v541_v21  ;;  %v1054_v28 = vadd.f32 -0.42421293, %v542_v22  ;;  %v36_v34 = vld [vmem:[#allocation2 + $0x68] sm:$0xff] }
  0x18   :  { %v1055_v29 = vadd.f32 -0.42421293, %v543_v23  ;;  %v545_v31 = vmul.f32 3.2456994, %v33_v25  ;;  %v546_v32 = vmul.f32 3.2456994, %v34_v26 }
  0x19   :  { %1565 = vst [vmem:[#allocation5 + $0x30] sm:$0xff] %v1053_v27  ;;  %1566 = vst [vmem:[#allocation5 + $0x38] sm:$0xff] %v1054_v28  ;;  %v37_v35 = vld [vmem:[#allocation2 + $0x70] sm:$0xff]  ;;  %v1056_v36 = vadd.f32 -0.42421293, %v544_v30  ;;  %v38_v42 = vld [vmem:[#allocation2 + $0x78] sm:$0xff] }
  0x1a   :  { %1567 = vst [vmem:[#allocation5 + $0x40] sm:$0xff] %v1055_v29  ;;  %v1057_v37 = vadd.f32 -0.42421293, %v545_v31  ;;  %v1058_v38 = vadd.f32 -0.42421293, %v546_v32  ;;  %v39_v43 = vld [vmem:[#allocation2 + $0x80] sm:$0xff] }
  0x1b   :  { %v547_v39 = vmul.f32 3.2456994, %v35_v33  ;;  %v548_v40 = vmul.f32 3.2456994, %v36_v34  ;;  %v549_v41 = vmul.f32 3.2456994, %v37_v35 }
  0x1c   :  { %1568 = vst [vmem:[#allocation5 + $0x48] sm:$0xff] %v1056_v36  ;;  %1569 = vst [vmem:[#allocation5 + $0x50] sm:$0xff] %v1057_v37  ;;  %v40_v44 = vld [vmem:[#allocation2 + $0x88] sm:$0xff]  ;;  %v550_v48 = vmul.f32 3.2456994, %v38_v42  ;;  %v41_v51 = vld [vmem:[#allocation2 + $0x90] sm:$0xff] }
  0x1d   :  { %1570 = vst [vmem:[#allocation5 + $0x58] sm:$0xff] %v1058_v38  ;;  %v1059_v45 = vadd.f32 -0.42421293, %v547_v39  ;;  %v1060_v46 = vadd.f32 -0.42421293, %v548_v40  ;;  %v42_v52 = vld [vmem:[#allocation2 + $0x98] sm:$0xff] }
  0x1e   :  { %v1061_v47 = vadd.f32 -0.42421293, %v549_v41  ;;  %v551_v49 = vmul.f32 3.2456994, %v39_v43  ;;  %v552_v50 = vmul.f32 3.2456994, %v40_v44 }
  0x1f   :  { %1571 = vst [vmem:[#allocation5 + $0x60] sm:$0xff] %v1059_v45  ;;  %1572 = vst [vmem:[#allocation5 + $0x68] sm:$0xff] %v1060_v46  ;;  %v43_v53 = vld [vmem:[#allocation2 + $0xa0] sm:$0xff]  ;;  %v1062_v54 = vadd.f32 -0.42421293, %v550_v48  ;;  %v44_v60 = vld [vmem:[#allocation2 + $0xa8] sm:$0xff] }
  0x20   :  { %1573 = vst [vmem:[#allocation5 + $0x70] sm:$0xff] %v1061_v47  ;;  %v1063_v55 = vadd.f32 -0.42421293, %v551_v49  ;;  %v1064_v56 = vadd.f32 -0.42421293, %v552_v50  ;;  %v45_v61 = vld [vmem:[#allocation2 + $0xb0] sm:$0xff] }
  0x21   :  { %v553_v57 = vmul.f32 3.2456994, %v41_v51  ;;  %v554_v58 = vmul.f32 3.2456994, %v42_v52  ;;  %v555_v59 = vmul.f32 3.2456994, %v43_v53 }
  0x22   :  { %1574 = vst [vmem:[#allocation5 + $0x78] sm:$0xff] %v1062_v54  ;;  %1575 = vst [vmem:[#allocation5 + $0x80] sm:$0xff] %v1063_v55  ;;  %v46_v62 = vld [vmem:[#allocation2 + $0xb8] sm:$0xff]  ;;  %v556_v2 = vmul.f32 3.2456994, %v44_v60  ;;  %v47_v5 = vld [vmem:[#allocation2 + $0xc0] sm:$0xff] }
  0x23   :  { %1576 = vst [vmem:[#allocation5 + $0x88] sm:$0xff] %v1064_v56  ;;  %v1065_v63 = vadd.f32 -0.42421293, %v553_v57  ;;  %v1066_v0 = vadd.f32 -0.42421293, %v554_v58  ;;  %v48_v6 = vld [vmem:[#allocation2 + $0xc8] sm:$0xff] }
  0x24   :  { %v1067_v1 = vadd.f32 -0.42421293, %v555_v59  ;;  %v557_v3 = vmul.f32 3.2456994, %v45_v61  ;;  %v558_v4 = vmul.f32 3.2456994, %v46_v62 }
  0x25   :  { %1577 = vst [vmem:[#allocation5 + $0x90] sm:$0xff] %v1065_v63  ;;  %1578 = vst [vmem:[#allocation5 + $0x98] sm:$0xff] %v1066_v0  ;;  %v49_v7 = vld [vmem:[#allocation2 + $0xd0] sm:$0xff]  ;;  %v1068_v8 = vadd.f32 -0.42421293, %v556_v2  ;;  %v50_v14 = vld [vmem:[#allocation2 + $0xd8] sm:$0xff] }
  0x26   :  { %1579 = vst [vmem:[#allocation5 + $0xa0] sm:$0xff] %v1067_v1  ;;  %v1069_v9 = vadd.f32 -0.42421293, %v557_v3  ;;  %v1070_v10 = vadd.f32 -0.42421293, %v558_v4  ;;  %v51_v15 = vld [vmem:[#allocation2 + $0xe0] sm:$0xff] }
  0x27   :  { %v559_v11 = vmul.f32 3.2456994, %v47_v5  ;;  %v560_v12 = vmul.f32 3.2456994, %v48_v6  ;;  %v561_v13 = vmul.f32 3.2456994, %v49_v7 }
  0x28   :  { %1580 = vst [vmem:[#allocation5 + $0xa8] sm:$0xff] %v1068_v8  ;;  %1581 = vst [vmem:[#allocation5 + $0xb0] sm:$0xff] %v1069_v9  ;;  %v52_v16 = vld [vmem:[#allocation2 + $0xe8] sm:$0xff]  ;;  %v562_v20 = vmul.f32 3.2456994, %v50_v14  ;;  %v53_v23 = vld [vmem:[#allocation2 + $0xf0] sm:$0xff] }
  0x29   :  { %1582 = vst [vmem:[#allocation5 + $0xb8] sm:$0xff] %v1070_v10  ;;  %v1071_v17 = vadd.f32 -0.42421293, %v559_v11  ;;  %v1072_v18 = vadd.f32 -0.42421293, %v560_v12  ;;  %v54_v24 = vld [vmem:[#allocation2 + $0xf8] sm:$0xff] }
  0x2a   :  { %v1073_v19 = vadd.f32 -0.42421293, %v561_v13  ;;  %v563_v21 = vmul.f32 3.2456994, %v51_v15  ;;  %v564_v22 = vmul.f32 3.2456994, %v52_v16 }
  0x2b   :  { %1583 = vst [vmem:[#allocation5 + $0xc0] sm:$0xff] %v1071_v17  ;;  %1584 = vst [vmem:[#allocation5 + $0xc8] sm:$0xff] %v1072_v18  ;;  %v55_v25 = vld [vmem:[#allocation2 + $0x100] sm:$0xff]  ;;  %v1074_v26 = vadd.f32 -0.42421293, %v562_v20  ;;  %v56_v32 = vld [vmem:[#allocation2 + $0x108] sm:$0xff] }
  0x2c   :  { %1585 = vst [vmem:[#allocation5 + $0xd0] sm:$0xff] %v1073_v19  ;;  %v1075_v27 = vadd.f32 -0.42421293, %v563_v21  ;;  %v1076_v28 = vadd.f32 -0.42421293, %v564_v22  ;;  %v57_v33 = vld [vmem:[#allocation2 + $0x110] sm:$0xff] }
  0x2d   :  { %v565_v29 = vmul.f32 3.2456994, %v53_v23  ;;  %v566_v30 = vmul.f32 3.2456994, %v54_v24  ;;  %v567_v31 = vmul.f32 3.2456994, %v55_v25 }
  0x2e   :  { %1586 = vst [vmem:[#allocation5 + $0xd8] sm:$0xff] %v1074_v26  ;;  %1587 = vst [vmem:[#allocation5 + $0xe0] sm:$0xff] %v1075_v27  ;;  %v58_v34 = vld [vmem:[#allocation2 + $0x118] sm:$0xff]  ;;  %v568_v38 = vmul.f32 3.2456994, %v56_v32  ;;  %v59_v41 = vld [vmem:[#allocation2 + $0x120] sm:$0xff] }
  0x2f   :  { %1588 = vst [vmem:[#allocation5 + $0xe8] sm:$0xff] %v1076_v28  ;;  %v1077_v35 = vadd.f32 -0.42421293, %v565_v29  ;;  %v1078_v36 = vadd.f32 -0.42421293, %v566_v30  ;;  %v60_v42 = vld [vmem:[#allocation2 + $0x128] sm:$0xff] }
  0x30   :  { %v1079_v37 = vadd.f32 -0.42421293, %v567_v31  ;;  %v569_v39 = vmul.f32 3.2456994, %v57_v33  ;;  %v570_v40 = vmul.f32 3.2456994, %v58_v34 }
  0x31   :  { %1589 = vst [vmem:[#allocation5 + $0xf0] sm:$0xff] %v1077_v35  ;;  %1590 = vst [vmem:[#allocation5 + $0xf8] sm:$0xff] %v1078_v36  ;;  %v61_v43 = vld [vmem:[#allocation2 + $0x130] sm:$0xff]  ;;  %v1080_v44 = vadd.f32 -0.42421293, %v568_v38  ;;  %v62_v50 = vld [vmem:[#allocation2 + $0x138] sm:$0xff] }
  0x32   :  { %1591 = vst [vmem:[#allocation5 + $0x100] sm:$0xff] %v1079_v37  ;;  %v1081_v45 = vadd.f32 -0.42421293, %v569_v39  ;;  %v1082_v46 = vadd.f32 -0.42421293, %v570_v40  ;;  %v63_v51 = vld [vmem:[#allocation2 + $0x140] sm:$0xff] }
  0x33   :  { %v571_v47 = vmul.f32 3.2456994, %v59_v41  ;;  %v572_v48 = vmul.f32 3.2456994, %v60_v42  ;;  %v573_v49 = vmul.f32 3.2456994, %v61_v43 }
  0x34   :  { %1592 = vst [vmem:[#allocation5 + $0x108] sm:$0xff] %v1080_v44  ;;  %1593 = vst [vmem:[#allocation5 + $0x110] sm:$0xff] %v1081_v45  ;;  %v64_v52 = vld [vmem:[#allocation2 + $0x148] sm:$0xff]  ;;  %v574_v56 = vmul.f32 3.2456994, %v62_v50  ;;  %v65_v59 = vld [vmem:[#allocation2 + $0x150] sm:$0xff] }
  0x35   :  { %1594 = vst [vmem:[#allocation5 + $0x118] sm:$0xff] %v1082_v46  ;;  %v1083_v53 = vadd.f32 -0.42421293, %v571_v47  ;;  %v1084_v54 = vadd.f32 -0.42421293, %v572_v48  ;;  %v66_v60 = vld [vmem:[#allocation2 + $0x158] sm:$0xff] }
  0x36   :  { %v1085_v55 = vadd.f32 -0.42421293, %v573_v49  ;;  %v575_v57 = vmul.f32 3.2456994, %v63_v51  ;;  %v576_v58 = vmul.f32 3.2456994, %v64_v52 }
  0x37   :  { %1595 = vst [vmem:[#allocation5 + $0x120] sm:$0xff] %v1083_v53  ;;  %1596 = vst [vmem:[#allocation5 + $0x128] sm:$0xff] %v1084_v54  ;;  %v67_v61 = vld [vmem:[#allocation2 + $0x160] sm:$0xff]  ;;  %v1086_v62 = vadd.f32 -0.42421293, %v574_v56  ;;  %v68_v4 = vld [vmem:[#allocation2 + $0x168] sm:$0xff] }
  0x38   :  { %1597 = vst [vmem:[#allocation5 + $0x130] sm:$0xff] %v1085_v55  ;;  %v1087_v63 = vadd.f32 -0.42421293, %v575_v57  ;;  %v1088_v0 = vadd.f32 -0.42421293, %v576_v58  ;;  %v69_v5 = vld [vmem:[#allocation2 + $0x170] sm:$0xff] }
  0x39   :  { %v577_v1 = vmul.f32 3.2456994, %v65_v59  ;;  %v578_v2 = vmul.f32 3.2456994, %v66_v60  ;;  %v579_v3 = vmul.f32 3.2456994, %v67_v61 }
  0x3a   :  { %1598 = vst [vmem:[#allocation5 + $0x138] sm:$0xff] %v1086_v62  ;;  %1599 = vst [vmem:[#allocation5 + $0x140] sm:$0xff] %v1087_v63  ;;  %v70_v6 = vld [vmem:[#allocation2 + $0x178] sm:$0xff]  ;;  %v580_v10 = vmul.f32 3.2456994, %v68_v4  ;;  %v71_v13 = vld [vmem:[#allocation2 + $0x180] sm:$0xff] }
  0x3b   :  { %1600 = vst [vmem:[#allocation5 + $0x148] sm:$0xff] %v1088_v0  ;;  %v1089_v7 = vadd.f32 -0.42421293, %v577_v1  ;;  %v1090_v8 = vadd.f32 -0.42421293, %v578_v2  ;;  %v72_v14 = vld [vmem:[#allocation2 + $0x188] sm:$0xff] }
  0x3c   :  { %v1091_v9 = vadd.f32 -0.42421293, %v579_v3  ;;  %v581_v11 = vmul.f32 3.2456994, %v69_v5  ;;  %v582_v12 = vmul.f32 3.2456994, %v70_v6 }
  0x3d   :  { %1601 = vst [vmem:[#allocation5 + $0x150] sm:$0xff] %v1089_v7  ;;  %1602 = vst [vmem:[#allocation5 + $0x158] sm:$0xff] %v1090_v8  ;;  %v73_v15 = vld [vmem:[#allocation2 + $0x190] sm:$0xff]  ;;  %v1092_v16 = vadd.f32 -0.42421293, %v580_v10  ;;  %v74_v22 = vld [vmem:[#allocation2 + $0x198] sm:$0xff] }
  0x3e   :  { %1603 = vst [vmem:[#allocation5 + $0x160] sm:$0xff] %v1091_v9  ;;  %v1093_v17 = vadd.f32 -0.42421293, %v581_v11  ;;  %v1094_v18 = vadd.f32 -0.42421293, %v582_v12  ;;  %v75_v23 = vld [vmem:[#allocation2 + $0x1a0] sm:$0xff] }
  0x3f   :  { %v583_v19 = vmul.f32 3.2456994, %v71_v13  ;;  %v584_v20 = vmul.f32 3.2456994, %v72_v14  ;;  %v585_v21 = vmul.f32 3.2456994, %v73_v15 }
  0x40   :  { %1604 = vst [vmem:[#allocation5 + $0x168] sm:$0xff] %v1092_v16  ;;  %1605 = vst [vmem:[#allocation5 + $0x170] sm:$0xff] %v1093_v17  ;;  %v76_v24 = vld [vmem:[#allocation2 + $0x1a8] sm:$0xff]  ;;  %v586_v28 = vmul.f32 3.2456994, %v74_v22  ;;  %v77_v31 = vld [vmem:[#allocation2 + $0x1b0] sm:$0xff] }
  0x41   :  { %1606 = vst [vmem:[#allocation5 + $0x178] sm:$0xff] %v1094_v18  ;;  %v1095_v25 = vadd.f32 -0.42421293, %v583_v19  ;;  %v1096_v26 = vadd.f32 -0.42421293, %v584_v20  ;;  %v78_v32 = vld [vmem:[#allocation2 + $0x1b8] sm:$0xff] }
  0x42   :  { %v1097_v27 = vadd.f32 -0.42421293, %v585_v21  ;;  %v587_v29 = vmul.f32 3.2456994, %v75_v23  ;;  %v588_v30 = vmul.f32 3.2456994, %v76_v24 }
  0x43   :  { %1607 = vst [vmem:[#allocation5 + $0x180] sm:$0xff] %v1095_v25  ;;  %1608 = vst [vmem:[#allocation5 + $0x188] sm:$0xff] %v1096_v26  ;;  %v79_v33 = vld [vmem:[#allocation2 + $0x1c0] sm:$0xff]  ;;  %v1098_v34 = vadd.f32 -0.42421293, %v586_v28  ;;  %v80_v40 = vld [vmem:[#allocation2 + $0x1c8] sm:$0xff] }
  0x44   :  { %1609 = vst [vmem:[#allocation5 + $0x190] sm:$0xff] %v1097_v27  ;;  %v1099_v35 = vadd.f32 -0.42421293, %v587_v29  ;;  %v1100_v36 = vadd.f32 -0.42421293, %v588_v30  ;;  %v81_v41 = vld [vmem:[#allocation2 + $0x1d0] sm:$0xff] }
  0x45   :  { %v589_v37 = vmul.f32 3.2456994, %v77_v31  ;;  %v590_v38 = vmul.f32 3.2456994, %v78_v32  ;;  %v591_v39 = vmul.f32 3.2456994, %v79_v33 }
  0x46   :  { %1610 = vst [vmem:[#allocation5 + $0x198] sm:$0xff] %v1098_v34  ;;  %1611 = vst [vmem:[#allocation5 + $0x1a0] sm:$0xff] %v1099_v35  ;;  %v82_v42 = vld [vmem:[#allocation2 + $0x1d8] sm:$0xff]  ;;  %v592_v46 = vmul.f32 3.2456994, %v80_v40  ;;  %v83_v49 = vld [vmem:[#allocation2 + $0x1e0] sm:$0xff] }
  0x47   :  { %1612 = vst [vmem:[#allocation5 + $0x1a8] sm:$0xff] %v1100_v36  ;;  %v1101_v43 = vadd.f32 -0.42421293, %v589_v37  ;;  %v1102_v44 = vadd.f32 -0.42421293, %v590_v38  ;;  %v84_v50 = vld [vmem:[#allocation2 + $0x1e8] sm:$0xff] }
  0x48   :  { %v1103_v45 = vadd.f32 -0.42421293, %v591_v39  ;;  %v593_v47 = vmul.f32 3.2456994, %v81_v41  ;;  %v594_v48 = vmul.f32 3.2456994, %v82_v42 }
  0x49   :  { %1613 = vst [vmem:[#allocation5 + $0x1b0] sm:$0xff] %v1101_v43  ;;  %1614 = vst [vmem:[#allocation5 + $0x1b8] sm:$0xff] %v1102_v44  ;;  %v85_v51 = vld [vmem:[#allocation2 + $0x1f0] sm:$0xff]  ;;  %v1104_v52 = vadd.f32 -0.42421293, %v592_v46  ;;  %v86_v58 = vld [vmem:[#allocation2 + $0x1f8] sm:$0xff] }
  0x4a   :  { %1615 = vst [vmem:[#allocation5 + $0x1c0] sm:$0xff] %v1103_v45  ;;  %v1105_v53 = vadd.f32 -0.42421293, %v593_v47  ;;  %v1106_v54 = vadd.f32 -0.42421293, %v594_v48  ;;  %v87_v59 = vld [vmem:[#allocation2 + $0x200] sm:$0xff] }
  0x4b   :  { %v595_v55 = vmul.f32 3.2456994, %v83_v49  ;;  %v596_v56 = vmul.f32 3.2456994, %v84_v50  ;;  %v597_v57 = vmul.f32 3.2456994, %v85_v51 }
  0x4c   :  { %1616 = vst [vmem:[#allocation5 + $0x1c8] sm:$0xff] %v1104_v52  ;;  %1617 = vst [vmem:[#allocation5 + $0x1d0] sm:$0xff] %v1105_v53  ;;  %v88_v60 = vld [vmem:[#allocation2 + $0x208] sm:$0xff]  ;;  %v598_v0 = vmul.f32 3.2456994, %v86_v58  ;;  %v89_v3 = vld [vmem:[#allocation2 + $0x210] sm:$0xff] }
  0x4d   :  { %1618 = vst [vmem:[#allocation5 + $0x1d8] sm:$0xff] %v1106_v54  ;;  %v1107_v61 = vadd.f32 -0.42421293, %v595_v55  ;;  %v1108_v62 = vadd.f32 -0.42421293, %v596_v56  ;;  %v90_v4 = vld [vmem:[#allocation2 + $0x218] sm:$0xff] }
  0x4e   :  { %v1109_v63 = vadd.f32 -0.42421293, %v597_v57  ;;  %v599_v1 = vmul.f32 3.2456994, %v87_v59  ;;  %v600_v2 = vmul.f32 3.2456994, %v88_v60 }
  0x4f   :  { %1619 = vst [vmem:[#allocation5 + $0x1e0] sm:$0xff] %v1107_v61  ;;  %1620 = vst [vmem:[#allocation5 + $0x1e8] sm:$0xff] %v1108_v62  ;;  %v91_v5 = vld [vmem:[#allocation2 + $0x220] sm:$0xff]  ;;  %v1110_v6 = vadd.f32 -0.42421293, %v598_v0  ;;  %v92_v12 = vld [vmem:[#allocation2 + $0x228] sm:$0xff] }
  0x50   :  { %1621 = vst [vmem:[#allocation5 + $0x1f0] sm:$0xff] %v1109_v63  ;;  %v1111_v7 = vadd.f32 -0.42421293, %v599_v1  ;;  %v1112_v8 = vadd.f32 -0.42421293, %v600_v2  ;;  %v93_v13 = vld [vmem:[#allocation2 + $0x230] sm:$0xff] }
  0x51   :  { %v601_v9 = vmul.f32 3.2456994, %v89_v3  ;;  %v602_v10 = vmul.f32 3.2456994, %v90_v4  ;;  %v603_v11 = vmul.f32 3.2456994, %v91_v5 }
  0x52   :  { %1622 = vst [vmem:[#allocation5 + $0x1f8] sm:$0xff] %v1110_v6  ;;  %1623 = vst [vmem:[#allocation5 + $0x200] sm:$0xff] %v1111_v7  ;;  %v94_v14 = vld [vmem:[#allocation2 + $0x238] sm:$0xff]  ;;  %v604_v18 = vmul.f32 3.2456994, %v92_v12  ;;  %v95_v21 = vld [vmem:[#allocation2 + $0x240] sm:$0xff] }
  0x53   :  { %1624 = vst [vmem:[#allocation5 + $0x208] sm:$0xff] %v1112_v8  ;;  %v1113_v15 = vadd.f32 -0.42421293, %v601_v9  ;;  %v1114_v16 = vadd.f32 -0.42421293, %v602_v10  ;;  %v96_v22 = vld [vmem:[#allocation2 + $0x248] sm:$0xff] }
  0x54   :  { %v1115_v17 = vadd.f32 -0.42421293, %v603_v11  ;;  %v605_v19 = vmul.f32 3.2456994, %v93_v13  ;;  %v606_v20 = vmul.f32 3.2456994, %v94_v14 }
  0x55   :  { %1625 = vst [vmem:[#allocation5 + $0x210] sm:$0xff] %v1113_v15  ;;  %1626 = vst [vmem:[#allocation5 + $0x218] sm:$0xff] %v1114_v16  ;;  %v97_v23 = vld [vmem:[#allocation2 + $0x250] sm:$0xff]  ;;  %v1116_v24 = vadd.f32 -0.42421293, %v604_v18  ;;  %v98_v30 = vld [vmem:[#allocation2 + $0x258] sm:$0xff] }
  0x56   :  { %1627 = vst [vmem:[#allocation5 + $0x220] sm:$0xff] %v1115_v17  ;;  %v1117_v25 = vadd.f32 -0.42421293, %v605_v19  ;;  %v1118_v26 = vadd.f32 -0.42421293, %v606_v20  ;;  %v99_v31 = vld [vmem:[#allocation2 + $0x260] sm:$0xff] }
  0x57   :  { %v607_v27 = vmul.f32 3.2456994, %v95_v21  ;;  %v608_v28 = vmul.f32 3.2456994, %v96_v22  ;;  %v609_v29 = vmul.f32 3.2456994, %v97_v23 }
  0x58   :  { %1628 = vst [vmem:[#allocation5 + $0x228] sm:$0xff] %v1116_v24  ;;  %1629 = vst [vmem:[#allocation5 + $0x230] sm:$0xff] %v1117_v25  ;;  %v100_v32 = vld [vmem:[#allocation2 + $0x268] sm:$0xff]  ;;  %v610_v36 = vmul.f32 3.2456994, %v98_v30  ;;  %v101_v39 = vld [vmem:[#allocation2 + $0x270] sm:$0xff] }
  0x59   :  { %1630 = vst [vmem:[#allocation5 + $0x238] sm:$0xff] %v1118_v26  ;;  %v1119_v33 = vadd.f32 -0.42421293, %v607_v27  ;;  %v1120_v34 = vadd.f32 -0.42421293, %v608_v28  ;;  %v102_v40 = vld [vmem:[#allocation2 + $0x278] sm:$0xff] }
  0x5a   :  { %v1121_v35 = vadd.f32 -0.42421293, %v609_v29  ;;  %v611_v37 = vmul.f32 3.2456994, %v99_v31  ;;  %v612_v38 = vmul.f32 3.2456994, %v100_v32 }
  0x5b   :  { %1631 = vst [vmem:[#allocation5 + $0x240] sm:$0xff] %v1119_v33  ;;  %1632 = vst [vmem:[#allocation5 + $0x248] sm:$0xff] %v1120_v34  ;;  %v103_v41 = vld [vmem:[#allocation2 + $0x280] sm:$0xff]  ;;  %v1122_v42 = vadd.f32 -0.42421293, %v610_v36  ;;  %v104_v48 = vld [vmem:[#allocation2 + $0x288] sm:$0xff] }
  0x5c   :  { %1633 = vst [vmem:[#allocation5 + $0x250] sm:$0xff] %v1121_v35  ;;  %v1123_v43 = vadd.f32 -0.42421293, %v611_v37  ;;  %v1124_v44 = vadd.f32 -0.42421293, %v612_v38  ;;  %v105_v49 = vld [vmem:[#allocation2 + $0x290] sm:$0xff] }
  0x5d   :  { %v613_v45 = vmul.f32 3.2456994, %v101_v39  ;;  %v614_v46 = vmul.f32 3.2456994, %v102_v40  ;;  %v615_v47 = vmul.f32 3.2456994, %v103_v41 }
  0x5e   :  { %1634 = vst [vmem:[#allocation5 + $0x258] sm:$0xff] %v1122_v42  ;;  %1635 = vst [vmem:[#allocation5 + $0x260] sm:$0xff] %v1123_v43  ;;  %v106_v50 = vld [vmem:[#allocation2 + $0x298] sm:$0xff]  ;;  %v616_v54 = vmul.f32 3.2456994, %v104_v48  ;;  %v107_v57 = vld [vmem:[#allocation2 + $0x2a0] sm:$0xff] }
  0x5f   :  { %1636 = vst [vmem:[#allocation5 + $0x268] sm:$0xff] %v1124_v44  ;;  %v1125_v51 = vadd.f32 -0.42421293, %v613_v45  ;;  %v1126_v52 = vadd.f32 -0.42421293, %v614_v46  ;;  %v108_v58 = vld [vmem:[#allocation2 + $0x2a8] sm:$0xff] }
  0x60   :  { %v1127_v53 = vadd.f32 -0.42421293, %v615_v47  ;;  %v617_v55 = vmul.f32 3.2456994, %v105_v49  ;;  %v618_v56 = vmul.f32 3.2456994, %v106_v50 }
  0x61   :  { %1637 = vst [vmem:[#allocation5 + $0x270] sm:$0xff] %v1125_v51  ;;  %1638 = vst [vmem:[#allocation5 + $0x278] sm:$0xff] %v1126_v52  ;;  %v109_v59 = vld [vmem:[#allocation2 + $0x2b0] sm:$0xff]  ;;  %v1128_v60 = vadd.f32 -0.42421293, %v616_v54  ;;  %v110_v2 = vld [vmem:[#allocation2 + $0x2b8] sm:$0xff] }
  0x62   :  { %1639 = vst [vmem:[#allocation5 + $0x280] sm:$0xff] %v1127_v53  ;;  %v1129_v61 = vadd.f32 -0.42421293, %v617_v55  ;;  %v1130_v62 = vadd.f32 -0.42421293, %v618_v56  ;;  %v111_v3 = vld [vmem:[#allocation2 + $0x2c0] sm:$0xff] }
  0x63   :  { %v619_v63 = vmul.f32 3.2456994, %v107_v57  ;;  %v620_v0 = vmul.f32 3.2456994, %v108_v58  ;;  %v621_v1 = vmul.f32 3.2456994, %v109_v59 }
  0x64   :  { %1640 = vst [vmem:[#allocation5 + $0x288] sm:$0xff] %v1128_v60  ;;  %1641 = vst [vmem:[#allocation5 + $0x290] sm:$0xff] %v1129_v61  ;;  %v112_v4 = vld [vmem:[#allocation2 + $0x2c8] sm:$0xff]  ;;  %v622_v8 = vmul.f32 3.2456994, %v110_v2  ;;  %v113_v11 = vld [vmem:[#allocation2 + $0x2d0] sm:$0xff] }
  0x65   :  { %1642 = vst [vmem:[#allocation5 + $0x298] sm:$0xff] %v1130_v62  ;;  %v1131_v5 = vadd.f32 -0.42421293, %v619_v63  ;;  %v1132_v6 = vadd.f32 -0.42421293, %v620_v0  ;;  %v114_v12 = vld [vmem:[#allocation2 + $0x2d8] sm:$0xff] }
  0x66   :  { %v1133_v7 = vadd.f32 -0.42421293, %v621_v1  ;;  %v623_v9 = vmul.f32 3.2456994, %v111_v3  ;;  %v624_v10 = vmul.f32 3.2456994, %v112_v4 }
  0x67   :  { %1643 = vst [vmem:[#allocation5 + $0x2a0] sm:$0xff] %v1131_v5  ;;  %1644 = vst [vmem:[#allocation5 + $0x2a8] sm:$0xff] %v1132_v6  ;;  %v115_v13 = vld [vmem:[#allocation2 + $0x2e0] sm:$0xff]  ;;  %v1134_v14 = vadd.f32 -0.42421293, %v622_v8  ;;  %v116_v20 = vld [vmem:[#allocation2 + $0x2e8] sm:$0xff] }
  0x68   :  { %1645 = vst [vmem:[#allocation5 + $0x2b0] sm:$0xff] %v1133_v7  ;;  %v1135_v15 = vadd.f32 -0.42421293, %v623_v9  ;;  %v1136_v16 = vadd.f32 -0.42421293, %v624_v10  ;;  %v117_v21 = vld [vmem:[#allocation2 + $0x2f0] sm:$0xff] }
  0x69   :  { %v625_v17 = vmul.f32 3.2456994, %v113_v11  ;;  %v626_v18 = vmul.f32 3.2456994, %v114_v12  ;;  %v627_v19 = vmul.f32 3.2456994, %v115_v13 }
  0x6a   :  { %1646 = vst [vmem:[#allocation5 + $0x2b8] sm:$0xff] %v1134_v14  ;;  %1647 = vst [vmem:[#allocation5 + $0x2c0] sm:$0xff] %v1135_v15  ;;  %v118_v22 = vld [vmem:[#allocation2 + $0x2f8] sm:$0xff]  ;;  %v628_v26 = vmul.f32 3.2456994, %v116_v20  ;;  %v119_v29 = vld [vmem:[#allocation2 + $0x300] sm:$0xff] }
  0x6b   :  { %1648 = vst [vmem:[#allocation5 + $0x2c8] sm:$0xff] %v1136_v16  ;;  %v1137_v23 = vadd.f32 -0.42421293, %v625_v17  ;;  %v1138_v24 = vadd.f32 -0.42421293, %v626_v18  ;;  %v120_v30 = vld [vmem:[#allocation2 + $0x308] sm:$0xff] }
  0x6c   :  { %v1139_v25 = vadd.f32 -0.42421293, %v627_v19  ;;  %v629_v27 = vmul.f32 3.2456994, %v117_v21  ;;  %v630_v28 = vmul.f32 3.2456994, %v118_v22 }
  0x6d   :  { %1649 = vst [vmem:[#allocation5 + $0x2d0] sm:$0xff] %v1137_v23  ;;  %1650 = vst [vmem:[#allocation5 + $0x2d8] sm:$0xff] %v1138_v24  ;;  %v121_v31 = vld [vmem:[#allocation2 + $0x310] sm:$0xff]  ;;  %v1140_v32 = vadd.f32 -0.42421293, %v628_v26  ;;  %v122_v38 = vld [vmem:[#allocation2 + $0x318] sm:$0xff] }
  0x6e   :  { %1651 = vst [vmem:[#allocation5 + $0x2e0] sm:$0xff] %v1139_v25  ;;  %v1141_v33 = vadd.f32 -0.42421293, %v629_v27  ;;  %v1142_v34 = vadd.f32 -0.42421293, %v630_v28  ;;  %v123_v39 = vld [vmem:[#allocation2 + $0x320] sm:$0xff] }
  0x6f   :  { %v631_v35 = vmul.f32 3.2456994, %v119_v29  ;;  %v632_v36 = vmul.f32 3.2456994, %v120_v30  ;;  %v633_v37 = vmul.f32 3.2456994, %v121_v31 }
  0x70   :  { %1652 = vst [vmem:[#allocation5 + $0x2e8] sm:$0xff] %v1140_v32  ;;  %1653 = vst [vmem:[#allocation5 + $0x2f0] sm:$0xff] %v1141_v33  ;;  %v124_v40 = vld [vmem:[#allocation2 + $0x328] sm:$0xff]  ;;  %v634_v44 = vmul.f32 3.2456994, %v122_v38  ;;  %v125_v47 = vld [vmem:[#allocation2 + $0x330] sm:$0xff] }
  0x71   :  { %1654 = vst [vmem:[#allocation5 + $0x2f8] sm:$0xff] %v1142_v34  ;;  %v1143_v41 = vadd.f32 -0.42421293, %v631_v35  ;;  %v1144_v42 = vadd.f32 -0.42421293, %v632_v36  ;;  %v126_v48 = vld [vmem:[#allocation2 + $0x338] sm:$0xff] }
  0x72   :  { %v1145_v43 = vadd.f32 -0.42421293, %v633_v37  ;;  %v635_v45 = vmul.f32 3.2456994, %v123_v39  ;;  %v636_v46 = vmul.f32 3.2456994, %v124_v40 }
  0x73   :  { %1655 = vst [vmem:[#allocation5 + $0x300] sm:$0xff] %v1143_v41  ;;  %1656 = vst [vmem:[#allocation5 + $0x308] sm:$0xff] %v1144_v42  ;;  %v127_v49 = vld [vmem:[#allocation2 + $0x340] sm:$0xff]  ;;  %v1146_v50 = vadd.f32 -0.42421293, %v634_v44  ;;  %v128_v56 = vld [vmem:[#allocation2 + $0x348] sm:$0xff] }
  0x74   :  { %1657 = vst [vmem:[#allocation5 + $0x310] sm:$0xff] %v1145_v43  ;;  %v1147_v51 = vadd.f32 -0.42421293, %v635_v45  ;;  %v1148_v52 = vadd.f32 -0.42421293, %v636_v46  ;;  %v129_v57 = vld [vmem:[#allocation2 + $0x350] sm:$0xff] }
  0x75   :  { %v637_v53 = vmul.f32 3.2456994, %v125_v47  ;;  %v638_v54 = vmul.f32 3.2456994, %v126_v48  ;;  %v639_v55 = vmul.f32 3.2456994, %v127_v49 }
  0x76   :  { %1658 = vst [vmem:[#allocation5 + $0x318] sm:$0xff] %v1146_v50  ;;  %1659 = vst [vmem:[#allocation5 + $0x320] sm:$0xff] %v1147_v51  ;;  %v130_v58 = vld [vmem:[#allocation2 + $0x358] sm:$0xff]  ;;  %v640_v62 = vmul.f32 3.2456994, %v128_v56  ;;  %v131_v1 = vld [vmem:[#allocation2 + $0x360] sm:$0xff] }
  0x77   :  { %1660 = vst [vmem:[#allocation5 + $0x328] sm:$0xff] %v1148_v52  ;;  %v1149_v59 = vadd.f32 -0.42421293, %v637_v53  ;;  %v1150_v60 = vadd.f32 -0.42421293, %v638_v54  ;;  %v132_v2 = vld [vmem:[#allocation2 + $0x368] sm:$0xff] }
  0x78   :  { %v1151_v61 = vadd.f32 -0.42421293, %v639_v55  ;;  %v641_v63 = vmul.f32 3.2456994, %v129_v57  ;;  %v642_v0 = vmul.f32 3.2456994, %v130_v58 }
  0x79   :  { %1661 = vst [vmem:[#allocation5 + $0x330] sm:$0xff] %v1149_v59  ;;  %1662 = vst [vmem:[#allocation5 + $0x338] sm:$0xff] %v1150_v60  ;;  %v133_v3 = vld [vmem:[#allocation2 + $0x370] sm:$0xff]  ;;  %v1152_v4 = vadd.f32 -0.42421293, %v640_v62  ;;  %v134_v10 = vld [vmem:[#allocation2 + $0x378] sm:$0xff] }
  0x7a   :  { %1663 = vst [vmem:[#allocation5 + $0x340] sm:$0xff] %v1151_v61  ;;  %v1153_v5 = vadd.f32 -0.42421293, %v641_v63  ;;  %v1154_v6 = vadd.f32 -0.42421293, %v642_v0  ;;  %v135_v11 = vld [vmem:[#allocation2 + $0x380] sm:$0xff] }
  0x7b   :  { %v643_v7 = vmul.f32 3.2456994, %v131_v1  ;;  %v644_v8 = vmul.f32 3.2456994, %v132_v2  ;;  %v645_v9 = vmul.f32 3.2456994, %v133_v3 }
  0x7c   :  { %1664 = vst [vmem:[#allocation5 + $0x348] sm:$0xff] %v1152_v4  ;;  %1665 = vst [vmem:[#allocation5 + $0x350] sm:$0xff] %v1153_v5  ;;  %v136_v12 = vld [vmem:[#allocation2 + $0x388] sm:$0xff]  ;;  %v646_v16 = vmul.f32 3.2456994, %v134_v10  ;;  %v137_v19 = vld [vmem:[#allocation2 + $0x390] sm:$0xff] }
  0x7d   :  { %1666 = vst [vmem:[#allocation5 + $0x358] sm:$0xff] %v1154_v6  ;;  %v1155_v13 = vadd.f32 -0.42421293, %v643_v7  ;;  %v1156_v14 = vadd.f32 -0.42421293, %v644_v8  ;;  %v138_v20 = vld [vmem:[#allocation2 + $0x398] sm:$0xff] }
  0x7e   :  { %v1157_v15 = vadd.f32 -0.42421293, %v645_v9  ;;  %v647_v17 = vmul.f32 3.2456994, %v135_v11  ;;  %v648_v18 = vmul.f32 3.2456994, %v136_v12 }
  0x7f   :  { %1667 = vst [vmem:[#allocation5 + $0x360] sm:$0xff] %v1155_v13  ;;  %1668 = vst [vmem:[#allocation5 + $0x368] sm:$0xff] %v1156_v14  ;;  %v139_v21 = vld [vmem:[#allocation2 + $0x3a0] sm:$0xff]  ;;  %v1158_v22 = vadd.f32 -0.42421293, %v646_v16  ;;  %v140_v28 = vld [vmem:[#allocation2 + $0x3a8] sm:$0xff] }
  0x80   :  { %1669 = vst [vmem:[#allocation5 + $0x370] sm:$0xff] %v1157_v15  ;;  %v1159_v23 = vadd.f32 -0.42421293, %v647_v17  ;;  %v1160_v24 = vadd.f32 -0.42421293, %v648_v18  ;;  %v141_v29 = vld [vmem:[#allocation2 + $0x3b0] sm:$0xff] }
  0x81   :  { %v649_v25 = vmul.f32 3.2456994, %v137_v19  ;;  %v650_v26 = vmul.f32 3.2456994, %v138_v20  ;;  %v651_v27 = vmul.f32 3.2456994, %v139_v21 }
  0x82   :  { %1670 = vst [vmem:[#allocation5 + $0x378] sm:$0xff] %v1158_v22  ;;  %1671 = vst [vmem:[#allocation5 + $0x380] sm:$0xff] %v1159_v23  ;;  %v142_v30 = vld [vmem:[#allocation2 + $0x3b8] sm:$0xff]  ;;  %v652_v34 = vmul.f32 3.2456994, %v140_v28  ;;  %v143_v37 = vld [vmem:[#allocation2 + $0x3c0] sm:$0xff] }
  0x83   :  { %1672 = vst [vmem:[#allocation5 + $0x388] sm:$0xff] %v1160_v24  ;;  %v1161_v31 = vadd.f32 -0.42421293, %v649_v25  ;;  %v1162_v32 = vadd.f32 -0.42421293, %v650_v26  ;;  %v144_v38 = vld [vmem:[#allocation2 + $0x3c8] sm:$0xff] }
  0x84   :  { %v1163_v33 = vadd.f32 -0.42421293, %v651_v27  ;;  %v653_v35 = vmul.f32 3.2456994, %v141_v29  ;;  %v654_v36 = vmul.f32 3.2456994, %v142_v30 }
  0x85   :  { %1673 = vst [vmem:[#allocation5 + $0x390] sm:$0xff] %v1161_v31  ;;  %1674 = vst [vmem:[#allocation5 + $0x398] sm:$0xff] %v1162_v32  ;;  %v145_v39 = vld [vmem:[#allocation2 + $0x3d0] sm:$0xff]  ;;  %v1164_v40 = vadd.f32 -0.42421293, %v652_v34  ;;  %v146_v46 = vld [vmem:[#allocation2 + $0x3d8] sm:$0xff] }
  0x86   :  { %1675 = vst [vmem:[#allocation5 + $0x3a0] sm:$0xff] %v1163_v33  ;;  %v1165_v41 = vadd.f32 -0.42421293, %v653_v35  ;;  %v1166_v42 = vadd.f32 -0.42421293, %v654_v36  ;;  %v147_v47 = vld [vmem:[#allocation2 + $0x3e0] sm:$0xff] }
  0x87   :  { %v655_v43 = vmul.f32 3.2456994, %v143_v37  ;;  %v656_v44 = vmul.f32 3.2456994, %v144_v38  ;;  %v657_v45 = vmul.f32 3.2456994, %v145_v39 }
  0x88   :  { %1676 = vst [vmem:[#allocation5 + $0x3a8] sm:$0xff] %v1164_v40  ;;  %1677 = vst [vmem:[#allocation5 + $0x3b0] sm:$0xff] %v1165_v41  ;;  %v148_v48 = vld [vmem:[#allocation2 + $0x3e8] sm:$0xff]  ;;  %v658_v52 = vmul.f32 3.2456994, %v146_v46  ;;  %v149_v55 = vld [vmem:[#allocation2 + $0x3f0] sm:$0xff] }
  0x89   :  { %1678 = vst [vmem:[#allocation5 + $0x3b8] sm:$0xff] %v1166_v42  ;;  %v1167_v49 = vadd.f32 -0.42421293, %v655_v43  ;;  %v1168_v50 = vadd.f32 -0.42421293, %v656_v44  ;;  %v150_v56 = vld [vmem:[#allocation2 + $0x3f8] sm:$0xff] }
  0x8a   :  { %v1169_v51 = vadd.f32 -0.42421293, %v657_v45  ;;  %v659_v53 = vmul.f32 3.2456994, %v147_v47  ;;  %v660_v54 = vmul.f32 3.2456994, %v148_v48 }
  0x8b   :  { %1679 = vst [vmem:[#allocation5 + $0x3c0] sm:$0xff] %v1167_v49  ;;  %1680 = vst [vmem:[#allocation5 + $0x3c8] sm:$0xff] %v1168_v50  ;;  %v151_v57 = vld [vmem:[#allocation2 + $0x400] sm:$0xff]  ;;  %v1170_v58 = vadd.f32 -0.42421293, %v658_v52  ;;  %v152_v0 = vld [vmem:[#allocation2 + $0x408] sm:$0xff] }
  0x8c   :  { %1681 = vst [vmem:[#allocation5 + $0x3d0] sm:$0xff] %v1169_v51  ;;  %v1171_v59 = vadd.f32 -0.42421293, %v659_v53  ;;  %v1172_v60 = vadd.f32 -0.42421293, %v660_v54  ;;  %v153_v1 = vld [vmem:[#allocation2 + $0x410] sm:$0xff] }
  0x8d   :  { %v661_v61 = vmul.f32 3.2456994, %v149_v55  ;;  %v662_v62 = vmul.f32 3.2456994, %v150_v56  ;;  %v663_v63 = vmul.f32 3.2456994, %v151_v57 }
  0x8e   :  { %1682 = vst [vmem:[#allocation5 + $0x3d8] sm:$0xff] %v1170_v58  ;;  %1683 = vst [vmem:[#allocation5 + $0x3e0] sm:$0xff] %v1171_v59  ;;  %v154_v2 = vld [vmem:[#allocation2 + $0x418] sm:$0xff]  ;;  %v664_v6 = vmul.f32 3.2456994, %v152_v0  ;;  %v155_v9 = vld [vmem:[#allocation2 + $0x420] sm:$0xff] }
  0x8f   :  { %1684 = vst [vmem:[#allocation5 + $0x3e8] sm:$0xff] %v1172_v60  ;;  %v1173_v3 = vadd.f32 -0.42421293, %v661_v61  ;;  %v1174_v4 = vadd.f32 -0.42421293, %v662_v62  ;;  %v156_v10 = vld [vmem:[#allocation2 + $0x428] sm:$0xff] }
  0x90   :  { %v1175_v5 = vadd.f32 -0.42421293, %v663_v63  ;;  %v665_v7 = vmul.f32 3.2456994, %v153_v1  ;;  %v666_v8 = vmul.f32 3.2456994, %v154_v2 }
  0x91   :  { %1685 = vst [vmem:[#allocation5 + $0x3f0] sm:$0xff] %v1173_v3  ;;  %1686 = vst [vmem:[#allocation5 + $0x3f8] sm:$0xff] %v1174_v4  ;;  %v157_v11 = vld [vmem:[#allocation2 + $0x430] sm:$0xff]  ;;  %v1176_v12 = vadd.f32 -0.42421293, %v664_v6  ;;  %v158_v18 = vld [vmem:[#allocation2 + $0x438] sm:$0xff] }
  0x92   :  { %1687 = vst [vmem:[#allocation5 + $0x400] sm:$0xff] %v1175_v5  ;;  %v1177_v13 = vadd.f32 -0.42421293, %v665_v7  ;;  %v1178_v14 = vadd.f32 -0.42421293, %v666_v8  ;;  %v159_v19 = vld [vmem:[#allocation2 + $0x440] sm:$0xff] }
  0x93   :  { %v667_v15 = vmul.f32 3.2456994, %v155_v9  ;;  %v668_v16 = vmul.f32 3.2456994, %v156_v10  ;;  %v669_v17 = vmul.f32 3.2456994, %v157_v11 }
  0x94   :  { %1688 = vst [vmem:[#allocation5 + $0x408] sm:$0xff] %v1176_v12  ;;  %1689 = vst [vmem:[#allocation5 + $0x410] sm:$0xff] %v1177_v13  ;;  %v160_v20 = vld [vmem:[#allocation2 + $0x448] sm:$0xff]  ;;  %v670_v24 = vmul.f32 3.2456994, %v158_v18  ;;  %v161_v27 = vld [vmem:[#allocation2 + $0x450] sm:$0xff] }
  0x95   :  { %1690 = vst [vmem:[#allocation5 + $0x418] sm:$0xff] %v1178_v14  ;;  %v1179_v21 = vadd.f32 -0.42421293, %v667_v15  ;;  %v1180_v22 = vadd.f32 -0.42421293, %v668_v16  ;;  %v162_v28 = vld [vmem:[#allocation2 + $0x458] sm:$0xff] }
  0x96   :  { %v1181_v23 = vadd.f32 -0.42421293, %v669_v17  ;;  %v671_v25 = vmul.f32 3.2456994, %v159_v19  ;;  %v672_v26 = vmul.f32 3.2456994, %v160_v20 }
  0x97   :  { %1691 = vst [vmem:[#allocation5 + $0x420] sm:$0xff] %v1179_v21  ;;  %1692 = vst [vmem:[#allocation5 + $0x428] sm:$0xff] %v1180_v22  ;;  %v163_v29 = vld [vmem:[#allocation2 + $0x460] sm:$0xff]  ;;  %v1182_v30 = vadd.f32 -0.42421293, %v670_v24  ;;  %v164_v36 = vld [vmem:[#allocation2 + $0x468] sm:$0xff] }
  0x98   :  { %1693 = vst [vmem:[#allocation5 + $0x430] sm:$0xff] %v1181_v23  ;;  %v1183_v31 = vadd.f32 -0.42421293, %v671_v25  ;;  %v1184_v32 = vadd.f32 -0.42421293, %v672_v26  ;;  %v165_v37 = vld [vmem:[#allocation2 + $0x470] sm:$0xff] }
  0x99   :  { %v673_v33 = vmul.f32 3.2456994, %v161_v27  ;;  %v674_v34 = vmul.f32 3.2456994, %v162_v28  ;;  %v675_v35 = vmul.f32 3.2456994, %v163_v29 }
  0x9a   :  { %1694 = vst [vmem:[#allocation5 + $0x438] sm:$0xff] %v1182_v30  ;;  %1695 = vst [vmem:[#allocation5 + $0x440] sm:$0xff] %v1183_v31  ;;  %v166_v38 = vld [vmem:[#allocation2 + $0x478] sm:$0xff]  ;;  %v676_v42 = vmul.f32 3.2456994, %v164_v36  ;;  %v167_v45 = vld [vmem:[#allocation2 + $0x480] sm:$0xff] }
  0x9b   :  { %1696 = vst [vmem:[#allocation5 + $0x448] sm:$0xff] %v1184_v32  ;;  %v1185_v39 = vadd.f32 -0.42421293, %v673_v33  ;;  %v1186_v40 = vadd.f32 -0.42421293, %v674_v34  ;;  %v168_v46 = vld [vmem:[#allocation2 + $0x488] sm:$0xff] }
  0x9c   :  { %v1187_v41 = vadd.f32 -0.42421293, %v675_v35  ;;  %v677_v43 = vmul.f32 3.2456994, %v165_v37  ;;  %v678_v44 = vmul.f32 3.2456994, %v166_v38 }
  0x9d   :  { %1697 = vst [vmem:[#allocation5 + $0x450] sm:$0xff] %v1185_v39  ;;  %1698 = vst [vmem:[#allocation5 + $0x458] sm:$0xff] %v1186_v40  ;;  %v169_v47 = vld [vmem:[#allocation2 + $0x490] sm:$0xff]  ;;  %v1188_v48 = vadd.f32 -0.42421293, %v676_v42  ;;  %v170_v54 = vld [vmem:[#allocation2 + $0x498] sm:$0xff] }
  0x9e   :  { %1699 = vst [vmem:[#allocation5 + $0x460] sm:$0xff] %v1187_v41  ;;  %v1189_v49 = vadd.f32 -0.42421293, %v677_v43  ;;  %v1190_v50 = vadd.f32 -0.42421293, %v678_v44  ;;  %v171_v55 = vld [vmem:[#allocation2 + $0x4a0] sm:$0xff] }
  0x9f   :  { %v679_v51 = vmul.f32 3.2456994, %v167_v45  ;;  %v680_v52 = vmul.f32 3.2456994, %v168_v46  ;;  %v681_v53 = vmul.f32 3.2456994, %v169_v47 }
  0xa0   :  { %1700 = vst [vmem:[#allocation5 + $0x468] sm:$0xff] %v1188_v48  ;;  %1701 = vst [vmem:[#allocation5 + $0x470] sm:$0xff] %v1189_v49  ;;  %v172_v56 = vld [vmem:[#allocation2 + $0x4a8] sm:$0xff]  ;;  %v682_v60 = vmul.f32 3.2456994, %v170_v54  ;;  %v173_v63 = vld [vmem:[#allocation2 + $0x4b0] sm:$0xff] }
  0xa1   :  { %1702 = vst [vmem:[#allocation5 + $0x478] sm:$0xff] %v1190_v50  ;;  %v1191_v57 = vadd.f32 -0.42421293, %v679_v51  ;;  %v1192_v58 = vadd.f32 -0.42421293, %v680_v52  ;;  %v174_v0 = vld [vmem:[#allocation2 + $0x4b8] sm:$0xff] }
  0xa2   :  { %v1193_v59 = vadd.f32 -0.42421293, %v681_v53  ;;  %v683_v61 = vmul.f32 3.2456994, %v171_v55  ;;  %v684_v62 = vmul.f32 3.2456994, %v172_v56 }
  0xa3   :  { %1703 = vst [vmem:[#allocation5 + $0x480] sm:$0xff] %v1191_v57  ;;  %1704 = vst [vmem:[#allocation5 + $0x488] sm:$0xff] %v1192_v58  ;;  %v175_v1 = vld [vmem:[#allocation2 + $0x4c0] sm:$0xff]  ;;  %v1194_v2 = vadd.f32 -0.42421293, %v682_v60  ;;  %v176_v8 = vld [vmem:[#allocation2 + $0x4c8] sm:$0xff] }
  0xa4   :  { %1705 = vst [vmem:[#allocation5 + $0x490] sm:$0xff] %v1193_v59  ;;  %v1195_v3 = vadd.f32 -0.42421293, %v683_v61  ;;  %v1196_v4 = vadd.f32 -0.42421293, %v684_v62  ;;  %v177_v9 = vld [vmem:[#allocation2 + $0x4d0] sm:$0xff] }
  0xa5   :  { %v685_v5 = vmul.f32 3.2456994, %v173_v63  ;;  %v686_v6 = vmul.f32 3.2456994, %v174_v0  ;;  %v687_v7 = vmul.f32 3.2456994, %v175_v1 }
  0xa6   :  { %1706 = vst [vmem:[#allocation5 + $0x498] sm:$0xff] %v1194_v2  ;;  %1707 = vst [vmem:[#allocation5 + $0x4a0] sm:$0xff] %v1195_v3  ;;  %v178_v10 = vld [vmem:[#allocation2 + $0x4d8] sm:$0xff]  ;;  %v688_v14 = vmul.f32 3.2456994, %v176_v8  ;;  %v179_v17 = vld [vmem:[#allocation2 + $0x4e0] sm:$0xff] }
  0xa7   :  { %1708 = vst [vmem:[#allocation5 + $0x4a8] sm:$0xff] %v1196_v4  ;;  %v1197_v11 = vadd.f32 -0.42421293, %v685_v5  ;;  %v1198_v12 = vadd.f32 -0.42421293, %v686_v6  ;;  %v180_v18 = vld [vmem:[#allocation2 + $0x4e8] sm:$0xff] }
  0xa8   :  { %v1199_v13 = vadd.f32 -0.42421293, %v687_v7  ;;  %v689_v15 = vmul.f32 3.2456994, %v177_v9  ;;  %v690_v16 = vmul.f32 3.2456994, %v178_v10 }
  0xa9   :  { %1709 = vst [vmem:[#allocation5 + $0x4b0] sm:$0xff] %v1197_v11  ;;  %1710 = vst [vmem:[#allocation5 + $0x4b8] sm:$0xff] %v1198_v12  ;;  %v181_v19 = vld [vmem:[#allocation2 + $0x4f0] sm:$0xff]  ;;  %v1200_v20 = vadd.f32 -0.42421293, %v688_v14  ;;  %v182_v26 = vld [vmem:[#allocation2 + $0x4f8] sm:$0xff] }
  0xaa   :  { %1711 = vst [vmem:[#allocation5 + $0x4c0] sm:$0xff] %v1199_v13  ;;  %v1201_v21 = vadd.f32 -0.42421293, %v689_v15  ;;  %v1202_v22 = vadd.f32 -0.42421293, %v690_v16  ;;  %v183_v27 = vld [vmem:[#allocation2 + $0x500] sm:$0xff] }
  0xab   :  { %v691_v23 = vmul.f32 3.2456994, %v179_v17  ;;  %v692_v24 = vmul.f32 3.2456994, %v180_v18  ;;  %v693_v25 = vmul.f32 3.2456994, %v181_v19 }
  0xac   :  { %1712 = vst [vmem:[#allocation5 + $0x4c8] sm:$0xff] %v1200_v20  ;;  %1713 = vst [vmem:[#allocation5 + $0x4d0] sm:$0xff] %v1201_v21  ;;  %v184_v28 = vld [vmem:[#allocation2 + $0x508] sm:$0xff]  ;;  %v694_v32 = vmul.f32 3.2456994, %v182_v26  ;;  %v185_v35 = vld [vmem:[#allocation2 + $0x510] sm:$0xff] }
  0xad   :  { %1714 = vst [vmem:[#allocation5 + $0x4d8] sm:$0xff] %v1202_v22  ;;  %v1203_v29 = vadd.f32 -0.42421293, %v691_v23  ;;  %v1204_v30 = vadd.f32 -0.42421293, %v692_v24  ;;  %v186_v36 = vld [vmem:[#allocation2 + $0x518] sm:$0xff] }
  0xae   :  { %v1205_v31 = vadd.f32 -0.42421293, %v693_v25  ;;  %v695_v33 = vmul.f32 3.2456994, %v183_v27  ;;  %v696_v34 = vmul.f32 3.2456994, %v184_v28 }
  0xaf   :  { %1715 = vst [vmem:[#allocation5 + $0x4e0] sm:$0xff] %v1203_v29  ;;  %1716 = vst [vmem:[#allocation5 + $0x4e8] sm:$0xff] %v1204_v30  ;;  %v187_v37 = vld [vmem:[#allocation2 + $0x520] sm:$0xff]  ;;  %v1206_v38 = vadd.f32 -0.42421293, %v694_v32  ;;  %v188_v44 = vld [vmem:[#allocation2 + $0x528] sm:$0xff] }
  0xb0   :  { %1717 = vst [vmem:[#allocation5 + $0x4f0] sm:$0xff] %v1205_v31  ;;  %v1207_v39 = vadd.f32 -0.42421293, %v695_v33  ;;  %v1208_v40 = vadd.f32 -0.42421293, %v696_v34  ;;  %v189_v45 = vld [vmem:[#allocation2 + $0x530] sm:$0xff] }
  0xb1   :  { %v697_v41 = vmul.f32 3.2456994, %v185_v35  ;;  %v698_v42 = vmul.f32 3.2456994, %v186_v36  ;;  %v699_v43 = vmul.f32 3.2456994, %v187_v37 }
  0xb2   :  { %1718 = vst [vmem:[#allocation5 + $0x4f8] sm:$0xff] %v1206_v38  ;;  %1719 = vst [vmem:[#allocation5 + $0x500] sm:$0xff] %v1207_v39  ;;  %v190_v46 = vld [vmem:[#allocation2 + $0x538] sm:$0xff]  ;;  %v700_v50 = vmul.f32 3.2456994, %v188_v44  ;;  %v191_v53 = vld [vmem:[#allocation2 + $0x540] sm:$0xff] }
  0xb3   :  { %1720 = vst [vmem:[#allocation5 + $0x508] sm:$0xff] %v1208_v40  ;;  %v1209_v47 = vadd.f32 -0.42421293, %v697_v41  ;;  %v1210_v48 = vadd.f32 -0.42421293, %v698_v42  ;;  %v192_v54 = vld [vmem:[#allocation2 + $0x548] sm:$0xff] }
  0xb4   :  { %v1211_v49 = vadd.f32 -0.42421293, %v699_v43  ;;  %v701_v51 = vmul.f32 3.2456994, %v189_v45  ;;  %v702_v52 = vmul.f32 3.2456994, %v190_v46 }
  0xb5   :  { %1721 = vst [vmem:[#allocation5 + $0x510] sm:$0xff] %v1209_v47  ;;  %1722 = vst [vmem:[#allocation5 + $0x518] sm:$0xff] %v1210_v48  ;;  %v193_v55 = vld [vmem:[#allocation2 + $0x550] sm:$0xff]  ;;  %v1212_v56 = vadd.f32 -0.42421293, %v700_v50  ;;  %v194_v62 = vld [vmem:[#allocation2 + $0x558] sm:$0xff] }
  0xb6   :  { %1723 = vst [vmem:[#allocation5 + $0x520] sm:$0xff] %v1211_v49  ;;  %v1213_v57 = vadd.f32 -0.42421293, %v701_v51  ;;  %v1214_v58 = vadd.f32 -0.42421293, %v702_v52  ;;  %v195_v63 = vld [vmem:[#allocation2 + $0x560] sm:$0xff] }
  0xb7   :  { %v703_v59 = vmul.f32 3.2456994, %v191_v53  ;;  %v704_v60 = vmul.f32 3.2456994, %v192_v54  ;;  %v705_v61 = vmul.f32 3.2456994, %v193_v55 }
  0xb8   :  { %1724 = vst [vmem:[#allocation5 + $0x528] sm:$0xff] %v1212_v56  ;;  %1725 = vst [vmem:[#allocation5 + $0x530] sm:$0xff] %v1213_v57  ;;  %v196_v0 = vld [vmem:[#allocation2 + $0x568] sm:$0xff]  ;;  %v706_v4 = vmul.f32 3.2456994, %v194_v62  ;;  %v197_v7 = vld [vmem:[#allocation2 + $0x570] sm:$0xff] }
  0xb9   :  { %1726 = vst [vmem:[#allocation5 + $0x538] sm:$0xff] %v1214_v58  ;;  %v1215_v1 = vadd.f32 -0.42421293, %v703_v59  ;;  %v1216_v2 = vadd.f32 -0.42421293, %v704_v60  ;;  %v198_v8 = vld [vmem:[#allocation2 + $0x578] sm:$0xff] }
  0xba   :  { %v1217_v3 = vadd.f32 -0.42421293, %v705_v61  ;;  %v707_v5 = vmul.f32 3.2456994, %v195_v63  ;;  %v708_v6 = vmul.f32 3.2456994, %v196_v0 }
  0xbb   :  { %1727 = vst [vmem:[#allocation5 + $0x540] sm:$0xff] %v1215_v1  ;;  %1728 = vst [vmem:[#allocation5 + $0x548] sm:$0xff] %v1216_v2  ;;  %v199_v9 = vld [vmem:[#allocation2 + $0x580] sm:$0xff]  ;;  %v1218_v10 = vadd.f32 -0.42421293, %v706_v4  ;;  %v200_v16 = vld [vmem:[#allocation2 + $0x588] sm:$0xff] }
  0xbc   :  { %1729 = vst [vmem:[#allocation5 + $0x550] sm:$0xff] %v1217_v3  ;;  %v1219_v11 = vadd.f32 -0.42421293, %v707_v5  ;;  %v1220_v12 = vadd.f32 -0.42421293, %v708_v6  ;;  %v201_v17 = vld [vmem:[#allocation2 + $0x590] sm:$0xff] }
  0xbd   :  { %v709_v13 = vmul.f32 3.2456994, %v197_v7  ;;  %v710_v14 = vmul.f32 3.2456994, %v198_v8  ;;  %v711_v15 = vmul.f32 3.2456994, %v199_v9 }
  0xbe   :  { %1730 = vst [vmem:[#allocation5 + $0x558] sm:$0xff] %v1218_v10  ;;  %1731 = vst [vmem:[#allocation5 + $0x560] sm:$0xff] %v1219_v11  ;;  %v202_v18 = vld [vmem:[#allocation2 + $0x598] sm:$0xff]  ;;  %v712_v22 = vmul.f32 3.2456994, %v200_v16  ;;  %v203_v25 = vld [vmem:[#allocation2 + $0x5a0] sm:$0xff] }
  0xbf   :  { %1732 = vst [vmem:[#allocation5 + $0x568] sm:$0xff] %v1220_v12  ;;  %v1221_v19 = vadd.f32 -0.42421293, %v709_v13  ;;  %v1222_v20 = vadd.f32 -0.42421293, %v710_v14  ;;  %v204_v26 = vld [vmem:[#allocation2 + $0x5a8] sm:$0xff] }
  0xc0   :  { %v1223_v21 = vadd.f32 -0.42421293, %v711_v15  ;;  %v713_v23 = vmul.f32 3.2456994, %v201_v17  ;;  %v714_v24 = vmul.f32 3.2456994, %v202_v18 }
  0xc1   :  { %1733 = vst [vmem:[#allocation5 + $0x570] sm:$0xff] %v1221_v19  ;;  %1734 = vst [vmem:[#allocation5 + $0x578] sm:$0xff] %v1222_v20  ;;  %v205_v27 = vld [vmem:[#allocation2 + $0x5b0] sm:$0xff]  ;;  %v1224_v28 = vadd.f32 -0.42421293, %v712_v22  ;;  %v206_v34 = vld [vmem:[#allocation2 + $0x5b8] sm:$0xff] }
  0xc2   :  { %1735 = vst [vmem:[#allocation5 + $0x580] sm:$0xff] %v1223_v21  ;;  %v1225_v29 = vadd.f32 -0.42421293, %v713_v23  ;;  %v1226_v30 = vadd.f32 -0.42421293, %v714_v24  ;;  %v207_v35 = vld [vmem:[#allocation2 + $0x5c0] sm:$0xff] }
  0xc3   :  { %v715_v31 = vmul.f32 3.2456994, %v203_v25  ;;  %v716_v32 = vmul.f32 3.2456994, %v204_v26  ;;  %v717_v33 = vmul.f32 3.2456994, %v205_v27 }
  0xc4   :  { %1736 = vst [vmem:[#allocation5 + $0x588] sm:$0xff] %v1224_v28  ;;  %1737 = vst [vmem:[#allocation5 + $0x590] sm:$0xff] %v1225_v29  ;;  %v208_v36 = vld [vmem:[#allocation2 + $0x5c8] sm:$0xff]  ;;  %v718_v40 = vmul.f32 3.2456994, %v206_v34  ;;  %v209_v43 = vld [vmem:[#allocation2 + $0x5d0] sm:$0xff] }
  0xc5   :  { %1738 = vst [vmem:[#allocation5 + $0x598] sm:$0xff] %v1226_v30  ;;  %v1227_v37 = vadd.f32 -0.42421293, %v715_v31  ;;  %v1228_v38 = vadd.f32 -0.42421293, %v716_v32  ;;  %v210_v44 = vld [vmem:[#allocation2 + $0x5d8] sm:$0xff] }
  0xc6   :  { %v1229_v39 = vadd.f32 -0.42421293, %v717_v33  ;;  %v719_v41 = vmul.f32 3.2456994, %v207_v35  ;;  %v720_v42 = vmul.f32 3.2456994, %v208_v36 }
  0xc7   :  { %1739 = vst [vmem:[#allocation5 + $0x5a0] sm:$0xff] %v1227_v37  ;;  %1740 = vst [vmem:[#allocation5 + $0x5a8] sm:$0xff] %v1228_v38  ;;  %v211_v45 = vld [vmem:[#allocation2 + $0x5e0] sm:$0xff]  ;;  %v1230_v46 = vadd.f32 -0.42421293, %v718_v40  ;;  %v212_v52 = vld [vmem:[#allocation2 + $0x5e8] sm:$0xff] }
  0xc8   :  { %1741 = vst [vmem:[#allocation5 + $0x5b0] sm:$0xff] %v1229_v39  ;;  %v1231_v47 = vadd.f32 -0.42421293, %v719_v41  ;;  %v1232_v48 = vadd.f32 -0.42421293, %v720_v42  ;;  %v213_v53 = vld [vmem:[#allocation2 + $0x5f0] sm:$0xff] }
  0xc9   :  { %v721_v49 = vmul.f32 3.2456994, %v209_v43  ;;  %v722_v50 = vmul.f32 3.2456994, %v210_v44  ;;  %v723_v51 = vmul.f32 3.2456994, %v211_v45 }
  0xca   :  { %1742 = vst [vmem:[#allocation5 + $0x5b8] sm:$0xff] %v1230_v46  ;;  %1743 = vst [vmem:[#allocation5 + $0x5c0] sm:$0xff] %v1231_v47  ;;  %v214_v54 = vld [vmem:[#allocation2 + $0x5f8] sm:$0xff]  ;;  %v724_v58 = vmul.f32 3.2456994, %v212_v52  ;;  %v215_v61 = vld [vmem:[#allocation2 + $0x600] sm:$0xff] }
  0xcb   :  { %1744 = vst [vmem:[#allocation5 + $0x5c8] sm:$0xff] %v1232_v48  ;;  %v1233_v55 = vadd.f32 -0.42421293, %v721_v49  ;;  %v1234_v56 = vadd.f32 -0.42421293, %v722_v50  ;;  %v216_v62 = vld [vmem:[#allocation2 + $0x608] sm:$0xff] }
  0xcc   :  { %v1235_v57 = vadd.f32 -0.42421293, %v723_v51  ;;  %v725_v59 = vmul.f32 3.2456994, %v213_v53  ;;  %v726_v60 = vmul.f32 3.2456994, %v214_v54 }
  0xcd   :  { %1745 = vst [vmem:[#allocation5 + $0x5d0] sm:$0xff] %v1233_v55  ;;  %1746 = vst [vmem:[#allocation5 + $0x5d8] sm:$0xff] %v1234_v56  ;;  %v217_v63 = vld [vmem:[#allocation2 + $0x610] sm:$0xff]  ;;  %v1236_v0 = vadd.f32 -0.42421293, %v724_v58  ;;  %v218_v6 = vld [vmem:[#allocation2 + $0x618] sm:$0xff] }
  0xce   :  { %1747 = vst [vmem:[#allocation5 + $0x5e0] sm:$0xff] %v1235_v57  ;;  %v1237_v1 = vadd.f32 -0.42421293, %v725_v59  ;;  %v1238_v2 = vadd.f32 -0.42421293, %v726_v60  ;;  %v219_v7 = vld [vmem:[#allocation2 + $0x620] sm:$0xff] }
  0xcf   :  { %v727_v3 = vmul.f32 3.2456994, %v215_v61  ;;  %v728_v4 = vmul.f32 3.2456994, %v216_v62  ;;  %v729_v5 = vmul.f32 3.2456994, %v217_v63 }
  0xd0   :  { %1748 = vst [vmem:[#allocation5 + $0x5e8] sm:$0xff] %v1236_v0  ;;  %1749 = vst [vmem:[#allocation5 + $0x5f0] sm:$0xff] %v1237_v1  ;;  %v220_v8 = vld [vmem:[#allocation2 + $0x628] sm:$0xff]  ;;  %v730_v12 = vmul.f32 3.2456994, %v218_v6  ;;  %v221_v15 = vld [vmem:[#allocation2 + $0x630] sm:$0xff] }
  0xd1   :  { %1750 = vst [vmem:[#allocation5 + $0x5f8] sm:$0xff] %v1238_v2  ;;  %v1239_v9 = vadd.f32 -0.42421293, %v727_v3  ;;  %v1240_v10 = vadd.f32 -0.42421293, %v728_v4  ;;  %v222_v16 = vld [vmem:[#allocation2 + $0x638] sm:$0xff] }
  0xd2   :  { %v1241_v11 = vadd.f32 -0.42421293, %v729_v5  ;;  %v731_v13 = vmul.f32 3.2456994, %v219_v7  ;;  %v732_v14 = vmul.f32 3.2456994, %v220_v8 }
  0xd3   :  { %1751 = vst [vmem:[#allocation5 + $0x600] sm:$0xff] %v1239_v9  ;;  %1752 = vst [vmem:[#allocation5 + $0x608] sm:$0xff] %v1240_v10  ;;  %v223_v17 = vld [vmem:[#allocation2 + $0x640] sm:$0xff]  ;;  %v1242_v18 = vadd.f32 -0.42421293, %v730_v12  ;;  %v224_v24 = vld [vmem:[#allocation2 + $0x648] sm:$0xff] }
  0xd4   :  { %1753 = vst [vmem:[#allocation5 + $0x610] sm:$0xff] %v1241_v11  ;;  %v1243_v19 = vadd.f32 -0.42421293, %v731_v13  ;;  %v1244_v20 = vadd.f32 -0.42421293, %v732_v14  ;;  %v225_v25 = vld [vmem:[#allocation2 + $0x650] sm:$0xff] }
  0xd5   :  { %v733_v21 = vmul.f32 3.2456994, %v221_v15  ;;  %v734_v22 = vmul.f32 3.2456994, %v222_v16  ;;  %v735_v23 = vmul.f32 3.2456994, %v223_v17 }
  0xd6   :  { %1754 = vst [vmem:[#allocation5 + $0x618] sm:$0xff] %v1242_v18  ;;  %1755 = vst [vmem:[#allocation5 + $0x620] sm:$0xff] %v1243_v19  ;;  %v226_v26 = vld [vmem:[#allocation2 + $0x658] sm:$0xff]  ;;  %v736_v30 = vmul.f32 3.2456994, %v224_v24  ;;  %v227_v33 = vld [vmem:[#allocation2 + $0x660] sm:$0xff] }
  0xd7   :  { %1756 = vst [vmem:[#allocation5 + $0x628] sm:$0xff] %v1244_v20  ;;  %v1245_v27 = vadd.f32 -0.42421293, %v733_v21  ;;  %v1246_v28 = vadd.f32 -0.42421293, %v734_v22  ;;  %v228_v34 = vld [vmem:[#allocation2 + $0x668] sm:$0xff] }
  0xd8   :  { %v1247_v29 = vadd.f32 -0.42421293, %v735_v23  ;;  %v737_v31 = vmul.f32 3.2456994, %v225_v25  ;;  %v738_v32 = vmul.f32 3.2456994, %v226_v26 }
  0xd9   :  { %1757 = vst [vmem:[#allocation5 + $0x630] sm:$0xff] %v1245_v27  ;;  %1758 = vst [vmem:[#allocation5 + $0x638] sm:$0xff] %v1246_v28  ;;  %v229_v35 = vld [vmem:[#allocation2 + $0x670] sm:$0xff]  ;;  %v1248_v36 = vadd.f32 -0.42421293, %v736_v30  ;;  %v230_v42 = vld [vmem:[#allocation2 + $0x678] sm:$0xff] }
  0xda   :  { %1759 = vst [vmem:[#allocation5 + $0x640] sm:$0xff] %v1247_v29  ;;  %v1249_v37 = vadd.f32 -0.42421293, %v737_v31  ;;  %v1250_v38 = vadd.f32 -0.42421293, %v738_v32  ;;  %v231_v43 = vld [vmem:[#allocation2 + $0x680] sm:$0xff] }
  0xdb   :  { %v739_v39 = vmul.f32 3.2456994, %v227_v33  ;;  %v740_v40 = vmul.f32 3.2456994, %v228_v34  ;;  %v741_v41 = vmul.f32 3.2456994, %v229_v35 }
  0xdc   :  { %1760 = vst [vmem:[#allocation5 + $0x648] sm:$0xff] %v1248_v36  ;;  %1761 = vst [vmem:[#allocation5 + $0x650] sm:$0xff] %v1249_v37  ;;  %v232_v44 = vld [vmem:[#allocation2 + $0x688] sm:$0xff]  ;;  %v742_v48 = vmul.f32 3.2456994, %v230_v42  ;;  %v233_v51 = vld [vmem:[#allocation2 + $0x690] sm:$0xff] }
  0xdd   :  { %1762 = vst [vmem:[#allocation5 + $0x658] sm:$0xff] %v1250_v38  ;;  %v1251_v45 = vadd.f32 -0.42421293, %v739_v39  ;;  %v1252_v46 = vadd.f32 -0.42421293, %v740_v40  ;;  %v234_v52 = vld [vmem:[#allocation2 + $0x698] sm:$0xff] }
  0xde   :  { %v1253_v47 = vadd.f32 -0.42421293, %v741_v41  ;;  %v743_v49 = vmul.f32 3.2456994, %v231_v43  ;;  %v744_v50 = vmul.f32 3.2456994, %v232_v44 }
  0xdf   :  { %1763 = vst [vmem:[#allocation5 + $0x660] sm:$0xff] %v1251_v45  ;;  %1764 = vst [vmem:[#allocation5 + $0x668] sm:$0xff] %v1252_v46  ;;  %v235_v53 = vld [vmem:[#allocation2 + $0x6a0] sm:$0xff]  ;;  %v1254_v54 = vadd.f32 -0.42421293, %v742_v48  ;;  %v236_v60 = vld [vmem:[#allocation2 + $0x6a8] sm:$0xff] }
  0xe0   :  { %1765 = vst [vmem:[#allocation5 + $0x670] sm:$0xff] %v1253_v47  ;;  %v1255_v55 = vadd.f32 -0.42421293, %v743_v49  ;;  %v1256_v56 = vadd.f32 -0.42421293, %v744_v50  ;;  %v237_v61 = vld [vmem:[#allocation2 + $0x6b0] sm:$0xff] }
  0xe1   :  { %v745_v57 = vmul.f32 3.2456994, %v233_v51  ;;  %v746_v58 = vmul.f32 3.2456994, %v234_v52  ;;  %v747_v59 = vmul.f32 3.2456994, %v235_v53 }
  0xe2   :  { %1766 = vst [vmem:[#allocation5 + $0x678] sm:$0xff] %v1254_v54  ;;  %1767 = vst [vmem:[#allocation5 + $0x680] sm:$0xff] %v1255_v55  ;;  %v238_v62 = vld [vmem:[#allocation2 + $0x6b8] sm:$0xff]  ;;  %v748_v2 = vmul.f32 3.2456994, %v236_v60  ;;  %v239_v5 = vld [vmem:[#allocation2 + $0x6c0] sm:$0xff] }
  0xe3   :  { %1768 = vst [vmem:[#allocation5 + $0x688] sm:$0xff] %v1256_v56  ;;  %v1257_v63 = vadd.f32 -0.42421293, %v745_v57  ;;  %v1258_v0 = vadd.f32 -0.42421293, %v746_v58  ;;  %v240_v6 = vld [vmem:[#allocation2 + $0x6c8] sm:$0xff] }
  0xe4   :  { %v1259_v1 = vadd.f32 -0.42421293, %v747_v59  ;;  %v749_v3 = vmul.f32 3.2456994, %v237_v61  ;;  %v750_v4 = vmul.f32 3.2456994, %v238_v62 }
  0xe5   :  { %1769 = vst [vmem:[#allocation5 + $0x690] sm:$0xff] %v1257_v63  ;;  %1770 = vst [vmem:[#allocation5 + $0x698] sm:$0xff] %v1258_v0  ;;  %v241_v7 = vld [vmem:[#allocation2 + $0x6d0] sm:$0xff]  ;;  %v1260_v8 = vadd.f32 -0.42421293, %v748_v2  ;;  %v242_v14 = vld [vmem:[#allocation2 + $0x6d8] sm:$0xff] }
  0xe6   :  { %1771 = vst [vmem:[#allocation5 + $0x6a0] sm:$0xff] %v1259_v1  ;;  %v1261_v9 = vadd.f32 -0.42421293, %v749_v3  ;;  %v1262_v10 = vadd.f32 -0.42421293, %v750_v4  ;;  %v243_v15 = vld [vmem:[#allocation2 + $0x6e0] sm:$0xff] }
  0xe7   :  { %v751_v11 = vmul.f32 3.2456994, %v239_v5  ;;  %v752_v12 = vmul.f32 3.2456994, %v240_v6  ;;  %v753_v13 = vmul.f32 3.2456994, %v241_v7 }
  0xe8   :  { %1772 = vst [vmem:[#allocation5 + $0x6a8] sm:$0xff] %v1260_v8  ;;  %1773 = vst [vmem:[#allocation5 + $0x6b0] sm:$0xff] %v1261_v9  ;;  %v244_v16 = vld [vmem:[#allocation2 + $0x6e8] sm:$0xff]  ;;  %v754_v20 = vmul.f32 3.2456994, %v242_v14  ;;  %v245_v23 = vld [vmem:[#allocation2 + $0x6f0] sm:$0xff] }
  0xe9   :  { %1774 = vst [vmem:[#allocation5 + $0x6b8] sm:$0xff] %v1262_v10  ;;  %v1263_v17 = vadd.f32 -0.42421293, %v751_v11  ;;  %v1264_v18 = vadd.f32 -0.42421293, %v752_v12  ;;  %v246_v24 = vld [vmem:[#allocation2 + $0x6f8] sm:$0xff] }
  0xea   :  { %v1265_v19 = vadd.f32 -0.42421293, %v753_v13  ;;  %v755_v21 = vmul.f32 3.2456994, %v243_v15  ;;  %v756_v22 = vmul.f32 3.2456994, %v244_v16 }
  0xeb   :  { %1775 = vst [vmem:[#allocation5 + $0x6c0] sm:$0xff] %v1263_v17  ;;  %1776 = vst [vmem:[#allocation5 + $0x6c8] sm:$0xff] %v1264_v18  ;;  %v247_v25 = vld [vmem:[#allocation2 + $0x700] sm:$0xff]  ;;  %v1266_v26 = vadd.f32 -0.42421293, %v754_v20  ;;  %v248_v32 = vld [vmem:[#allocation2 + $0x708] sm:$0xff] }
  0xec   :  { %1777 = vst [vmem:[#allocation5 + $0x6d0] sm:$0xff] %v1265_v19  ;;  %v1267_v27 = vadd.f32 -0.42421293, %v755_v21  ;;  %v1268_v28 = vadd.f32 -0.42421293, %v756_v22  ;;  %v249_v33 = vld [vmem:[#allocation2 + $0x710] sm:$0xff] }
  0xed   :  { %v757_v29 = vmul.f32 3.2456994, %v245_v23  ;;  %v758_v30 = vmul.f32 3.2456994, %v246_v24  ;;  %v759_v31 = vmul.f32 3.2456994, %v247_v25 }
  0xee   :  { %1778 = vst [vmem:[#allocation5 + $0x6d8] sm:$0xff] %v1266_v26  ;;  %1779 = vst [vmem:[#allocation5 + $0x6e0] sm:$0xff] %v1267_v27  ;;  %v250_v34 = vld [vmem:[#allocation2 + $0x718] sm:$0xff]  ;;  %v760_v38 = vmul.f32 3.2456994, %v248_v32  ;;  %v251_v41 = vld [vmem:[#allocation2 + $0x720] sm:$0xff] }
  0xef   :  { %1780 = vst [vmem:[#allocation5 + $0x6e8] sm:$0xff] %v1268_v28  ;;  %v1269_v35 = vadd.f32 -0.42421293, %v757_v29  ;;  %v1270_v36 = vadd.f32 -0.42421293, %v758_v30  ;;  %v252_v42 = vld [vmem:[#allocation2 + $0x728] sm:$0xff] }
  0xf0   :  { %v1271_v37 = vadd.f32 -0.42421293, %v759_v31  ;;  %v761_v39 = vmul.f32 3.2456994, %v249_v33  ;;  %v762_v40 = vmul.f32 3.2456994, %v250_v34 }
  0xf1   :  { %1781 = vst [vmem:[#allocation5 + $0x6f0] sm:$0xff] %v1269_v35  ;;  %1782 = vst [vmem:[#allocation5 + $0x6f8] sm:$0xff] %v1270_v36  ;;  %v253_v43 = vld [vmem:[#allocation2 + $0x730] sm:$0xff]  ;;  %v1272_v44 = vadd.f32 -0.42421293, %v760_v38  ;;  %v254_v50 = vld [vmem:[#allocation2 + $0x738] sm:$0xff] }
  0xf2   :  { %1783 = vst [vmem:[#allocation5 + $0x700] sm:$0xff] %v1271_v37  ;;  %v1273_v45 = vadd.f32 -0.42421293, %v761_v39  ;;  %v1274_v46 = vadd.f32 -0.42421293, %v762_v40  ;;  %v255_v51 = vld [vmem:[#allocation2 + $0x740] sm:$0xff] }
  0xf3   :  { %v763_v47 = vmul.f32 3.2456994, %v251_v41  ;;  %v764_v48 = vmul.f32 3.2456994, %v252_v42  ;;  %v765_v49 = vmul.f32 3.2456994, %v253_v43 }
  0xf4   :  { %1784 = vst [vmem:[#allocation5 + $0x708] sm:$0xff] %v1272_v44  ;;  %1785 = vst [vmem:[#allocation5 + $0x710] sm:$0xff] %v1273_v45  ;;  %v256_v52 = vld [vmem:[#allocation2 + $0x748] sm:$0xff]  ;;  %v766_v56 = vmul.f32 3.2456994, %v254_v50  ;;  %v257_v59 = vld [vmem:[#allocation2 + $0x750] sm:$0xff] }
  0xf5   :  { %1786 = vst [vmem:[#allocation5 + $0x718] sm:$0xff] %v1274_v46  ;;  %v1275_v53 = vadd.f32 -0.42421293, %v763_v47  ;;  %v1276_v54 = vadd.f32 -0.42421293, %v764_v48  ;;  %v258_v60 = vld [vmem:[#allocation2 + $0x758] sm:$0xff] }
  0xf6   :  { %v1277_v55 = vadd.f32 -0.42421293, %v765_v49  ;;  %v767_v57 = vmul.f32 3.2456994, %v255_v51  ;;  %v768_v58 = vmul.f32 3.2456994, %v256_v52 }
  0xf7   :  { %1787 = vst [vmem:[#allocation5 + $0x720] sm:$0xff] %v1275_v53  ;;  %1788 = vst [vmem:[#allocation5 + $0x728] sm:$0xff] %v1276_v54  ;;  %v259_v61 = vld [vmem:[#allocation2 + $0x760] sm:$0xff]  ;;  %v1278_v62 = vadd.f32 -0.42421293, %v766_v56  ;;  %v260_v4 = vld [vmem:[#allocation2 + $0x768] sm:$0xff] }
  0xf8   :  { %1789 = vst [vmem:[#allocation5 + $0x730] sm:$0xff] %v1277_v55  ;;  %v1279_v63 = vadd.f32 -0.42421293, %v767_v57  ;;  %v1280_v0 = vadd.f32 -0.42421293, %v768_v58  ;;  %v261_v5 = vld [vmem:[#allocation2 + $0x770] sm:$0xff] }
  0xf9   :  { %v769_v1 = vmul.f32 3.2456994, %v257_v59  ;;  %v770_v2 = vmul.f32 3.2456994, %v258_v60  ;;  %v771_v3 = vmul.f32 3.2456994, %v259_v61 }
  0xfa   :  { %1790 = vst [vmem:[#allocation5 + $0x738] sm:$0xff] %v1278_v62  ;;  %1791 = vst [vmem:[#allocation5 + $0x740] sm:$0xff] %v1279_v63  ;;  %v262_v6 = vld [vmem:[#allocation2 + $0x778] sm:$0xff]  ;;  %v772_v10 = vmul.f32 3.2456994, %v260_v4  ;;  %v263_v13 = vld [vmem:[#allocation2 + $0x780] sm:$0xff] }
  0xfb   :  { %1792 = vst [vmem:[#allocation5 + $0x748] sm:$0xff] %v1280_v0  ;;  %v1281_v7 = vadd.f32 -0.42421293, %v769_v1  ;;  %v1282_v8 = vadd.f32 -0.42421293, %v770_v2  ;;  %v264_v14 = vld [vmem:[#allocation2 + $0x788] sm:$0xff] }
  0xfc   :  { %v1283_v9 = vadd.f32 -0.42421293, %v771_v3  ;;  %v773_v11 = vmul.f32 3.2456994, %v261_v5  ;;  %v774_v12 = vmul.f32 3.2456994, %v262_v6 }
  0xfd   :  { %1793 = vst [vmem:[#allocation5 + $0x750] sm:$0xff] %v1281_v7  ;;  %1794 = vst [vmem:[#allocation5 + $0x758] sm:$0xff] %v1282_v8  ;;  %v265_v15 = vld [vmem:[#allocation2 + $0x790] sm:$0xff]  ;;  %v1284_v16 = vadd.f32 -0.42421293, %v772_v10  ;;  %v266_v22 = vld [vmem:[#allocation2 + $0x798] sm:$0xff] }
  0xfe   :  { %1795 = vst [vmem:[#allocation5 + $0x760] sm:$0xff] %v1283_v9  ;;  %v1285_v17 = vadd.f32 -0.42421293, %v773_v11  ;;  %v1286_v18 = vadd.f32 -0.42421293, %v774_v12  ;;  %v267_v23 = vld [vmem:[#allocation2 + $0x7a0] sm:$0xff] }
  0xff   :  { %v775_v19 = vmul.f32 3.2456994, %v263_v13  ;;  %v776_v20 = vmul.f32 3.2456994, %v264_v14  ;;  %v777_v21 = vmul.f32 3.2456994, %v265_v15 }
 0x100   :  { %1796 = vst [vmem:[#allocation5 + $0x768] sm:$0xff] %v1284_v16  ;;  %1797 = vst [vmem:[#allocation5 + $0x770] sm:$0xff] %v1285_v17  ;;  %v268_v24 = vld [vmem:[#allocation2 + $0x7a8] sm:$0xff]  ;;  %v778_v28 = vmul.f32 3.2456994, %v266_v22  ;;  %v269_v31 = vld [vmem:[#allocation2 + $0x7b0] sm:$0xff] }
 0x101   :  { %1798 = vst [vmem:[#allocation5 + $0x778] sm:$0xff] %v1286_v18  ;;  %v1287_v25 = vadd.f32 -0.42421293, %v775_v19  ;;  %v1288_v26 = vadd.f32 -0.42421293, %v776_v20  ;;  %v270_v32 = vld [vmem:[#allocation2 + $0x7b8] sm:$0xff] }
 0x102   :  { %v1289_v27 = vadd.f32 -0.42421293, %v777_v21  ;;  %v779_v29 = vmul.f32 3.2456994, %v267_v23  ;;  %v780_v30 = vmul.f32 3.2456994, %v268_v24 }
 0x103   :  { %1799 = vst [vmem:[#allocation5 + $0x780] sm:$0xff] %v1287_v25  ;;  %1800 = vst [vmem:[#allocation5 + $0x788] sm:$0xff] %v1288_v26  ;;  %v271_v33 = vld [vmem:[#allocation2 + $0x7c0] sm:$0xff]  ;;  %v1290_v34 = vadd.f32 -0.42421293, %v778_v28  ;;  %v272_v40 = vld [vmem:[#allocation2 + $0x7c8] sm:$0xff] }
 0x104   :  { %1801 = vst [vmem:[#allocation5 + $0x790] sm:$0xff] %v1289_v27  ;;  %v1291_v35 = vadd.f32 -0.42421293, %v779_v29  ;;  %v1292_v36 = vadd.f32 -0.42421293, %v780_v30  ;;  %v273_v41 = vld [vmem:[#allocation2 + $0x7d0] sm:$0xff] }
 0x105   :  { %v781_v37 = vmul.f32 3.2456994, %v269_v31  ;;  %v782_v38 = vmul.f32 3.2456994, %v270_v32  ;;  %v783_v39 = vmul.f32 3.2456994, %v271_v33 }
 0x106   :  { %1802 = vst [vmem:[#allocation5 + $0x798] sm:$0xff] %v1290_v34  ;;  %1803 = vst [vmem:[#allocation5 + $0x7a0] sm:$0xff] %v1291_v35  ;;  %v274_v42 = vld [vmem:[#allocation2 + $0x7d8] sm:$0xff]  ;;  %v784_v46 = vmul.f32 3.2456994, %v272_v40  ;;  %v275_v49 = vld [vmem:[#allocation2 + $0x7e0] sm:$0xff] }
 0x107   :  { %1804 = vst [vmem:[#allocation5 + $0x7a8] sm:$0xff] %v1292_v36  ;;  %v1293_v43 = vadd.f32 -0.42421293, %v781_v37  ;;  %v1294_v44 = vadd.f32 -0.42421293, %v782_v38  ;;  %v276_v50 = vld [vmem:[#allocation2 + $0x7e8] sm:$0xff] }
 0x108   :  { %v1295_v45 = vadd.f32 -0.42421293, %v783_v39  ;;  %v785_v47 = vmul.f32 3.2456994, %v273_v41  ;;  %v786_v48 = vmul.f32 3.2456994, %v274_v42 }
 0x109   :  { %1805 = vst [vmem:[#allocation5 + $0x7b0] sm:$0xff] %v1293_v43  ;;  %1806 = vst [vmem:[#allocation5 + $0x7b8] sm:$0xff] %v1294_v44  ;;  %v277_v51 = vld [vmem:[#allocation2 + $0x7f0] sm:$0xff]  ;;  %v1296_v52 = vadd.f32 -0.42421293, %v784_v46  ;;  %v278_v58 = vld [vmem:[#allocation2 + $0x7f8] sm:$0xff] }
 0x10a   :  { %1807 = vst [vmem:[#allocation5 + $0x7c0] sm:$0xff] %v1295_v45  ;;  %v1297_v53 = vadd.f32 -0.42421293, %v785_v47  ;;  %v1298_v54 = vadd.f32 -0.42421293, %v786_v48  ;;  %v279_v59 = vld [vmem:[#allocation2 + $0x800] sm:$0xff] }
 0x10b   :  { %v787_v55 = vmul.f32 3.2456994, %v275_v49  ;;  %v788_v56 = vmul.f32 3.2456994, %v276_v50  ;;  %v789_v57 = vmul.f32 3.2456994, %v277_v51 }
 0x10c   :  { %1808 = vst [vmem:[#allocation5 + $0x7c8] sm:$0xff] %v1296_v52  ;;  %1809 = vst [vmem:[#allocation5 + $0x7d0] sm:$0xff] %v1297_v53  ;;  %v280_v60 = vld [vmem:[#allocation2 + $0x808] sm:$0xff]  ;;  %v790_v0 = vmul.f32 3.2456994, %v278_v58  ;;  %v281_v3 = vld [vmem:[#allocation2 + $0x810] sm:$0xff] }
 0x10d   :  { %1810 = vst [vmem:[#allocation5 + $0x7d8] sm:$0xff] %v1298_v54  ;;  %v1299_v61 = vadd.f32 -0.42421293, %v787_v55  ;;  %v1300_v62 = vadd.f32 -0.42421293, %v788_v56  ;;  %v282_v4 = vld [vmem:[#allocation2 + $0x818] sm:$0xff] }
 0x10e   :  { %v1301_v63 = vadd.f32 -0.42421293, %v789_v57  ;;  %v791_v1 = vmul.f32 3.2456994, %v279_v59  ;;  %v792_v2 = vmul.f32 3.2456994, %v280_v60 }
 0x10f   :  { %1811 = vst [vmem:[#allocation5 + $0x7e0] sm:$0xff] %v1299_v61  ;;  %1812 = vst [vmem:[#allocation5 + $0x7e8] sm:$0xff] %v1300_v62  ;;  %v283_v5 = vld [vmem:[#allocation2 + $0x820] sm:$0xff]  ;;  %v1302_v6 = vadd.f32 -0.42421293, %v790_v0  ;;  %v284_v12 = vld [vmem:[#allocation2 + $0x828] sm:$0xff] }
 0x110   :  { %1813 = vst [vmem:[#allocation5 + $0x7f0] sm:$0xff] %v1301_v63  ;;  %v1303_v7 = vadd.f32 -0.42421293, %v791_v1  ;;  %v1304_v8 = vadd.f32 -0.42421293, %v792_v2  ;;  %v285_v13 = vld [vmem:[#allocation2 + $0x830] sm:$0xff] }
 0x111   :  { %v793_v9 = vmul.f32 3.2456994, %v281_v3  ;;  %v794_v10 = vmul.f32 3.2456994, %v282_v4  ;;  %v795_v11 = vmul.f32 3.2456994, %v283_v5 }
 0x112   :  { %1814 = vst [vmem:[#allocation5 + $0x7f8] sm:$0xff] %v1302_v6  ;;  %1815 = vst [vmem:[#allocation5 + $0x800] sm:$0xff] %v1303_v7  ;;  %v286_v14 = vld [vmem:[#allocation2 + $0x838] sm:$0xff]  ;;  %v796_v18 = vmul.f32 3.2456994, %v284_v12  ;;  %v287_v21 = vld [vmem:[#allocation2 + $0x840] sm:$0xff] }
 0x113   :  { %1816 = vst [vmem:[#allocation5 + $0x808] sm:$0xff] %v1304_v8  ;;  %v1305_v15 = vadd.f32 -0.42421293, %v793_v9  ;;  %v1306_v16 = vadd.f32 -0.42421293, %v794_v10  ;;  %v288_v22 = vld [vmem:[#allocation2 + $0x848] sm:$0xff] }
 0x114   :  { %v1307_v17 = vadd.f32 -0.42421293, %v795_v11  ;;  %v797_v19 = vmul.f32 3.2456994, %v285_v13  ;;  %v798_v20 = vmul.f32 3.2456994, %v286_v14 }
 0x115   :  { %1817 = vst [vmem:[#allocation5 + $0x810] sm:$0xff] %v1305_v15  ;;  %1818 = vst [vmem:[#allocation5 + $0x818] sm:$0xff] %v1306_v16  ;;  %v289_v23 = vld [vmem:[#allocation2 + $0x850] sm:$0xff]  ;;  %v1308_v24 = vadd.f32 -0.42421293, %v796_v18  ;;  %v290_v30 = vld [vmem:[#allocation2 + $0x858] sm:$0xff] }
 0x116   :  { %1819 = vst [vmem:[#allocation5 + $0x820] sm:$0xff] %v1307_v17  ;;  %v1309_v25 = vadd.f32 -0.42421293, %v797_v19  ;;  %v1310_v26 = vadd.f32 -0.42421293, %v798_v20  ;;  %v291_v31 = vld [vmem:[#allocation2 + $0x860] sm:$0xff] }
 0x117   :  { %v799_v27 = vmul.f32 3.2456994, %v287_v21  ;;  %v800_v28 = vmul.f32 3.2456994, %v288_v22  ;;  %v801_v29 = vmul.f32 3.2456994, %v289_v23 }
 0x118   :  { %1820 = vst [vmem:[#allocation5 + $0x828] sm:$0xff] %v1308_v24  ;;  %1821 = vst [vmem:[#allocation5 + $0x830] sm:$0xff] %v1309_v25  ;;  %v292_v32 = vld [vmem:[#allocation2 + $0x868] sm:$0xff]  ;;  %v802_v36 = vmul.f32 3.2456994, %v290_v30  ;;  %v293_v39 = vld [vmem:[#allocation2 + $0x870] sm:$0xff] }
 0x119   :  { %1822 = vst [vmem:[#allocation5 + $0x838] sm:$0xff] %v1310_v26  ;;  %v1311_v33 = vadd.f32 -0.42421293, %v799_v27  ;;  %v1312_v34 = vadd.f32 -0.42421293, %v800_v28  ;;  %v294_v40 = vld [vmem:[#allocation2 + $0x878] sm:$0xff] }
 0x11a   :  { %v1313_v35 = vadd.f32 -0.42421293, %v801_v29  ;;  %v803_v37 = vmul.f32 3.2456994, %v291_v31  ;;  %v804_v38 = vmul.f32 3.2456994, %v292_v32 }
 0x11b   :  { %1823 = vst [vmem:[#allocation5 + $0x840] sm:$0xff] %v1311_v33  ;;  %1824 = vst [vmem:[#allocation5 + $0x848] sm:$0xff] %v1312_v34  ;;  %v295_v41 = vld [vmem:[#allocation2 + $0x880] sm:$0xff]  ;;  %v1314_v42 = vadd.f32 -0.42421293, %v802_v36  ;;  %v296_v48 = vld [vmem:[#allocation2 + $0x888] sm:$0xff] }
 0x11c   :  { %1825 = vst [vmem:[#allocation5 + $0x850] sm:$0xff] %v1313_v35  ;;  %v1315_v43 = vadd.f32 -0.42421293, %v803_v37  ;;  %v1316_v44 = vadd.f32 -0.42421293, %v804_v38  ;;  %v297_v49 = vld [vmem:[#allocation2 + $0x890] sm:$0xff] }
 0x11d   :  { %v805_v45 = vmul.f32 3.2456994, %v293_v39  ;;  %v806_v46 = vmul.f32 3.2456994, %v294_v40  ;;  %v807_v47 = vmul.f32 3.2456994, %v295_v41 }
 0x11e   :  { %1826 = vst [vmem:[#allocation5 + $0x858] sm:$0xff] %v1314_v42  ;;  %1827 = vst [vmem:[#allocation5 + $0x860] sm:$0xff] %v1315_v43  ;;  %v298_v50 = vld [vmem:[#allocation2 + $0x898] sm:$0xff]  ;;  %v808_v54 = vmul.f32 3.2456994, %v296_v48  ;;  %v299_v57 = vld [vmem:[#allocation2 + $0x8a0] sm:$0xff] }
 0x11f   :  { %1828 = vst [vmem:[#allocation5 + $0x868] sm:$0xff] %v1316_v44  ;;  %v1317_v51 = vadd.f32 -0.42421293, %v805_v45  ;;  %v1318_v52 = vadd.f32 -0.42421293, %v806_v46  ;;  %v300_v58 = vld [vmem:[#allocation2 + $0x8a8] sm:$0xff] }
 0x120   :  { %v1319_v53 = vadd.f32 -0.42421293, %v807_v47  ;;  %v809_v55 = vmul.f32 3.2456994, %v297_v49  ;;  %v810_v56 = vmul.f32 3.2456994, %v298_v50 }
 0x121   :  { %1829 = vst [vmem:[#allocation5 + $0x870] sm:$0xff] %v1317_v51  ;;  %1830 = vst [vmem:[#allocation5 + $0x878] sm:$0xff] %v1318_v52  ;;  %v301_v59 = vld [vmem:[#allocation2 + $0x8b0] sm:$0xff]  ;;  %v1320_v60 = vadd.f32 -0.42421293, %v808_v54  ;;  %v302_v2 = vld [vmem:[#allocation2 + $0x8b8] sm:$0xff] }
 0x122   :  { %1831 = vst [vmem:[#allocation5 + $0x880] sm:$0xff] %v1319_v53  ;;  %v1321_v61 = vadd.f32 -0.42421293, %v809_v55  ;;  %v1322_v62 = vadd.f32 -0.42421293, %v810_v56  ;;  %v303_v3 = vld [vmem:[#allocation2 + $0x8c0] sm:$0xff] }
 0x123   :  { %v811_v63 = vmul.f32 3.2456994, %v299_v57  ;;  %v812_v0 = vmul.f32 3.2456994, %v300_v58  ;;  %v813_v1 = vmul.f32 3.2456994, %v301_v59 }
 0x124   :  { %1832 = vst [vmem:[#allocation5 + $0x888] sm:$0xff] %v1320_v60  ;;  %1833 = vst [vmem:[#allocation5 + $0x890] sm:$0xff] %v1321_v61  ;;  %v304_v4 = vld [vmem:[#allocation2 + $0x8c8] sm:$0xff]  ;;  %v814_v8 = vmul.f32 3.2456994, %v302_v2  ;;  %v305_v11 = vld [vmem:[#allocation2 + $0x8d0] sm:$0xff] }
 0x125   :  { %1834 = vst [vmem:[#allocation5 + $0x898] sm:$0xff] %v1322_v62  ;;  %v1323_v5 = vadd.f32 -0.42421293, %v811_v63  ;;  %v1324_v6 = vadd.f32 -0.42421293, %v812_v0  ;;  %v306_v12 = vld [vmem:[#allocation2 + $0x8d8] sm:$0xff] }
 0x126   :  { %v1325_v7 = vadd.f32 -0.42421293, %v813_v1  ;;  %v815_v9 = vmul.f32 3.2456994, %v303_v3  ;;  %v816_v10 = vmul.f32 3.2456994, %v304_v4 }
 0x127   :  { %1835 = vst [vmem:[#allocation5 + $0x8a0] sm:$0xff] %v1323_v5  ;;  %1836 = vst [vmem:[#allocation5 + $0x8a8] sm:$0xff] %v1324_v6  ;;  %v307_v13 = vld [vmem:[#allocation2 + $0x8e0] sm:$0xff]  ;;  %v1326_v14 = vadd.f32 -0.42421293, %v814_v8  ;;  %v308_v20 = vld [vmem:[#allocation2 + $0x8e8] sm:$0xff] }
 0x128   :  { %1837 = vst [vmem:[#allocation5 + $0x8b0] sm:$0xff] %v1325_v7  ;;  %v1327_v15 = vadd.f32 -0.42421293, %v815_v9  ;;  %v1328_v16 = vadd.f32 -0.42421293, %v816_v10  ;;  %v309_v21 = vld [vmem:[#allocation2 + $0x8f0] sm:$0xff] }
 0x129   :  { %v817_v17 = vmul.f32 3.2456994, %v305_v11  ;;  %v818_v18 = vmul.f32 3.2456994, %v306_v12  ;;  %v819_v19 = vmul.f32 3.2456994, %v307_v13 }
 0x12a   :  { %1838 = vst [vmem:[#allocation5 + $0x8b8] sm:$0xff] %v1326_v14  ;;  %1839 = vst [vmem:[#allocation5 + $0x8c0] sm:$0xff] %v1327_v15  ;;  %v310_v22 = vld [vmem:[#allocation2 + $0x8f8] sm:$0xff]  ;;  %v820_v26 = vmul.f32 3.2456994, %v308_v20  ;;  %v311_v29 = vld [vmem:[#allocation2 + $0x900] sm:$0xff] }
 0x12b   :  { %1840 = vst [vmem:[#allocation5 + $0x8c8] sm:$0xff] %v1328_v16  ;;  %v1329_v23 = vadd.f32 -0.42421293, %v817_v17  ;;  %v1330_v24 = vadd.f32 -0.42421293, %v818_v18  ;;  %v312_v30 = vld [vmem:[#allocation2 + $0x908] sm:$0xff] }
 0x12c   :  { %v1331_v25 = vadd.f32 -0.42421293, %v819_v19  ;;  %v821_v27 = vmul.f32 3.2456994, %v309_v21  ;;  %v822_v28 = vmul.f32 3.2456994, %v310_v22 }
 0x12d   :  { %1841 = vst [vmem:[#allocation5 + $0x8d0] sm:$0xff] %v1329_v23  ;;  %1842 = vst [vmem:[#allocation5 + $0x8d8] sm:$0xff] %v1330_v24  ;;  %v313_v31 = vld [vmem:[#allocation2 + $0x910] sm:$0xff]  ;;  %v1332_v32 = vadd.f32 -0.42421293, %v820_v26  ;;  %v314_v38 = vld [vmem:[#allocation2 + $0x918] sm:$0xff] }
 0x12e   :  { %1843 = vst [vmem:[#allocation5 + $0x8e0] sm:$0xff] %v1331_v25  ;;  %v1333_v33 = vadd.f32 -0.42421293, %v821_v27  ;;  %v1334_v34 = vadd.f32 -0.42421293, %v822_v28  ;;  %v315_v39 = vld [vmem:[#allocation2 + $0x920] sm:$0xff] }
 0x12f   :  { %v823_v35 = vmul.f32 3.2456994, %v311_v29  ;;  %v824_v36 = vmul.f32 3.2456994, %v312_v30  ;;  %v825_v37 = vmul.f32 3.2456994, %v313_v31 }
 0x130   :  { %1844 = vst [vmem:[#allocation5 + $0x8e8] sm:$0xff] %v1332_v32  ;;  %1845 = vst [vmem:[#allocation5 + $0x8f0] sm:$0xff] %v1333_v33  ;;  %v316_v40 = vld [vmem:[#allocation2 + $0x928] sm:$0xff]  ;;  %v826_v44 = vmul.f32 3.2456994, %v314_v38  ;;  %v317_v47 = vld [vmem:[#allocation2 + $0x930] sm:$0xff] }
 0x131   :  { %1846 = vst [vmem:[#allocation5 + $0x8f8] sm:$0xff] %v1334_v34  ;;  %v1335_v41 = vadd.f32 -0.42421293, %v823_v35  ;;  %v1336_v42 = vadd.f32 -0.42421293, %v824_v36  ;;  %v318_v48 = vld [vmem:[#allocation2 + $0x938] sm:$0xff] }
 0x132   :  { %v1337_v43 = vadd.f32 -0.42421293, %v825_v37  ;;  %v827_v45 = vmul.f32 3.2456994, %v315_v39  ;;  %v828_v46 = vmul.f32 3.2456994, %v316_v40 }
 0x133   :  { %1847 = vst [vmem:[#allocation5 + $0x900] sm:$0xff] %v1335_v41  ;;  %1848 = vst [vmem:[#allocation5 + $0x908] sm:$0xff] %v1336_v42  ;;  %v319_v49 = vld [vmem:[#allocation2 + $0x940] sm:$0xff]  ;;  %v1338_v50 = vadd.f32 -0.42421293, %v826_v44  ;;  %v320_v56 = vld [vmem:[#allocation2 + $0x948] sm:$0xff] }
 0x134   :  { %1849 = vst [vmem:[#allocation5 + $0x910] sm:$0xff] %v1337_v43  ;;  %v1339_v51 = vadd.f32 -0.42421293, %v827_v45  ;;  %v1340_v52 = vadd.f32 -0.42421293, %v828_v46  ;;  %v321_v57 = vld [vmem:[#allocation2 + $0x950] sm:$0xff] }
 0x135   :  { %v829_v53 = vmul.f32 3.2456994, %v317_v47  ;;  %v830_v54 = vmul.f32 3.2456994, %v318_v48  ;;  %v831_v55 = vmul.f32 3.2456994, %v319_v49 }
 0x136   :  { %1850 = vst [vmem:[#allocation5 + $0x918] sm:$0xff] %v1338_v50  ;;  %1851 = vst [vmem:[#allocation5 + $0x920] sm:$0xff] %v1339_v51  ;;  %v322_v58 = vld [vmem:[#allocation2 + $0x958] sm:$0xff]  ;;  %v832_v62 = vmul.f32 3.2456994, %v320_v56  ;;  %v323_v1 = vld [vmem:[#allocation2 + $0x960] sm:$0xff] }
 0x137   :  { %1852 = vst [vmem:[#allocation5 + $0x928] sm:$0xff] %v1340_v52  ;;  %v1341_v59 = vadd.f32 -0.42421293, %v829_v53  ;;  %v1342_v60 = vadd.f32 -0.42421293, %v830_v54  ;;  %v324_v2 = vld [vmem:[#allocation2 + $0x968] sm:$0xff] }
 0x138   :  { %v1343_v61 = vadd.f32 -0.42421293, %v831_v55  ;;  %v833_v63 = vmul.f32 3.2456994, %v321_v57  ;;  %v834_v0 = vmul.f32 3.2456994, %v322_v58 }
 0x139   :  { %1853 = vst [vmem:[#allocation5 + $0x930] sm:$0xff] %v1341_v59  ;;  %1854 = vst [vmem:[#allocation5 + $0x938] sm:$0xff] %v1342_v60  ;;  %v325_v3 = vld [vmem:[#allocation2 + $0x970] sm:$0xff]  ;;  %v1344_v4 = vadd.f32 -0.42421293, %v832_v62  ;;  %v326_v10 = vld [vmem:[#allocation2 + $0x978] sm:$0xff] }
 0x13a   :  { %1855 = vst [vmem:[#allocation5 + $0x940] sm:$0xff] %v1343_v61  ;;  %v1345_v5 = vadd.f32 -0.42421293, %v833_v63  ;;  %v1346_v6 = vadd.f32 -0.42421293, %v834_v0  ;;  %v327_v11 = vld [vmem:[#allocation2 + $0x980] sm:$0xff] }
 0x13b   :  { %v835_v7 = vmul.f32 3.2456994, %v323_v1  ;;  %v836_v8 = vmul.f32 3.2456994, %v324_v2  ;;  %v837_v9 = vmul.f32 3.2456994, %v325_v3 }
 0x13c   :  { %1856 = vst [vmem:[#allocation5 + $0x948] sm:$0xff] %v1344_v4  ;;  %1857 = vst [vmem:[#allocation5 + $0x950] sm:$0xff] %v1345_v5  ;;  %v328_v12 = vld [vmem:[#allocation2 + $0x988] sm:$0xff]  ;;  %v838_v16 = vmul.f32 3.2456994, %v326_v10  ;;  %v329_v19 = vld [vmem:[#allocation2 + $0x990] sm:$0xff] }
 0x13d   :  { %1858 = vst [vmem:[#allocation5 + $0x958] sm:$0xff] %v1346_v6  ;;  %v1347_v13 = vadd.f32 -0.42421293, %v835_v7  ;;  %v1348_v14 = vadd.f32 -0.42421293, %v836_v8  ;;  %v330_v20 = vld [vmem:[#allocation2 + $0x998] sm:$0xff] }
 0x13e   :  { %v1349_v15 = vadd.f32 -0.42421293, %v837_v9  ;;  %v839_v17 = vmul.f32 3.2456994, %v327_v11  ;;  %v840_v18 = vmul.f32 3.2456994, %v328_v12 }
 0x13f   :  { %1859 = vst [vmem:[#allocation5 + $0x960] sm:$0xff] %v1347_v13  ;;  %1860 = vst [vmem:[#allocation5 + $0x968] sm:$0xff] %v1348_v14  ;;  %v331_v21 = vld [vmem:[#allocation2 + $0x9a0] sm:$0xff]  ;;  %v1350_v22 = vadd.f32 -0.42421293, %v838_v16  ;;  %v332_v28 = vld [vmem:[#allocation2 + $0x9a8] sm:$0xff] }
 0x140   :  { %1861 = vst [vmem:[#allocation5 + $0x970] sm:$0xff] %v1349_v15  ;;  %v1351_v23 = vadd.f32 -0.42421293, %v839_v17  ;;  %v1352_v24 = vadd.f32 -0.42421293, %v840_v18  ;;  %v333_v29 = vld [vmem:[#allocation2 + $0x9b0] sm:$0xff] }
 0x141   :  { %v841_v25 = vmul.f32 3.2456994, %v329_v19  ;;  %v842_v26 = vmul.f32 3.2456994, %v330_v20  ;;  %v843_v27 = vmul.f32 3.2456994, %v331_v21 }
 0x142   :  { %1862 = vst [vmem:[#allocation5 + $0x978] sm:$0xff] %v1350_v22  ;;  %1863 = vst [vmem:[#allocation5 + $0x980] sm:$0xff] %v1351_v23  ;;  %v334_v30 = vld [vmem:[#allocation2 + $0x9b8] sm:$0xff]  ;;  %v844_v34 = vmul.f32 3.2456994, %v332_v28  ;;  %v335_v37 = vld [vmem:[#allocation2 + $0x9c0] sm:$0xff] }
 0x143   :  { %1864 = vst [vmem:[#allocation5 + $0x988] sm:$0xff] %v1352_v24  ;;  %v1353_v31 = vadd.f32 -0.42421293, %v841_v25  ;;  %v1354_v32 = vadd.f32 -0.42421293, %v842_v26  ;;  %v336_v38 = vld [vmem:[#allocation2 + $0x9c8] sm:$0xff] }
 0x144   :  { %v1355_v33 = vadd.f32 -0.42421293, %v843_v27  ;;  %v845_v35 = vmul.f32 3.2456994, %v333_v29  ;;  %v846_v36 = vmul.f32 3.2456994, %v334_v30 }
 0x145   :  { %1865 = vst [vmem:[#allocation5 + $0x990] sm:$0xff] %v1353_v31  ;;  %1866 = vst [vmem:[#allocation5 + $0x998] sm:$0xff] %v1354_v32  ;;  %v337_v39 = vld [vmem:[#allocation2 + $0x9d0] sm:$0xff]  ;;  %v1356_v40 = vadd.f32 -0.42421293, %v844_v34  ;;  %v338_v46 = vld [vmem:[#allocation2 + $0x9d8] sm:$0xff] }
 0x146   :  { %1867 = vst [vmem:[#allocation5 + $0x9a0] sm:$0xff] %v1355_v33  ;;  %v1357_v41 = vadd.f32 -0.42421293, %v845_v35  ;;  %v1358_v42 = vadd.f32 -0.42421293, %v846_v36  ;;  %v339_v47 = vld [vmem:[#allocation2 + $0x9e0] sm:$0xff] }
 0x147   :  { %v847_v43 = vmul.f32 3.2456994, %v335_v37  ;;  %v848_v44 = vmul.f32 3.2456994, %v336_v38  ;;  %v849_v45 = vmul.f32 3.2456994, %v337_v39 }
 0x148   :  { %1868 = vst [vmem:[#allocation5 + $0x9a8] sm:$0xff] %v1356_v40  ;;  %1869 = vst [vmem:[#allocation5 + $0x9b0] sm:$0xff] %v1357_v41  ;;  %v340_v48 = vld [vmem:[#allocation2 + $0x9e8] sm:$0xff]  ;;  %v850_v52 = vmul.f32 3.2456994, %v338_v46  ;;  %v341_v55 = vld [vmem:[#allocation2 + $0x9f0] sm:$0xff] }
 0x149   :  { %1870 = vst [vmem:[#allocation5 + $0x9b8] sm:$0xff] %v1358_v42  ;;  %v1359_v49 = vadd.f32 -0.42421293, %v847_v43  ;;  %v1360_v50 = vadd.f32 -0.42421293, %v848_v44  ;;  %v342_v56 = vld [vmem:[#allocation2 + $0x9f8] sm:$0xff] }
 0x14a   :  { %v1361_v51 = vadd.f32 -0.42421293, %v849_v45  ;;  %v851_v53 = vmul.f32 3.2456994, %v339_v47  ;;  %v852_v54 = vmul.f32 3.2456994, %v340_v48 }
 0x14b   :  { %1871 = vst [vmem:[#allocation5 + $0x9c0] sm:$0xff] %v1359_v49  ;;  %1872 = vst [vmem:[#allocation5 + $0x9c8] sm:$0xff] %v1360_v50  ;;  %v343_v57 = vld [vmem:[#allocation2 + $0xa00] sm:$0xff]  ;;  %v1362_v58 = vadd.f32 -0.42421293, %v850_v52  ;;  %v344_v0 = vld [vmem:[#allocation2 + $0xa08] sm:$0xff] }
 0x14c   :  { %1873 = vst [vmem:[#allocation5 + $0x9d0] sm:$0xff] %v1361_v51  ;;  %v1363_v59 = vadd.f32 -0.42421293, %v851_v53  ;;  %v1364_v60 = vadd.f32 -0.42421293, %v852_v54  ;;  %v345_v1 = vld [vmem:[#allocation2 + $0xa10] sm:$0xff] }
 0x14d   :  { %v853_v61 = vmul.f32 3.2456994, %v341_v55  ;;  %v854_v62 = vmul.f32 3.2456994, %v342_v56  ;;  %v855_v63 = vmul.f32 3.2456994, %v343_v57 }
 0x14e   :  { %1874 = vst [vmem:[#allocation5 + $0x9d8] sm:$0xff] %v1362_v58  ;;  %1875 = vst [vmem:[#allocation5 + $0x9e0] sm:$0xff] %v1363_v59  ;;  %v346_v2 = vld [vmem:[#allocation2 + $0xa18] sm:$0xff]  ;;  %v856_v6 = vmul.f32 3.2456994, %v344_v0  ;;  %v347_v9 = vld [vmem:[#allocation2 + $0xa20] sm:$0xff] }
 0x14f   :  { %1876 = vst [vmem:[#allocation5 + $0x9e8] sm:$0xff] %v1364_v60  ;;  %v1365_v3 = vadd.f32 -0.42421293, %v853_v61  ;;  %v1366_v4 = vadd.f32 -0.42421293, %v854_v62  ;;  %v348_v10 = vld [vmem:[#allocation2 + $0xa28] sm:$0xff] }
 0x150   :  { %v1367_v5 = vadd.f32 -0.42421293, %v855_v63  ;;  %v857_v7 = vmul.f32 3.2456994, %v345_v1  ;;  %v858_v8 = vmul.f32 3.2456994, %v346_v2 }
 0x151   :  { %1877 = vst [vmem:[#allocation5 + $0x9f0] sm:$0xff] %v1365_v3  ;;  %1878 = vst [vmem:[#allocation5 + $0x9f8] sm:$0xff] %v1366_v4  ;;  %v349_v11 = vld [vmem:[#allocation2 + $0xa30] sm:$0xff]  ;;  %v1368_v12 = vadd.f32 -0.42421293, %v856_v6  ;;  %v350_v18 = vld [vmem:[#allocation2 + $0xa38] sm:$0xff] }
 0x152   :  { %1879 = vst [vmem:[#allocation5 + $0xa00] sm:$0xff] %v1367_v5  ;;  %v1369_v13 = vadd.f32 -0.42421293, %v857_v7  ;;  %v1370_v14 = vadd.f32 -0.42421293, %v858_v8  ;;  %v351_v19 = vld [vmem:[#allocation2 + $0xa40] sm:$0xff] }
 0x153   :  { %v859_v15 = vmul.f32 3.2456994, %v347_v9  ;;  %v860_v16 = vmul.f32 3.2456994, %v348_v10  ;;  %v861_v17 = vmul.f32 3.2456994, %v349_v11 }
 0x154   :  { %1880 = vst [vmem:[#allocation5 + $0xa08] sm:$0xff] %v1368_v12  ;;  %1881 = vst [vmem:[#allocation5 + $0xa10] sm:$0xff] %v1369_v13  ;;  %v352_v20 = vld [vmem:[#allocation2 + $0xa48] sm:$0xff]  ;;  %v862_v24 = vmul.f32 3.2456994, %v350_v18  ;;  %v353_v27 = vld [vmem:[#allocation2 + $0xa50] sm:$0xff] }
 0x155   :  { %1882 = vst [vmem:[#allocation5 + $0xa18] sm:$0xff] %v1370_v14  ;;  %v1371_v21 = vadd.f32 -0.42421293, %v859_v15  ;;  %v1372_v22 = vadd.f32 -0.42421293, %v860_v16  ;;  %v354_v28 = vld [vmem:[#allocation2 + $0xa58] sm:$0xff] }
 0x156   :  { %v1373_v23 = vadd.f32 -0.42421293, %v861_v17  ;;  %v863_v25 = vmul.f32 3.2456994, %v351_v19  ;;  %v864_v26 = vmul.f32 3.2456994, %v352_v20 }
 0x157   :  { %1883 = vst [vmem:[#allocation5 + $0xa20] sm:$0xff] %v1371_v21  ;;  %1884 = vst [vmem:[#allocation5 + $0xa28] sm:$0xff] %v1372_v22  ;;  %v355_v29 = vld [vmem:[#allocation2 + $0xa60] sm:$0xff]  ;;  %v1374_v30 = vadd.f32 -0.42421293, %v862_v24  ;;  %v356_v36 = vld [vmem:[#allocation2 + $0xa68] sm:$0xff] }
 0x158   :  { %1885 = vst [vmem:[#allocation5 + $0xa30] sm:$0xff] %v1373_v23  ;;  %v1375_v31 = vadd.f32 -0.42421293, %v863_v25  ;;  %v1376_v32 = vadd.f32 -0.42421293, %v864_v26  ;;  %v357_v37 = vld [vmem:[#allocation2 + $0xa70] sm:$0xff] }
 0x159   :  { %v865_v33 = vmul.f32 3.2456994, %v353_v27  ;;  %v866_v34 = vmul.f32 3.2456994, %v354_v28  ;;  %v867_v35 = vmul.f32 3.2456994, %v355_v29 }
 0x15a   :  { %1886 = vst [vmem:[#allocation5 + $0xa38] sm:$0xff] %v1374_v30  ;;  %1887 = vst [vmem:[#allocation5 + $0xa40] sm:$0xff] %v1375_v31  ;;  %v358_v38 = vld [vmem:[#allocation2 + $0xa78] sm:$0xff]  ;;  %v868_v42 = vmul.f32 3.2456994, %v356_v36  ;;  %v359_v45 = vld [vmem:[#allocation2 + $0xa80] sm:$0xff] }
 0x15b   :  { %1888 = vst [vmem:[#allocation5 + $0xa48] sm:$0xff] %v1376_v32  ;;  %v1377_v39 = vadd.f32 -0.42421293, %v865_v33  ;;  %v1378_v40 = vadd.f32 -0.42421293, %v866_v34  ;;  %v360_v46 = vld [vmem:[#allocation2 + $0xa88] sm:$0xff] }
 0x15c   :  { %v1379_v41 = vadd.f32 -0.42421293, %v867_v35  ;;  %v869_v43 = vmul.f32 3.2456994, %v357_v37  ;;  %v870_v44 = vmul.f32 3.2456994, %v358_v38 }
 0x15d   :  { %1889 = vst [vmem:[#allocation5 + $0xa50] sm:$0xff] %v1377_v39  ;;  %1890 = vst [vmem:[#allocation5 + $0xa58] sm:$0xff] %v1378_v40  ;;  %v361_v47 = vld [vmem:[#allocation2 + $0xa90] sm:$0xff]  ;;  %v1380_v48 = vadd.f32 -0.42421293, %v868_v42  ;;  %v362_v54 = vld [vmem:[#allocation2 + $0xa98] sm:$0xff] }
 0x15e   :  { %1891 = vst [vmem:[#allocation5 + $0xa60] sm:$0xff] %v1379_v41  ;;  %v1381_v49 = vadd.f32 -0.42421293, %v869_v43  ;;  %v1382_v50 = vadd.f32 -0.42421293, %v870_v44  ;;  %v363_v55 = vld [vmem:[#allocation2 + $0xaa0] sm:$0xff] }
 0x15f   :  { %v871_v51 = vmul.f32 3.2456994, %v359_v45  ;;  %v872_v52 = vmul.f32 3.2456994, %v360_v46  ;;  %v873_v53 = vmul.f32 3.2456994, %v361_v47 }
 0x160   :  { %1892 = vst [vmem:[#allocation5 + $0xa68] sm:$0xff] %v1380_v48  ;;  %1893 = vst [vmem:[#allocation5 + $0xa70] sm:$0xff] %v1381_v49  ;;  %v364_v56 = vld [vmem:[#allocation2 + $0xaa8] sm:$0xff]  ;;  %v874_v60 = vmul.f32 3.2456994, %v362_v54  ;;  %v365_v63 = vld [vmem:[#allocation2 + $0xab0] sm:$0xff] }
 0x161   :  { %1894 = vst [vmem:[#allocation5 + $0xa78] sm:$0xff] %v1382_v50  ;;  %v1383_v57 = vadd.f32 -0.42421293, %v871_v51  ;;  %v1384_v58 = vadd.f32 -0.42421293, %v872_v52  ;;  %v366_v0 = vld [vmem:[#allocation2 + $0xab8] sm:$0xff] }
 0x162   :  { %v1385_v59 = vadd.f32 -0.42421293, %v873_v53  ;;  %v875_v61 = vmul.f32 3.2456994, %v363_v55  ;;  %v876_v62 = vmul.f32 3.2456994, %v364_v56 }
 0x163   :  { %1895 = vst [vmem:[#allocation5 + $0xa80] sm:$0xff] %v1383_v57  ;;  %1896 = vst [vmem:[#allocation5 + $0xa88] sm:$0xff] %v1384_v58  ;;  %v367_v1 = vld [vmem:[#allocation2 + $0xac0] sm:$0xff]  ;;  %v1386_v2 = vadd.f32 -0.42421293, %v874_v60  ;;  %v368_v8 = vld [vmem:[#allocation2 + $0xac8] sm:$0xff] }
 0x164   :  { %1897 = vst [vmem:[#allocation5 + $0xa90] sm:$0xff] %v1385_v59  ;;  %v1387_v3 = vadd.f32 -0.42421293, %v875_v61  ;;  %v1388_v4 = vadd.f32 -0.42421293, %v876_v62  ;;  %v369_v9 = vld [vmem:[#allocation2 + $0xad0] sm:$0xff] }
 0x165   :  { %v877_v5 = vmul.f32 3.2456994, %v365_v63  ;;  %v878_v6 = vmul.f32 3.2456994, %v366_v0  ;;  %v879_v7 = vmul.f32 3.2456994, %v367_v1 }
 0x166   :  { %1898 = vst [vmem:[#allocation5 + $0xa98] sm:$0xff] %v1386_v2  ;;  %1899 = vst [vmem:[#allocation5 + $0xaa0] sm:$0xff] %v1387_v3  ;;  %v370_v10 = vld [vmem:[#allocation2 + $0xad8] sm:$0xff]  ;;  %v880_v14 = vmul.f32 3.2456994, %v368_v8  ;;  %v371_v17 = vld [vmem:[#allocation2 + $0xae0] sm:$0xff] }
 0x167   :  { %1900 = vst [vmem:[#allocation5 + $0xaa8] sm:$0xff] %v1388_v4  ;;  %v1389_v11 = vadd.f32 -0.42421293, %v877_v5  ;;  %v1390_v12 = vadd.f32 -0.42421293, %v878_v6  ;;  %v372_v18 = vld [vmem:[#allocation2 + $0xae8] sm:$0xff] }
 0x168   :  { %v1391_v13 = vadd.f32 -0.42421293, %v879_v7  ;;  %v881_v15 = vmul.f32 3.2456994, %v369_v9  ;;  %v882_v16 = vmul.f32 3.2456994, %v370_v10 }
 0x169   :  { %1901 = vst [vmem:[#allocation5 + $0xab0] sm:$0xff] %v1389_v11  ;;  %1902 = vst [vmem:[#allocation5 + $0xab8] sm:$0xff] %v1390_v12  ;;  %v373_v19 = vld [vmem:[#allocation2 + $0xaf0] sm:$0xff]  ;;  %v1392_v20 = vadd.f32 -0.42421293, %v880_v14  ;;  %v374_v26 = vld [vmem:[#allocation2 + $0xaf8] sm:$0xff] }
 0x16a   :  { %1903 = vst [vmem:[#allocation5 + $0xac0] sm:$0xff] %v1391_v13  ;;  %v1393_v21 = vadd.f32 -0.42421293, %v881_v15  ;;  %v1394_v22 = vadd.f32 -0.42421293, %v882_v16  ;;  %v375_v27 = vld [vmem:[#allocation2 + $0xb00] sm:$0xff] }
 0x16b   :  { %v883_v23 = vmul.f32 3.2456994, %v371_v17  ;;  %v884_v24 = vmul.f32 3.2456994, %v372_v18  ;;  %v885_v25 = vmul.f32 3.2456994, %v373_v19 }
 0x16c   :  { %1904 = vst [vmem:[#allocation5 + $0xac8] sm:$0xff] %v1392_v20  ;;  %1905 = vst [vmem:[#allocation5 + $0xad0] sm:$0xff] %v1393_v21  ;;  %v376_v28 = vld [vmem:[#allocation2 + $0xb08] sm:$0xff]  ;;  %v886_v32 = vmul.f32 3.2456994, %v374_v26  ;;  %v377_v35 = vld [vmem:[#allocation2 + $0xb10] sm:$0xff] }
 0x16d   :  { %1906 = vst [vmem:[#allocation5 + $0xad8] sm:$0xff] %v1394_v22  ;;  %v1395_v29 = vadd.f32 -0.42421293, %v883_v23  ;;  %v1396_v30 = vadd.f32 -0.42421293, %v884_v24  ;;  %v378_v36 = vld [vmem:[#allocation2 + $0xb18] sm:$0xff] }
 0x16e   :  { %v1397_v31 = vadd.f32 -0.42421293, %v885_v25  ;;  %v887_v33 = vmul.f32 3.2456994, %v375_v27  ;;  %v888_v34 = vmul.f32 3.2456994, %v376_v28 }
 0x16f   :  { %1907 = vst [vmem:[#allocation5 + $0xae0] sm:$0xff] %v1395_v29  ;;  %1908 = vst [vmem:[#allocation5 + $0xae8] sm:$0xff] %v1396_v30  ;;  %v379_v37 = vld [vmem:[#allocation2 + $0xb20] sm:$0xff]  ;;  %v1398_v38 = vadd.f32 -0.42421293, %v886_v32  ;;  %v380_v44 = vld [vmem:[#allocation2 + $0xb28] sm:$0xff] }
 0x170   :  { %1909 = vst [vmem:[#allocation5 + $0xaf0] sm:$0xff] %v1397_v31  ;;  %v1399_v39 = vadd.f32 -0.42421293, %v887_v33  ;;  %v1400_v40 = vadd.f32 -0.42421293, %v888_v34  ;;  %v381_v45 = vld [vmem:[#allocation2 + $0xb30] sm:$0xff] }
 0x171   :  { %v889_v41 = vmul.f32 3.2456994, %v377_v35  ;;  %v890_v42 = vmul.f32 3.2456994, %v378_v36  ;;  %v891_v43 = vmul.f32 3.2456994, %v379_v37 }
 0x172   :  { %1910 = vst [vmem:[#allocation5 + $0xaf8] sm:$0xff] %v1398_v38  ;;  %1911 = vst [vmem:[#allocation5 + $0xb00] sm:$0xff] %v1399_v39  ;;  %v382_v46 = vld [vmem:[#allocation2 + $0xb38] sm:$0xff]  ;;  %v892_v50 = vmul.f32 3.2456994, %v380_v44  ;;  %v383_v53 = vld [vmem:[#allocation2 + $0xb40] sm:$0xff] }
 0x173   :  { %1912 = vst [vmem:[#allocation5 + $0xb08] sm:$0xff] %v1400_v40  ;;  %v1401_v47 = vadd.f32 -0.42421293, %v889_v41  ;;  %v1402_v48 = vadd.f32 -0.42421293, %v890_v42  ;;  %v384_v54 = vld [vmem:[#allocation2 + $0xb48] sm:$0xff] }
 0x174   :  { %v1403_v49 = vadd.f32 -0.42421293, %v891_v43  ;;  %v893_v51 = vmul.f32 3.2456994, %v381_v45  ;;  %v894_v52 = vmul.f32 3.2456994, %v382_v46 }
 0x175   :  { %1913 = vst [vmem:[#allocation5 + $0xb10] sm:$0xff] %v1401_v47  ;;  %1914 = vst [vmem:[#allocation5 + $0xb18] sm:$0xff] %v1402_v48  ;;  %v385_v55 = vld [vmem:[#allocation2 + $0xb50] sm:$0xff]  ;;  %v1404_v56 = vadd.f32 -0.42421293, %v892_v50  ;;  %v386_v62 = vld [vmem:[#allocation2 + $0xb58] sm:$0xff] }
 0x176   :  { %1915 = vst [vmem:[#allocation5 + $0xb20] sm:$0xff] %v1403_v49  ;;  %v1405_v57 = vadd.f32 -0.42421293, %v893_v51  ;;  %v1406_v58 = vadd.f32 -0.42421293, %v894_v52  ;;  %v387_v63 = vld [vmem:[#allocation2 + $0xb60] sm:$0xff] }
 0x177   :  { %v895_v59 = vmul.f32 3.2456994, %v383_v53  ;;  %v896_v60 = vmul.f32 3.2456994, %v384_v54  ;;  %v897_v61 = vmul.f32 3.2456994, %v385_v55 }
 0x178   :  { %1916 = vst [vmem:[#allocation5 + $0xb28] sm:$0xff] %v1404_v56  ;;  %1917 = vst [vmem:[#allocation5 + $0xb30] sm:$0xff] %v1405_v57  ;;  %v388_v0 = vld [vmem:[#allocation2 + $0xb68] sm:$0xff]  ;;  %v898_v4 = vmul.f32 3.2456994, %v386_v62  ;;  %v389_v7 = vld [vmem:[#allocation2 + $0xb70] sm:$0xff] }
 0x179   :  { %1918 = vst [vmem:[#allocation5 + $0xb38] sm:$0xff] %v1406_v58  ;;  %v1407_v1 = vadd.f32 -0.42421293, %v895_v59  ;;  %v1408_v2 = vadd.f32 -0.42421293, %v896_v60  ;;  %v390_v8 = vld [vmem:[#allocation2 + $0xb78] sm:$0xff] }
 0x17a   :  { %v1409_v3 = vadd.f32 -0.42421293, %v897_v61  ;;  %v899_v5 = vmul.f32 3.2456994, %v387_v63  ;;  %v900_v6 = vmul.f32 3.2456994, %v388_v0 }
 0x17b   :  { %1919 = vst [vmem:[#allocation5 + $0xb40] sm:$0xff] %v1407_v1  ;;  %1920 = vst [vmem:[#allocation5 + $0xb48] sm:$0xff] %v1408_v2  ;;  %v391_v9 = vld [vmem:[#allocation2 + $0xb80] sm:$0xff]  ;;  %v1410_v10 = vadd.f32 -0.42421293, %v898_v4  ;;  %v392_v16 = vld [vmem:[#allocation2 + $0xb88] sm:$0xff] }
 0x17c   :  { %1921 = vst [vmem:[#allocation5 + $0xb50] sm:$0xff] %v1409_v3  ;;  %v1411_v11 = vadd.f32 -0.42421293, %v899_v5  ;;  %v1412_v12 = vadd.f32 -0.42421293, %v900_v6  ;;  %v393_v17 = vld [vmem:[#allocation2 + $0xb90] sm:$0xff] }
 0x17d   :  { %v901_v13 = vmul.f32 3.2456994, %v389_v7  ;;  %v902_v14 = vmul.f32 3.2456994, %v390_v8  ;;  %v903_v15 = vmul.f32 3.2456994, %v391_v9 }
 0x17e   :  { %1922 = vst [vmem:[#allocation5 + $0xb58] sm:$0xff] %v1410_v10  ;;  %1923 = vst [vmem:[#allocation5 + $0xb60] sm:$0xff] %v1411_v11  ;;  %v394_v18 = vld [vmem:[#allocation2 + $0xb98] sm:$0xff]  ;;  %v904_v22 = vmul.f32 3.2456994, %v392_v16  ;;  %v395_v25 = vld [vmem:[#allocation2 + $0xba0] sm:$0xff] }
 0x17f   :  { %1924 = vst [vmem:[#allocation5 + $0xb68] sm:$0xff] %v1412_v12  ;;  %v1413_v19 = vadd.f32 -0.42421293, %v901_v13  ;;  %v1414_v20 = vadd.f32 -0.42421293, %v902_v14  ;;  %v396_v26 = vld [vmem:[#allocation2 + $0xba8] sm:$0xff] }
 0x180   :  { %v1415_v21 = vadd.f32 -0.42421293, %v903_v15  ;;  %v905_v23 = vmul.f32 3.2456994, %v393_v17  ;;  %v906_v24 = vmul.f32 3.2456994, %v394_v18 }
 0x181   :  { %1925 = vst [vmem:[#allocation5 + $0xb70] sm:$0xff] %v1413_v19  ;;  %1926 = vst [vmem:[#allocation5 + $0xb78] sm:$0xff] %v1414_v20  ;;  %v397_v27 = vld [vmem:[#allocation2 + $0xbb0] sm:$0xff]  ;;  %v1416_v28 = vadd.f32 -0.42421293, %v904_v22  ;;  %v398_v34 = vld [vmem:[#allocation2 + $0xbb8] sm:$0xff] }
 0x182   :  { %1927 = vst [vmem:[#allocation5 + $0xb80] sm:$0xff] %v1415_v21  ;;  %v1417_v29 = vadd.f32 -0.42421293, %v905_v23  ;;  %v1418_v30 = vadd.f32 -0.42421293, %v906_v24  ;;  %v399_v35 = vld [vmem:[#allocation2 + $0xbc0] sm:$0xff] }
 0x183   :  { %v907_v31 = vmul.f32 3.2456994, %v395_v25  ;;  %v908_v32 = vmul.f32 3.2456994, %v396_v26  ;;  %v909_v33 = vmul.f32 3.2456994, %v397_v27 }
 0x184   :  { %1928 = vst [vmem:[#allocation5 + $0xb88] sm:$0xff] %v1416_v28  ;;  %1929 = vst [vmem:[#allocation5 + $0xb90] sm:$0xff] %v1417_v29  ;;  %v400_v36 = vld [vmem:[#allocation2 + $0xbc8] sm:$0xff]  ;;  %v910_v40 = vmul.f32 3.2456994, %v398_v34  ;;  %v401_v43 = vld [vmem:[#allocation2 + $0xbd0] sm:$0xff] }
 0x185   :  { %1930 = vst [vmem:[#allocation5 + $0xb98] sm:$0xff] %v1418_v30  ;;  %v1419_v37 = vadd.f32 -0.42421293, %v907_v31  ;;  %v1420_v38 = vadd.f32 -0.42421293, %v908_v32  ;;  %v402_v44 = vld [vmem:[#allocation2 + $0xbd8] sm:$0xff] }
 0x186   :  { %v1421_v39 = vadd.f32 -0.42421293, %v909_v33  ;;  %v911_v41 = vmul.f32 3.2456994, %v399_v35  ;;  %v912_v42 = vmul.f32 3.2456994, %v400_v36 }
 0x187   :  { %1931 = vst [vmem:[#allocation5 + $0xba0] sm:$0xff] %v1419_v37  ;;  %1932 = vst [vmem:[#allocation5 + $0xba8] sm:$0xff] %v1420_v38  ;;  %v403_v45 = vld [vmem:[#allocation2 + $0xbe0] sm:$0xff]  ;;  %v1422_v46 = vadd.f32 -0.42421293, %v910_v40  ;;  %v404_v52 = vld [vmem:[#allocation2 + $0xbe8] sm:$0xff] }
 0x188   :  { %1933 = vst [vmem:[#allocation5 + $0xbb0] sm:$0xff] %v1421_v39  ;;  %v1423_v47 = vadd.f32 -0.42421293, %v911_v41  ;;  %v1424_v48 = vadd.f32 -0.42421293, %v912_v42  ;;  %v405_v53 = vld [vmem:[#allocation2 + $0xbf0] sm:$0xff] }
 0x189   :  { %v913_v49 = vmul.f32 3.2456994, %v401_v43  ;;  %v914_v50 = vmul.f32 3.2456994, %v402_v44  ;;  %v915_v51 = vmul.f32 3.2456994, %v403_v45 }
 0x18a   :  { %1934 = vst [vmem:[#allocation5 + $0xbb8] sm:$0xff] %v1422_v46  ;;  %1935 = vst [vmem:[#allocation5 + $0xbc0] sm:$0xff] %v1423_v47  ;;  %v406_v54 = vld [vmem:[#allocation2 + $0xbf8] sm:$0xff]  ;;  %v916_v58 = vmul.f32 3.2456994, %v404_v52  ;;  %v407_v61 = vld [vmem:[#allocation2 + $0xc00] sm:$0xff] }
 0x18b   :  { %1936 = vst [vmem:[#allocation5 + $0xbc8] sm:$0xff] %v1424_v48  ;;  %v1425_v55 = vadd.f32 -0.42421293, %v913_v49  ;;  %v1426_v56 = vadd.f32 -0.42421293, %v914_v50  ;;  %v408_v62 = vld [vmem:[#allocation2 + $0xc08] sm:$0xff] }
 0x18c   :  { %v1427_v57 = vadd.f32 -0.42421293, %v915_v51  ;;  %v917_v59 = vmul.f32 3.2456994, %v405_v53  ;;  %v918_v60 = vmul.f32 3.2456994, %v406_v54 }
 0x18d   :  { %1937 = vst [vmem:[#allocation5 + $0xbd0] sm:$0xff] %v1425_v55  ;;  %1938 = vst [vmem:[#allocation5 + $0xbd8] sm:$0xff] %v1426_v56  ;;  %v409_v63 = vld [vmem:[#allocation2 + $0xc10] sm:$0xff]  ;;  %v1428_v0 = vadd.f32 -0.42421293, %v916_v58  ;;  %v410_v6 = vld [vmem:[#allocation2 + $0xc18] sm:$0xff] }
 0x18e   :  { %1939 = vst [vmem:[#allocation5 + $0xbe0] sm:$0xff] %v1427_v57  ;;  %v1429_v1 = vadd.f32 -0.42421293, %v917_v59  ;;  %v1430_v2 = vadd.f32 -0.42421293, %v918_v60  ;;  %v411_v7 = vld [vmem:[#allocation2 + $0xc20] sm:$0xff] }
 0x18f   :  { %v919_v3 = vmul.f32 3.2456994, %v407_v61  ;;  %v920_v4 = vmul.f32 3.2456994, %v408_v62  ;;  %v921_v5 = vmul.f32 3.2456994, %v409_v63 }
 0x190   :  { %1940 = vst [vmem:[#allocation5 + $0xbe8] sm:$0xff] %v1428_v0  ;;  %1941 = vst [vmem:[#allocation5 + $0xbf0] sm:$0xff] %v1429_v1  ;;  %v412_v8 = vld [vmem:[#allocation2 + $0xc28] sm:$0xff]  ;;  %v922_v12 = vmul.f32 3.2456994, %v410_v6  ;;  %v413_v15 = vld [vmem:[#allocation2 + $0xc30] sm:$0xff] }
 0x191   :  { %1942 = vst [vmem:[#allocation5 + $0xbf8] sm:$0xff] %v1430_v2  ;;  %v1431_v9 = vadd.f32 -0.42421293, %v919_v3  ;;  %v1432_v10 = vadd.f32 -0.42421293, %v920_v4  ;;  %v414_v16 = vld [vmem:[#allocation2 + $0xc38] sm:$0xff] }
 0x192   :  { %v1433_v11 = vadd.f32 -0.42421293, %v921_v5  ;;  %v923_v13 = vmul.f32 3.2456994, %v411_v7  ;;  %v924_v14 = vmul.f32 3.2456994, %v412_v8 }
 0x193   :  { %1943 = vst [vmem:[#allocation5 + $0xc00] sm:$0xff] %v1431_v9  ;;  %1944 = vst [vmem:[#allocation5 + $0xc08] sm:$0xff] %v1432_v10  ;;  %v415_v17 = vld [vmem:[#allocation2 + $0xc40] sm:$0xff]  ;;  %v1434_v18 = vadd.f32 -0.42421293, %v922_v12  ;;  %v416_v24 = vld [vmem:[#allocation2 + $0xc48] sm:$0xff] }
 0x194   :  { %1945 = vst [vmem:[#allocation5 + $0xc10] sm:$0xff] %v1433_v11  ;;  %v1435_v19 = vadd.f32 -0.42421293, %v923_v13  ;;  %v1436_v20 = vadd.f32 -0.42421293, %v924_v14  ;;  %v417_v25 = vld [vmem:[#allocation2 + $0xc50] sm:$0xff] }
 0x195   :  { %v925_v21 = vmul.f32 3.2456994, %v413_v15  ;;  %v926_v22 = vmul.f32 3.2456994, %v414_v16  ;;  %v927_v23 = vmul.f32 3.2456994, %v415_v17 }
 0x196   :  { %1946 = vst [vmem:[#allocation5 + $0xc18] sm:$0xff] %v1434_v18  ;;  %1947 = vst [vmem:[#allocation5 + $0xc20] sm:$0xff] %v1435_v19  ;;  %v418_v26 = vld [vmem:[#allocation2 + $0xc58] sm:$0xff]  ;;  %v928_v30 = vmul.f32 3.2456994, %v416_v24  ;;  %v419_v33 = vld [vmem:[#allocation2 + $0xc60] sm:$0xff] }
 0x197   :  { %1948 = vst [vmem:[#allocation5 + $0xc28] sm:$0xff] %v1436_v20  ;;  %v1437_v27 = vadd.f32 -0.42421293, %v925_v21  ;;  %v1438_v28 = vadd.f32 -0.42421293, %v926_v22  ;;  %v420_v34 = vld [vmem:[#allocation2 + $0xc68] sm:$0xff] }
 0x198   :  { %v1439_v29 = vadd.f32 -0.42421293, %v927_v23  ;;  %v929_v31 = vmul.f32 3.2456994, %v417_v25  ;;  %v930_v32 = vmul.f32 3.2456994, %v418_v26 }
 0x199   :  { %1949 = vst [vmem:[#allocation5 + $0xc30] sm:$0xff] %v1437_v27  ;;  %1950 = vst [vmem:[#allocation5 + $0xc38] sm:$0xff] %v1438_v28  ;;  %v421_v35 = vld [vmem:[#allocation2 + $0xc70] sm:$0xff]  ;;  %v1440_v36 = vadd.f32 -0.42421293, %v928_v30  ;;  %v422_v42 = vld [vmem:[#allocation2 + $0xc78] sm:$0xff] }
 0x19a   :  { %1951 = vst [vmem:[#allocation5 + $0xc40] sm:$0xff] %v1439_v29  ;;  %v1441_v37 = vadd.f32 -0.42421293, %v929_v31  ;;  %v1442_v38 = vadd.f32 -0.42421293, %v930_v32  ;;  %v423_v43 = vld [vmem:[#allocation2 + $0xc80] sm:$0xff] }
 0x19b   :  { %v931_v39 = vmul.f32 3.2456994, %v419_v33  ;;  %v932_v40 = vmul.f32 3.2456994, %v420_v34  ;;  %v933_v41 = vmul.f32 3.2456994, %v421_v35 }
 0x19c   :  { %1952 = vst [vmem:[#allocation5 + $0xc48] sm:$0xff] %v1440_v36  ;;  %1953 = vst [vmem:[#allocation5 + $0xc50] sm:$0xff] %v1441_v37  ;;  %v424_v44 = vld [vmem:[#allocation2 + $0xc88] sm:$0xff]  ;;  %v934_v48 = vmul.f32 3.2456994, %v422_v42  ;;  %v425_v51 = vld [vmem:[#allocation2 + $0xc90] sm:$0xff] }
 0x19d   :  { %1954 = vst [vmem:[#allocation5 + $0xc58] sm:$0xff] %v1442_v38  ;;  %v1443_v45 = vadd.f32 -0.42421293, %v931_v39  ;;  %v1444_v46 = vadd.f32 -0.42421293, %v932_v40  ;;  %v426_v52 = vld [vmem:[#allocation2 + $0xc98] sm:$0xff] }
 0x19e   :  { %v1445_v47 = vadd.f32 -0.42421293, %v933_v41  ;;  %v935_v49 = vmul.f32 3.2456994, %v423_v43  ;;  %v936_v50 = vmul.f32 3.2456994, %v424_v44 }
 0x19f   :  { %1955 = vst [vmem:[#allocation5 + $0xc60] sm:$0xff] %v1443_v45  ;;  %1956 = vst [vmem:[#allocation5 + $0xc68] sm:$0xff] %v1444_v46  ;;  %v427_v53 = vld [vmem:[#allocation2 + $0xca0] sm:$0xff]  ;;  %v1446_v54 = vadd.f32 -0.42421293, %v934_v48  ;;  %v428_v60 = vld [vmem:[#allocation2 + $0xca8] sm:$0xff] }
 0x1a0   :  { %1957 = vst [vmem:[#allocation5 + $0xc70] sm:$0xff] %v1445_v47  ;;  %v1447_v55 = vadd.f32 -0.42421293, %v935_v49  ;;  %v1448_v56 = vadd.f32 -0.42421293, %v936_v50  ;;  %v429_v61 = vld [vmem:[#allocation2 + $0xcb0] sm:$0xff] }
 0x1a1   :  { %v937_v57 = vmul.f32 3.2456994, %v425_v51  ;;  %v938_v58 = vmul.f32 3.2456994, %v426_v52  ;;  %v939_v59 = vmul.f32 3.2456994, %v427_v53 }
 0x1a2   :  { %1958 = vst [vmem:[#allocation5 + $0xc78] sm:$0xff] %v1446_v54  ;;  %1959 = vst [vmem:[#allocation5 + $0xc80] sm:$0xff] %v1447_v55  ;;  %v430_v62 = vld [vmem:[#allocation2 + $0xcb8] sm:$0xff]  ;;  %v940_v2 = vmul.f32 3.2456994, %v428_v60  ;;  %v431_v5 = vld [vmem:[#allocation2 + $0xcc0] sm:$0xff] }
 0x1a3   :  { %1960 = vst [vmem:[#allocation5 + $0xc88] sm:$0xff] %v1448_v56  ;;  %v1449_v63 = vadd.f32 -0.42421293, %v937_v57  ;;  %v1450_v0 = vadd.f32 -0.42421293, %v938_v58  ;;  %v432_v6 = vld [vmem:[#allocation2 + $0xcc8] sm:$0xff] }
 0x1a4   :  { %v1451_v1 = vadd.f32 -0.42421293, %v939_v59  ;;  %v941_v3 = vmul.f32 3.2456994, %v429_v61  ;;  %v942_v4 = vmul.f32 3.2456994, %v430_v62 }
 0x1a5   :  { %1961 = vst [vmem:[#allocation5 + $0xc90] sm:$0xff] %v1449_v63  ;;  %1962 = vst [vmem:[#allocation5 + $0xc98] sm:$0xff] %v1450_v0  ;;  %v433_v7 = vld [vmem:[#allocation2 + $0xcd0] sm:$0xff]  ;;  %v1452_v8 = vadd.f32 -0.42421293, %v940_v2  ;;  %v434_v14 = vld [vmem:[#allocation2 + $0xcd8] sm:$0xff] }
 0x1a6   :  { %1963 = vst [vmem:[#allocation5 + $0xca0] sm:$0xff] %v1451_v1  ;;  %v1453_v9 = vadd.f32 -0.42421293, %v941_v3  ;;  %v1454_v10 = vadd.f32 -0.42421293, %v942_v4  ;;  %v435_v15 = vld [vmem:[#allocation2 + $0xce0] sm:$0xff] }
 0x1a7   :  { %v943_v11 = vmul.f32 3.2456994, %v431_v5  ;;  %v944_v12 = vmul.f32 3.2456994, %v432_v6  ;;  %v945_v13 = vmul.f32 3.2456994, %v433_v7 }
 0x1a8   :  { %1964 = vst [vmem:[#allocation5 + $0xca8] sm:$0xff] %v1452_v8  ;;  %1965 = vst [vmem:[#allocation5 + $0xcb0] sm:$0xff] %v1453_v9  ;;  %v436_v16 = vld [vmem:[#allocation2 + $0xce8] sm:$0xff]  ;;  %v946_v20 = vmul.f32 3.2456994, %v434_v14  ;;  %v437_v23 = vld [vmem:[#allocation2 + $0xcf0] sm:$0xff] }
 0x1a9   :  { %1966 = vst [vmem:[#allocation5 + $0xcb8] sm:$0xff] %v1454_v10  ;;  %v1455_v17 = vadd.f32 -0.42421293, %v943_v11  ;;  %v1456_v18 = vadd.f32 -0.42421293, %v944_v12  ;;  %v438_v24 = vld [vmem:[#allocation2 + $0xcf8] sm:$0xff] }
 0x1aa   :  { %v1457_v19 = vadd.f32 -0.42421293, %v945_v13  ;;  %v947_v21 = vmul.f32 3.2456994, %v435_v15  ;;  %v948_v22 = vmul.f32 3.2456994, %v436_v16 }
 0x1ab   :  { %1967 = vst [vmem:[#allocation5 + $0xcc0] sm:$0xff] %v1455_v17  ;;  %1968 = vst [vmem:[#allocation5 + $0xcc8] sm:$0xff] %v1456_v18  ;;  %v439_v25 = vld [vmem:[#allocation2 + $0xd00] sm:$0xff]  ;;  %v1458_v26 = vadd.f32 -0.42421293, %v946_v20  ;;  %v440_v32 = vld [vmem:[#allocation2 + $0xd08] sm:$0xff] }
 0x1ac   :  { %1969 = vst [vmem:[#allocation5 + $0xcd0] sm:$0xff] %v1457_v19  ;;  %v1459_v27 = vadd.f32 -0.42421293, %v947_v21  ;;  %v1460_v28 = vadd.f32 -0.42421293, %v948_v22  ;;  %v441_v33 = vld [vmem:[#allocation2 + $0xd10] sm:$0xff] }
 0x1ad   :  { %v949_v29 = vmul.f32 3.2456994, %v437_v23  ;;  %v950_v30 = vmul.f32 3.2456994, %v438_v24  ;;  %v951_v31 = vmul.f32 3.2456994, %v439_v25 }
 0x1ae   :  { %1970 = vst [vmem:[#allocation5 + $0xcd8] sm:$0xff] %v1458_v26  ;;  %1971 = vst [vmem:[#allocation5 + $0xce0] sm:$0xff] %v1459_v27  ;;  %v442_v34 = vld [vmem:[#allocation2 + $0xd18] sm:$0xff]  ;;  %v952_v38 = vmul.f32 3.2456994, %v440_v32  ;;  %v443_v41 = vld [vmem:[#allocation2 + $0xd20] sm:$0xff] }
 0x1af   :  { %1972 = vst [vmem:[#allocation5 + $0xce8] sm:$0xff] %v1460_v28  ;;  %v1461_v35 = vadd.f32 -0.42421293, %v949_v29  ;;  %v1462_v36 = vadd.f32 -0.42421293, %v950_v30  ;;  %v444_v42 = vld [vmem:[#allocation2 + $0xd28] sm:$0xff] }
 0x1b0   :  { %v1463_v37 = vadd.f32 -0.42421293, %v951_v31  ;;  %v953_v39 = vmul.f32 3.2456994, %v441_v33  ;;  %v954_v40 = vmul.f32 3.2456994, %v442_v34 }
 0x1b1   :  { %1973 = vst [vmem:[#allocation5 + $0xcf0] sm:$0xff] %v1461_v35  ;;  %1974 = vst [vmem:[#allocation5 + $0xcf8] sm:$0xff] %v1462_v36  ;;  %v445_v43 = vld [vmem:[#allocation2 + $0xd30] sm:$0xff]  ;;  %v1464_v44 = vadd.f32 -0.42421293, %v952_v38  ;;  %v446_v50 = vld [vmem:[#allocation2 + $0xd38] sm:$0xff] }
 0x1b2   :  { %1975 = vst [vmem:[#allocation5 + $0xd00] sm:$0xff] %v1463_v37  ;;  %v1465_v45 = vadd.f32 -0.42421293, %v953_v39  ;;  %v1466_v46 = vadd.f32 -0.42421293, %v954_v40  ;;  %v447_v51 = vld [vmem:[#allocation2 + $0xd40] sm:$0xff] }
 0x1b3   :  { %v955_v47 = vmul.f32 3.2456994, %v443_v41  ;;  %v956_v48 = vmul.f32 3.2456994, %v444_v42  ;;  %v957_v49 = vmul.f32 3.2456994, %v445_v43 }
 0x1b4   :  { %1976 = vst [vmem:[#allocation5 + $0xd08] sm:$0xff] %v1464_v44  ;;  %1977 = vst [vmem:[#allocation5 + $0xd10] sm:$0xff] %v1465_v45  ;;  %v448_v52 = vld [vmem:[#allocation2 + $0xd48] sm:$0xff]  ;;  %v958_v56 = vmul.f32 3.2456994, %v446_v50  ;;  %v449_v59 = vld [vmem:[#allocation2 + $0xd50] sm:$0xff] }
 0x1b5   :  { %1978 = vst [vmem:[#allocation5 + $0xd18] sm:$0xff] %v1466_v46  ;;  %v1467_v53 = vadd.f32 -0.42421293, %v955_v47  ;;  %v1468_v54 = vadd.f32 -0.42421293, %v956_v48  ;;  %v450_v60 = vld [vmem:[#allocation2 + $0xd58] sm:$0xff] }
 0x1b6   :  { %v1469_v55 = vadd.f32 -0.42421293, %v957_v49  ;;  %v959_v57 = vmul.f32 3.2456994, %v447_v51  ;;  %v960_v58 = vmul.f32 3.2456994, %v448_v52 }
 0x1b7   :  { %1979 = vst [vmem:[#allocation5 + $0xd20] sm:$0xff] %v1467_v53  ;;  %1980 = vst [vmem:[#allocation5 + $0xd28] sm:$0xff] %v1468_v54  ;;  %v451_v61 = vld [vmem:[#allocation2 + $0xd60] sm:$0xff]  ;;  %v1470_v62 = vadd.f32 -0.42421293, %v958_v56  ;;  %v452_v4 = vld [vmem:[#allocation2 + $0xd68] sm:$0xff] }
 0x1b8   :  { %1981 = vst [vmem:[#allocation5 + $0xd30] sm:$0xff] %v1469_v55  ;;  %v1471_v63 = vadd.f32 -0.42421293, %v959_v57  ;;  %v1472_v0 = vadd.f32 -0.42421293, %v960_v58  ;;  %v453_v5 = vld [vmem:[#allocation2 + $0xd70] sm:$0xff] }
 0x1b9   :  { %v961_v1 = vmul.f32 3.2456994, %v449_v59  ;;  %v962_v2 = vmul.f32 3.2456994, %v450_v60  ;;  %v963_v3 = vmul.f32 3.2456994, %v451_v61 }
 0x1ba   :  { %1982 = vst [vmem:[#allocation5 + $0xd38] sm:$0xff] %v1470_v62  ;;  %1983 = vst [vmem:[#allocation5 + $0xd40] sm:$0xff] %v1471_v63  ;;  %v454_v6 = vld [vmem:[#allocation2 + $0xd78] sm:$0xff]  ;;  %v964_v10 = vmul.f32 3.2456994, %v452_v4  ;;  %v455_v13 = vld [vmem:[#allocation2 + $0xd80] sm:$0xff] }
 0x1bb   :  { %1984 = vst [vmem:[#allocation5 + $0xd48] sm:$0xff] %v1472_v0  ;;  %v1473_v7 = vadd.f32 -0.42421293, %v961_v1  ;;  %v1474_v8 = vadd.f32 -0.42421293, %v962_v2  ;;  %v456_v14 = vld [vmem:[#allocation2 + $0xd88] sm:$0xff] }
 0x1bc   :  { %v1475_v9 = vadd.f32 -0.42421293, %v963_v3  ;;  %v965_v11 = vmul.f32 3.2456994, %v453_v5  ;;  %v966_v12 = vmul.f32 3.2456994, %v454_v6 }
 0x1bd   :  { %1985 = vst [vmem:[#allocation5 + $0xd50] sm:$0xff] %v1473_v7  ;;  %1986 = vst [vmem:[#allocation5 + $0xd58] sm:$0xff] %v1474_v8  ;;  %v457_v15 = vld [vmem:[#allocation2 + $0xd90] sm:$0xff]  ;;  %v1476_v16 = vadd.f32 -0.42421293, %v964_v10  ;;  %v458_v22 = vld [vmem:[#allocation2 + $0xd98] sm:$0xff] }
 0x1be   :  { %1987 = vst [vmem:[#allocation5 + $0xd60] sm:$0xff] %v1475_v9  ;;  %v1477_v17 = vadd.f32 -0.42421293, %v965_v11  ;;  %v1478_v18 = vadd.f32 -0.42421293, %v966_v12  ;;  %v459_v23 = vld [vmem:[#allocation2 + $0xda0] sm:$0xff] }
 0x1bf   :  { %v967_v19 = vmul.f32 3.2456994, %v455_v13  ;;  %v968_v20 = vmul.f32 3.2456994, %v456_v14  ;;  %v969_v21 = vmul.f32 3.2456994, %v457_v15 }
 0x1c0   :  { %1988 = vst [vmem:[#allocation5 + $0xd68] sm:$0xff] %v1476_v16  ;;  %1989 = vst [vmem:[#allocation5 + $0xd70] sm:$0xff] %v1477_v17  ;;  %v460_v24 = vld [vmem:[#allocation2 + $0xda8] sm:$0xff]  ;;  %v970_v28 = vmul.f32 3.2456994, %v458_v22  ;;  %v461_v31 = vld [vmem:[#allocation2 + $0xdb0] sm:$0xff] }
 0x1c1   :  { %1990 = vst [vmem:[#allocation5 + $0xd78] sm:$0xff] %v1478_v18  ;;  %v1479_v25 = vadd.f32 -0.42421293, %v967_v19  ;;  %v1480_v26 = vadd.f32 -0.42421293, %v968_v20  ;;  %v462_v32 = vld [vmem:[#allocation2 + $0xdb8] sm:$0xff] }
 0x1c2   :  { %v1481_v27 = vadd.f32 -0.42421293, %v969_v21  ;;  %v971_v29 = vmul.f32 3.2456994, %v459_v23  ;;  %v972_v30 = vmul.f32 3.2456994, %v460_v24 }
 0x1c3   :  { %1991 = vst [vmem:[#allocation5 + $0xd80] sm:$0xff] %v1479_v25  ;;  %1992 = vst [vmem:[#allocation5 + $0xd88] sm:$0xff] %v1480_v26  ;;  %v463_v33 = vld [vmem:[#allocation2 + $0xdc0] sm:$0xff]  ;;  %v1482_v34 = vadd.f32 -0.42421293, %v970_v28  ;;  %v464_v40 = vld [vmem:[#allocation2 + $0xdc8] sm:$0xff] }
 0x1c4   :  { %1993 = vst [vmem:[#allocation5 + $0xd90] sm:$0xff] %v1481_v27  ;;  %v1483_v35 = vadd.f32 -0.42421293, %v971_v29  ;;  %v1484_v36 = vadd.f32 -0.42421293, %v972_v30  ;;  %v465_v41 = vld [vmem:[#allocation2 + $0xdd0] sm:$0xff] }
 0x1c5   :  { %v973_v37 = vmul.f32 3.2456994, %v461_v31  ;;  %v974_v38 = vmul.f32 3.2456994, %v462_v32  ;;  %v975_v39 = vmul.f32 3.2456994, %v463_v33 }
 0x1c6   :  { %1994 = vst [vmem:[#allocation5 + $0xd98] sm:$0xff] %v1482_v34  ;;  %1995 = vst [vmem:[#allocation5 + $0xda0] sm:$0xff] %v1483_v35  ;;  %v466_v42 = vld [vmem:[#allocation2 + $0xdd8] sm:$0xff]  ;;  %v976_v46 = vmul.f32 3.2456994, %v464_v40  ;;  %v467_v49 = vld [vmem:[#allocation2 + $0xde0] sm:$0xff] }
 0x1c7   :  { %1996 = vst [vmem:[#allocation5 + $0xda8] sm:$0xff] %v1484_v36  ;;  %v1485_v43 = vadd.f32 -0.42421293, %v973_v37  ;;  %v1486_v44 = vadd.f32 -0.42421293, %v974_v38  ;;  %v468_v50 = vld [vmem:[#allocation2 + $0xde8] sm:$0xff] }
 0x1c8   :  { %v1487_v45 = vadd.f32 -0.42421293, %v975_v39  ;;  %v977_v47 = vmul.f32 3.2456994, %v465_v41  ;;  %v978_v48 = vmul.f32 3.2456994, %v466_v42 }
 0x1c9   :  { %1997 = vst [vmem:[#allocation5 + $0xdb0] sm:$0xff] %v1485_v43  ;;  %1998 = vst [vmem:[#allocation5 + $0xdb8] sm:$0xff] %v1486_v44  ;;  %v469_v51 = vld [vmem:[#allocation2 + $0xdf0] sm:$0xff]  ;;  %v1488_v52 = vadd.f32 -0.42421293, %v976_v46  ;;  %v470_v58 = vld [vmem:[#allocation2 + $0xdf8] sm:$0xff] }
 0x1ca   :  { %1999 = vst [vmem:[#allocation5 + $0xdc0] sm:$0xff] %v1487_v45  ;;  %v1489_v53 = vadd.f32 -0.42421293, %v977_v47  ;;  %v1490_v54 = vadd.f32 -0.42421293, %v978_v48  ;;  %v471_v59 = vld [vmem:[#allocation2 + $0xe00] sm:$0xff] }
 0x1cb   :  { %v979_v55 = vmul.f32 3.2456994, %v467_v49  ;;  %v980_v56 = vmul.f32 3.2456994, %v468_v50  ;;  %v981_v57 = vmul.f32 3.2456994, %v469_v51 }
 0x1cc   :  { %2000 = vst [vmem:[#allocation5 + $0xdc8] sm:$0xff] %v1488_v52  ;;  %2001 = vst [vmem:[#allocation5 + $0xdd0] sm:$0xff] %v1489_v53  ;;  %v472_v60 = vld [vmem:[#allocation2 + $0xe08] sm:$0xff]  ;;  %v982_v0 = vmul.f32 3.2456994, %v470_v58  ;;  %v473_v3 = vld [vmem:[#allocation2 + $0xe10] sm:$0xff] }
 0x1cd   :  { %2002 = vst [vmem:[#allocation5 + $0xdd8] sm:$0xff] %v1490_v54  ;;  %v1491_v61 = vadd.f32 -0.42421293, %v979_v55  ;;  %v1492_v62 = vadd.f32 -0.42421293, %v980_v56  ;;  %v474_v4 = vld [vmem:[#allocation2 + $0xe18] sm:$0xff] }
 0x1ce   :  { %v1493_v63 = vadd.f32 -0.42421293, %v981_v57  ;;  %v983_v1 = vmul.f32 3.2456994, %v471_v59  ;;  %v984_v2 = vmul.f32 3.2456994, %v472_v60 }
 0x1cf   :  { %2003 = vst [vmem:[#allocation5 + $0xde0] sm:$0xff] %v1491_v61  ;;  %2004 = vst [vmem:[#allocation5 + $0xde8] sm:$0xff] %v1492_v62  ;;  %v475_v5 = vld [vmem:[#allocation2 + $0xe20] sm:$0xff]  ;;  %v1494_v6 = vadd.f32 -0.42421293, %v982_v0  ;;  %v476_v12 = vld [vmem:[#allocation2 + $0xe28] sm:$0xff] }
 0x1d0   :  { %2005 = vst [vmem:[#allocation5 + $0xdf0] sm:$0xff] %v1493_v63  ;;  %v1495_v7 = vadd.f32 -0.42421293, %v983_v1  ;;  %v1496_v8 = vadd.f32 -0.42421293, %v984_v2  ;;  %v477_v13 = vld [vmem:[#allocation2 + $0xe30] sm:$0xff] }
 0x1d1   :  { %v985_v9 = vmul.f32 3.2456994, %v473_v3  ;;  %v986_v10 = vmul.f32 3.2456994, %v474_v4  ;;  %v987_v11 = vmul.f32 3.2456994, %v475_v5 }
 0x1d2   :  { %2006 = vst [vmem:[#allocation5 + $0xdf8] sm:$0xff] %v1494_v6  ;;  %2007 = vst [vmem:[#allocation5 + $0xe00] sm:$0xff] %v1495_v7  ;;  %v478_v14 = vld [vmem:[#allocation2 + $0xe38] sm:$0xff]  ;;  %v988_v18 = vmul.f32 3.2456994, %v476_v12  ;;  %v479_v21 = vld [vmem:[#allocation2 + $0xe40] sm:$0xff] }
 0x1d3   :  { %2008 = vst [vmem:[#allocation5 + $0xe08] sm:$0xff] %v1496_v8  ;;  %v1497_v15 = vadd.f32 -0.42421293, %v985_v9  ;;  %v1498_v16 = vadd.f32 -0.42421293, %v986_v10  ;;  %v480_v22 = vld [vmem:[#allocation2 + $0xe48] sm:$0xff] }
 0x1d4   :  { %v1499_v17 = vadd.f32 -0.42421293, %v987_v11  ;;  %v989_v19 = vmul.f32 3.2456994, %v477_v13  ;;  %v990_v20 = vmul.f32 3.2456994, %v478_v14 }
 0x1d5   :  { %2009 = vst [vmem:[#allocation5 + $0xe10] sm:$0xff] %v1497_v15  ;;  %2010 = vst [vmem:[#allocation5 + $0xe18] sm:$0xff] %v1498_v16  ;;  %v481_v23 = vld [vmem:[#allocation2 + $0xe50] sm:$0xff]  ;;  %v1500_v24 = vadd.f32 -0.42421293, %v988_v18  ;;  %v482_v30 = vld [vmem:[#allocation2 + $0xe58] sm:$0xff] }
 0x1d6   :  { %2011 = vst [vmem:[#allocation5 + $0xe20] sm:$0xff] %v1499_v17  ;;  %v1501_v25 = vadd.f32 -0.42421293, %v989_v19  ;;  %v1502_v26 = vadd.f32 -0.42421293, %v990_v20  ;;  %v483_v31 = vld [vmem:[#allocation2 + $0xe60] sm:$0xff] }
 0x1d7   :  { %v991_v27 = vmul.f32 3.2456994, %v479_v21  ;;  %v992_v28 = vmul.f32 3.2456994, %v480_v22  ;;  %v993_v29 = vmul.f32 3.2456994, %v481_v23 }
 0x1d8   :  { %2012 = vst [vmem:[#allocation5 + $0xe28] sm:$0xff] %v1500_v24  ;;  %2013 = vst [vmem:[#allocation5 + $0xe30] sm:$0xff] %v1501_v25  ;;  %v484_v32 = vld [vmem:[#allocation2 + $0xe68] sm:$0xff]  ;;  %v994_v36 = vmul.f32 3.2456994, %v482_v30  ;;  %v485_v39 = vld [vmem:[#allocation2 + $0xe70] sm:$0xff] }
 0x1d9   :  { %2014 = vst [vmem:[#allocation5 + $0xe38] sm:$0xff] %v1502_v26  ;;  %v1503_v33 = vadd.f32 -0.42421293, %v991_v27  ;;  %v1504_v34 = vadd.f32 -0.42421293, %v992_v28  ;;  %v486_v40 = vld [vmem:[#allocation2 + $0xe78] sm:$0xff] }
 0x1da   :  { %v1505_v35 = vadd.f32 -0.42421293, %v993_v29  ;;  %v995_v37 = vmul.f32 3.2456994, %v483_v31  ;;  %v996_v38 = vmul.f32 3.2456994, %v484_v32 }
 0x1db   :  { %2015 = vst [vmem:[#allocation5 + $0xe40] sm:$0xff] %v1503_v33  ;;  %2016 = vst [vmem:[#allocation5 + $0xe48] sm:$0xff] %v1504_v34  ;;  %v487_v41 = vld [vmem:[#allocation2 + $0xe80] sm:$0xff]  ;;  %v1506_v42 = vadd.f32 -0.42421293, %v994_v36  ;;  %v488_v48 = vld [vmem:[#allocation2 + $0xe88] sm:$0xff] }
 0x1dc   :  { %2017 = vst [vmem:[#allocation5 + $0xe50] sm:$0xff] %v1505_v35  ;;  %v1507_v43 = vadd.f32 -0.42421293, %v995_v37  ;;  %v1508_v44 = vadd.f32 -0.42421293, %v996_v38  ;;  %v489_v49 = vld [vmem:[#allocation2 + $0xe90] sm:$0xff] }
 0x1dd   :  { %v997_v45 = vmul.f32 3.2456994, %v485_v39  ;;  %v998_v46 = vmul.f32 3.2456994, %v486_v40  ;;  %v999_v47 = vmul.f32 3.2456994, %v487_v41 }
 0x1de   :  { %2018 = vst [vmem:[#allocation5 + $0xe58] sm:$0xff] %v1506_v42  ;;  %2019 = vst [vmem:[#allocation5 + $0xe60] sm:$0xff] %v1507_v43  ;;  %v490_v50 = vld [vmem:[#allocation2 + $0xe98] sm:$0xff]  ;;  %v1000_v54 = vmul.f32 3.2456994, %v488_v48  ;;  %v491_v57 = vld [vmem:[#allocation2 + $0xea0] sm:$0xff] }
 0x1df   :  { %2020 = vst [vmem:[#allocation5 + $0xe68] sm:$0xff] %v1508_v44  ;;  %v1509_v51 = vadd.f32 -0.42421293, %v997_v45  ;;  %v1510_v52 = vadd.f32 -0.42421293, %v998_v46  ;;  %v492_v58 = vld [vmem:[#allocation2 + $0xea8] sm:$0xff] }
 0x1e0   :  { %v1511_v53 = vadd.f32 -0.42421293, %v999_v47  ;;  %v1001_v55 = vmul.f32 3.2456994, %v489_v49  ;;  %v1002_v56 = vmul.f32 3.2456994, %v490_v50 }
 0x1e1   :  { %2021 = vst [vmem:[#allocation5 + $0xe70] sm:$0xff] %v1509_v51  ;;  %2022 = vst [vmem:[#allocation5 + $0xe78] sm:$0xff] %v1510_v52  ;;  %v493_v59 = vld [vmem:[#allocation2 + $0xeb0] sm:$0xff]  ;;  %v1512_v60 = vadd.f32 -0.42421293, %v1000_v54  ;;  %v494_v2 = vld [vmem:[#allocation2 + $0xeb8] sm:$0xff] }
 0x1e2   :  { %2023 = vst [vmem:[#allocation5 + $0xe80] sm:$0xff] %v1511_v53  ;;  %v1513_v61 = vadd.f32 -0.42421293, %v1001_v55  ;;  %v1514_v62 = vadd.f32 -0.42421293, %v1002_v56  ;;  %v495_v3 = vld [vmem:[#allocation2 + $0xec0] sm:$0xff] }
 0x1e3   :  { %v1003_v63 = vmul.f32 3.2456994, %v491_v57  ;;  %v1004_v0 = vmul.f32 3.2456994, %v492_v58  ;;  %v1005_v1 = vmul.f32 3.2456994, %v493_v59 }
 0x1e4   :  { %2024 = vst [vmem:[#allocation5 + $0xe88] sm:$0xff] %v1512_v60  ;;  %2025 = vst [vmem:[#allocation5 + $0xe90] sm:$0xff] %v1513_v61  ;;  %v496_v4 = vld [vmem:[#allocation2 + $0xec8] sm:$0xff]  ;;  %v1006_v8 = vmul.f32 3.2456994, %v494_v2  ;;  %v497_v11 = vld [vmem:[#allocation2 + $0xed0] sm:$0xff] }
 0x1e5   :  { %2026 = vst [vmem:[#allocation5 + $0xe98] sm:$0xff] %v1514_v62  ;;  %v1515_v5 = vadd.f32 -0.42421293, %v1003_v63  ;;  %v1516_v6 = vadd.f32 -0.42421293, %v1004_v0  ;;  %v498_v12 = vld [vmem:[#allocation2 + $0xed8] sm:$0xff] }
 0x1e6   :  { %v1517_v7 = vadd.f32 -0.42421293, %v1005_v1  ;;  %v1007_v9 = vmul.f32 3.2456994, %v495_v3  ;;  %v1008_v10 = vmul.f32 3.2456994, %v496_v4 }
 0x1e7   :  { %2027 = vst [vmem:[#allocation5 + $0xea0] sm:$0xff] %v1515_v5  ;;  %2028 = vst [vmem:[#allocation5 + $0xea8] sm:$0xff] %v1516_v6  ;;  %v499_v13 = vld [vmem:[#allocation2 + $0xee0] sm:$0xff]  ;;  %v1518_v14 = vadd.f32 -0.42421293, %v1006_v8  ;;  %v500_v20 = vld [vmem:[#allocation2 + $0xee8] sm:$0xff] }
 0x1e8   :  { %2029 = vst [vmem:[#allocation5 + $0xeb0] sm:$0xff] %v1517_v7  ;;  %v1519_v15 = vadd.f32 -0.42421293, %v1007_v9  ;;  %v1520_v16 = vadd.f32 -0.42421293, %v1008_v10  ;;  %v501_v21 = vld [vmem:[#allocation2 + $0xef0] sm:$0xff] }
 0x1e9   :  { %v1009_v17 = vmul.f32 3.2456994, %v497_v11  ;;  %v1010_v18 = vmul.f32 3.2456994, %v498_v12  ;;  %v1011_v19 = vmul.f32 3.2456994, %v499_v13 }
 0x1ea   :  { %2030 = vst [vmem:[#allocation5 + $0xeb8] sm:$0xff] %v1518_v14  ;;  %2031 = vst [vmem:[#allocation5 + $0xec0] sm:$0xff] %v1519_v15  ;;  %v502_v22 = vld [vmem:[#allocation2 + $0xef8] sm:$0xff]  ;;  %v1012_v26 = vmul.f32 3.2456994, %v500_v20  ;;  %v503_v29 = vld [vmem:[#allocation2 + $0xf00] sm:$0xff] }
 0x1eb   :  { %2032 = vst [vmem:[#allocation5 + $0xec8] sm:$0xff] %v1520_v16  ;;  %v1521_v23 = vadd.f32 -0.42421293, %v1009_v17  ;;  %v1522_v24 = vadd.f32 -0.42421293, %v1010_v18  ;;  %v504_v30 = vld [vmem:[#allocation2 + $0xf08] sm:$0xff] }
 0x1ec   :  { %v1523_v25 = vadd.f32 -0.42421293, %v1011_v19  ;;  %v1013_v27 = vmul.f32 3.2456994, %v501_v21  ;;  %v1014_v28 = vmul.f32 3.2456994, %v502_v22 }
 0x1ed   :  { %2033 = vst [vmem:[#allocation5 + $0xed0] sm:$0xff] %v1521_v23  ;;  %2034 = vst [vmem:[#allocation5 + $0xed8] sm:$0xff] %v1522_v24  ;;  %v505_v31 = vld [vmem:[#allocation2 + $0xf10] sm:$0xff]  ;;  %v1524_v32 = vadd.f32 -0.42421293, %v1012_v26  ;;  %v506_v38 = vld [vmem:[#allocation2 + $0xf18] sm:$0xff] }
 0x1ee   :  { %2035 = vst [vmem:[#allocation5 + $0xee0] sm:$0xff] %v1523_v25  ;;  %v1525_v33 = vadd.f32 -0.42421293, %v1013_v27  ;;  %v1526_v34 = vadd.f32 -0.42421293, %v1014_v28  ;;  %v507_v39 = vld [vmem:[#allocation2 + $0xf20] sm:$0xff] }
 0x1ef   :  { %v1015_v35 = vmul.f32 3.2456994, %v503_v29  ;;  %v1016_v36 = vmul.f32 3.2456994, %v504_v30  ;;  %v1017_v37 = vmul.f32 3.2456994, %v505_v31 }
 0x1f0   :  { %2036 = vst [vmem:[#allocation5 + $0xee8] sm:$0xff] %v1524_v32  ;;  %2037 = vst [vmem:[#allocation5 + $0xef0] sm:$0xff] %v1525_v33  ;;  %v508_v40 = vld [vmem:[#allocation2 + $0xf28] sm:$0xff]  ;;  %v1018_v44 = vmul.f32 3.2456994, %v506_v38  ;;  %v509_v47 = vld [vmem:[#allocation2 + $0xf30] sm:$0xff] }
 0x1f1   :  { %2038 = vst [vmem:[#allocation5 + $0xef8] sm:$0xff] %v1526_v34  ;;  %v1527_v41 = vadd.f32 -0.42421293, %v1015_v35  ;;  %v1528_v42 = vadd.f32 -0.42421293, %v1016_v36  ;;  %v510_v48 = vld [vmem:[#allocation2 + $0xf38] sm:$0xff] }
 0x1f2   :  { %v1529_v43 = vadd.f32 -0.42421293, %v1017_v37  ;;  %v1019_v45 = vmul.f32 3.2456994, %v507_v39  ;;  %v1020_v46 = vmul.f32 3.2456994, %v508_v40 }
 0x1f3   :  { %2039 = vst [vmem:[#allocation5 + $0xf00] sm:$0xff] %v1527_v41  ;;  %2040 = vst [vmem:[#allocation5 + $0xf08] sm:$0xff] %v1528_v42  ;;  %v511_v49 = vld [vmem:[#allocation2 + $0xf40] sm:$0xff]  ;;  %v1530_v50 = vadd.f32 -0.42421293, %v1018_v44  ;;  %v512_v56 = vld [vmem:[#allocation2 + $0xf48] sm:$0xff] }
 0x1f4   :  { %2041 = vst [vmem:[#allocation5 + $0xf10] sm:$0xff] %v1529_v43  ;;  %v1531_v51 = vadd.f32 -0.42421293, %v1019_v45  ;;  %v1532_v52 = vadd.f32 -0.42421293, %v1020_v46  ;;  %v513_v57 = vld [vmem:[#allocation2 + $0xf50] sm:$0xff] }
 0x1f5   :  { %v1021_v53 = vmul.f32 3.2456994, %v509_v47  ;;  %v1022_v54 = vmul.f32 3.2456994, %v510_v48  ;;  %v1023_v55 = vmul.f32 3.2456994, %v511_v49 }
 0x1f6   :  { %2042 = vst [vmem:[#allocation5 + $0xf18] sm:$0xff] %v1530_v50  ;;  %2043 = vst [vmem:[#allocation5 + $0xf20] sm:$0xff] %v1531_v51  ;;  %v514_v58 = vld [vmem:[#allocation2 + $0xf58] sm:$0xff]  ;;  %v1024_v62 = vmul.f32 3.2456994, %v512_v56  ;;  %v515_v1 = vld [vmem:[#allocation2 + $0xf60] sm:$0xff] }
 0x1f7   :  { %2044 = vst [vmem:[#allocation5 + $0xf28] sm:$0xff] %v1532_v52  ;;  %v1533_v59 = vadd.f32 -0.42421293, %v1021_v53  ;;  %v1534_v60 = vadd.f32 -0.42421293, %v1022_v54  ;;  %v516_v2 = vld [vmem:[#allocation2 + $0xf68] sm:$0xff] }
 0x1f8   :  { %v1535_v61 = vadd.f32 -0.42421293, %v1023_v55  ;;  %v1025_v63 = vmul.f32 3.2456994, %v513_v57  ;;  %v1026_v0 = vmul.f32 3.2456994, %v514_v58 }
 0x1f9   :  { %2045 = vst [vmem:[#allocation5 + $0xf30] sm:$0xff] %v1533_v59  ;;  %2046 = vst [vmem:[#allocation5 + $0xf38] sm:$0xff] %v1534_v60  ;;  %v517_v3 = vld [vmem:[#allocation2 + $0xf70] sm:$0xff]  ;;  %v1536_v4 = vadd.f32 -0.42421293, %v1024_v62  ;;  %v518_v10 = vld [vmem:[#allocation2 + $0xf78] sm:$0xff] }
 0x1fa   :  { %2047 = vst [vmem:[#allocation5 + $0xf40] sm:$0xff] %v1535_v61  ;;  %v1537_v5 = vadd.f32 -0.42421293, %v1025_v63  ;;  %v1538_v6 = vadd.f32 -0.42421293, %v1026_v0  ;;  %v519_v11 = vld [vmem:[#allocation2 + $0xf80] sm:$0xff] }
 0x1fb   :  { %v1027_v7 = vmul.f32 3.2456994, %v515_v1  ;;  %v1028_v8 = vmul.f32 3.2456994, %v516_v2  ;;  %v1029_v9 = vmul.f32 3.2456994, %v517_v3 }
 0x1fc   :  { %2048 = vst [vmem:[#allocation5 + $0xf48] sm:$0xff] %v1536_v4  ;;  %2049 = vst [vmem:[#allocation5 + $0xf50] sm:$0xff] %v1537_v5  ;;  %v520_v12 = vld [vmem:[#allocation2 + $0xf88] sm:$0xff]  ;;  %v1030_v16 = vmul.f32 3.2456994, %v518_v10  ;;  %v521_v19 = vld [vmem:[#allocation2 + $0xf90] sm:$0xff] }
 0x1fd   :  { %2050 = vst [vmem:[#allocation5 + $0xf58] sm:$0xff] %v1538_v6  ;;  %v1539_v13 = vadd.f32 -0.42421293, %v1027_v7  ;;  %v1540_v14 = vadd.f32 -0.42421293, %v1028_v8  ;;  %v522_v20 = vld [vmem:[#allocation2 + $0xf98] sm:$0xff] }
 0x1fe   :  { %v1541_v15 = vadd.f32 -0.42421293, %v1029_v9  ;;  %v1031_v17 = vmul.f32 3.2456994, %v519_v11  ;;  %v1032_v18 = vmul.f32 3.2456994, %v520_v12 }
 0x1ff   :  { %2051 = vst [vmem:[#allocation5 + $0xf60] sm:$0xff] %v1539_v13  ;;  %2052 = vst [vmem:[#allocation5 + $0xf68] sm:$0xff] %v1540_v14  ;;  %v523_v21 = vld [vmem:[#allocation2 + $0xfa0] sm:$0xff]  ;;  %v1542_v22 = vadd.f32 -0.42421293, %v1030_v16  ;;  %v524_v28 = vld [vmem:[#allocation2 + $0xfa8] sm:$0xff] }
 0x200   :  { %2053 = vst [vmem:[#allocation5 + $0xf70] sm:$0xff] %v1541_v15  ;;  %v1543_v23 = vadd.f32 -0.42421293, %v1031_v17  ;;  %v1544_v24 = vadd.f32 -0.42421293, %v1032_v18  ;;  %v525_v29 = vld [vmem:[#allocation2 + $0xfb0] sm:$0xff] }
 0x201   :  { %v1033_v25 = vmul.f32 3.2456994, %v521_v19  ;;  %v1034_v26 = vmul.f32 3.2456994, %v522_v20  ;;  %v1035_v27 = vmul.f32 3.2456994, %v523_v21 }
 0x202   :  { %2054 = vst [vmem:[#allocation5 + $0xf78] sm:$0xff] %v1542_v22  ;;  %2055 = vst [vmem:[#allocation5 + $0xf80] sm:$0xff] %v1543_v23  ;;  %v526_v30 = vld [vmem:[#allocation2 + $0xfb8] sm:$0xff]  ;;  %v1036_v34 = vmul.f32 3.2456994, %v524_v28  ;;  %v527_v37 = vld [vmem:[#allocation2 + $0xfc0] sm:$0xff] }
 0x203   :  { %2056 = vst [vmem:[#allocation5 + $0xf88] sm:$0xff] %v1544_v24  ;;  %v1545_v31 = vadd.f32 -0.42421293, %v1033_v25  ;;  %v1546_v32 = vadd.f32 -0.42421293, %v1034_v26  ;;  %v528_v38 = vld [vmem:[#allocation2 + $0xfc8] sm:$0xff] }
 0x204   :  { %v1547_v33 = vadd.f32 -0.42421293, %v1035_v27  ;;  %v1037_v35 = vmul.f32 3.2456994, %v525_v29  ;;  %v1038_v36 = vmul.f32 3.2456994, %v526_v30 }
 0x205   :  { %2057 = vst [vmem:[#allocation5 + $0xf90] sm:$0xff] %v1545_v31  ;;  %2058 = vst [vmem:[#allocation5 + $0xf98] sm:$0xff] %v1546_v32  ;;  %v529_v39 = vld [vmem:[#allocation2 + $0xfd0] sm:$0xff]  ;;  %v1548_v40 = vadd.f32 -0.42421293, %v1036_v34  ;;  %v530_v46 = vld [vmem:[#allocation2 + $0xfd8] sm:$0xff] }
 0x206   :  { %2059 = vst [vmem:[#allocation5 + $0xfa0] sm:$0xff] %v1547_v33  ;;  %v1549_v41 = vadd.f32 -0.42421293, %v1037_v35  ;;  %v1550_v42 = vadd.f32 -0.42421293, %v1038_v36  ;;  %v531_v47 = vld [vmem:[#allocation2 + $0xfe0] sm:$0xff] }
 0x207   :  { %v1039_v43 = vmul.f32 3.2456994, %v527_v37  ;;  %v1040_v44 = vmul.f32 3.2456994, %v528_v38  ;;  %v1041_v45 = vmul.f32 3.2456994, %v529_v39 }
 0x208   :  { %2060 = vst [vmem:[#allocation5 + $0xfa8] sm:$0xff] %v1548_v40  ;;  %2061 = vst [vmem:[#allocation5 + $0xfb0] sm:$0xff] %v1549_v41  ;;  %v532_v48 = vld [vmem:[#allocation2 + $0xfe8] sm:$0xff]  ;;  %v1042_v52 = vmul.f32 3.2456994, %v530_v46  ;;  %v533_v55 = vld [vmem:[#allocation2 + $0xff0] sm:$0xff] }
 0x209   :  { %2062 = vst [vmem:[#allocation5 + $0xfb8] sm:$0xff] %v1550_v42  ;;  %v1551_v49 = vadd.f32 -0.42421293, %v1039_v43  ;;  %v1552_v50 = vadd.f32 -0.42421293, %v1040_v44  ;;  %v534_v56 = vld [vmem:[#allocation2 + $0xff8] sm:$0xff] }
 0x20a   :  { %v1553_v51 = vadd.f32 -0.42421293, %v1041_v45  ;;  %v1043_v53 = vmul.f32 3.2456994, %v531_v47  ;;  %v1044_v54 = vmul.f32 3.2456994, %v532_v48 }
 0x20b   :  { %2063 = vst [vmem:[#allocation5 + $0xfc0] sm:$0xff] %v1551_v49  ;;  %2064 = vst [vmem:[#allocation5 + $0xfc8] sm:$0xff] %v1552_v50  ;;  %s2076_s13 = sshll.u32 %s2139_s0, 4  ;;  %v1554_v57 = vadd.f32 -0.42421293, %v1042_v52  ;;  %s2077_s13 = int_to_ptr.vmem [resolvable:$true] %s2076_s13 }
 0x20c   :  { %2065 = vst [vmem:[#allocation5 + $0xfd0] sm:$0xff] %v1553_v51  ;;  %v1555_v58 = vadd.f32 -0.42421293, %v1043_v53  ;;  %v1556_v59 = vadd.f32 -0.42421293, %v1044_v54  ;;  %s2112_s14 = scalar_lea.vmem %s2077_s13, 65536  ;;  %p2117_p6 = scmp.lt.s32.totalorder %s2077_s13, %s2077_s13 }
 0x20d   :  { %v1045_v60 = vmul.f32 3.2456994, %v533_v55  ;;  %v1046_v61 = vmul.f32 3.2456994, %v534_v56  ;;  %2066 = vst [vmem:[#allocation5 + $0xfd8] sm:$0xff] %v1554_v57  ;;  %p2113_p5 = scmp.ne.s32.totalorder %s2077_s13, %s2112_s14  ;;  %p2118_p7 = scmp.lt.s32.totalorder %s2112_s14, %s2112_s14 }
 0x20e   :  { %2067 = vst [vmem:[#allocation5 + $0xfe0] sm:$0xff] %v1555_v58  ;;  %2068 = vst [vmem:[#allocation5 + $0xfe8] sm:$0xff] %v1556_v59 }
 0x20f   :  { %v1557_v62 = vadd.f32 -0.42421293, %v1045_v60  ;;  %v1558_v63 = vadd.f32 -0.42421293, %v1046_v61  ;;  %p2119_p8 = por %p2118_p7, %p2117_p6 }
 0x211   :  { %2069 = vst [vmem:[#allocation5 + $0xff0] sm:$0xff] %v1557_v62  ;;  %2070 = vst [vmem:[#allocation5 + $0xff8] sm:$0xff] %v1558_v63  ;;  %p2120_p9 = pnand %p2119_p8, %p2113_p5 }
 0x213   :  { %2123 = shalt.err (!%p2120_p9)
}
 0x214   :  { %2082 = dma.vmem_to_hbm [thread:$0]  %s2077_s13, 65536, %s2163_s1, [#allocation4], %s2137_s9, %s2137_s9, %s2138_s10  }
 0x215   :  { %2134 = dma.done.wait [#allocation4], 65536  }
 0x216   :  { %2135 = vsyncadd [#allocation4], 4294901760 }
 0x217   :  { %2086 = vsyncpa [#allocation3], 1 }
 0x218   :  { %2087 = vsyncpa [#allocation4], 1 }

</bundles_post_ra>
